<compile_context>
chip_gen: v7x
topology: tpu7x:2x2x1
jax: 0.10.0
libtpu: 0.0.40
codegen_flags: <defaults>
</compile_context>

<pallas_src>
import functools

import jax
import jax.numpy as jnp
from jax import lax
from jax.experimental import pallas as pl
from jax.experimental.pallas import tpu as pltpu


_DEFAULT_TN = 256   # bf16 patch tile = 25*256*256*2 B ~ 3.3 MB, x2 for double
                    # buffering ~ 6.6 MB: fits every generation's default
                    # scoped VMEM (v5e 16 MiB, v6e/v7x 32 MiB) with headroom.


# ----------------------------- fused Pallas kernel -------------------------- #

def _disc_kernel(p_ref, w1_ref, b1_ref, w2_ref, b2_ref,
                 fc1_ref, fb1_ref, fc2_ref, fb2_ref,
                 o_ref, h2_ref):
    """One batch tile of the fused forward pass.

    p_ref   : (25, TN, 256) bf16  patches; dim0 = (oh2, ow2), cols (kh2,kw2,kh1,kw1)
    w1_ref  : (256, 16f)    bf16  kron(I_16, conv1 weight): conv1 output lands
                                  already in conv2-im2col column order (kh2,kw2,c)
    w2_ref  : (16f, 2f)     bf16
    fc1_ref : (25*2f, fc)   bf16  rows ordered (oh2, ow2, c2)
    fc2_ref : (1, fc)       f32   fc2 weight as a row (VPU/XLU reduction)
    h2_ref  : (TN, 25*2f)   f32   VMEM scratch, lane-dense conv2 activations
    o_ref   : (TN, 1)       f32   sigmoid scores
    """
    n_sp = p_ref.shape[0]                  # 25 spatial positions (5x5)
    c2 = w2_ref.shape[1]                   # 2 * f_dim

    def lrelu(v):                          # F.leaky_relu(v, 0.2): mul + max
        return jnp.maximum(v, 0.2 * v)

    # conv1 + conv2, one 5x5-output spatial position per (static) iteration.
    for s in range(n_sp):
        h1 = jnp.dot(p_ref[s], w1_ref[...],                    # (TN,256)@(256,16f)
                     preferred_element_type=jnp.float32)
        h1 = lrelu(h1 + b1_ref[...])                           # f32 activation math
        h2 = jnp.dot(h1.astype(w2_ref.dtype), w2_ref[...],     # (TN,16f)@(16f,2f)
                     preferred_element_type=jnp.float32)
        h2_ref[:, s * c2:(s + 1) * c2] = lrelu(h2 + b2_ref[...])

    # fc1: single lane-dense K=200 matmul over the whole (spatial, channel) axis.
    h3 = jnp.dot(h2_ref[...].astype(fc1_ref.dtype), fc1_ref[...],
                 preferred_element_type=jnp.float32)
    h3 = lrelu(h3 + fb1_ref[...])                              # (TN, fc)

    # fc2 + sigmoid: width-1 matmul replaced by a VPU/XLU reduction (MXU idle).
    z = jnp.sum(h3 * fc2_ref[...], axis=-1, keepdims=True) + fb2_ref[...]
    o_ref[...] = pl.reciprocal(1.0 + jnp.exp(-z), approx=False).astype(o_ref.dtype)


# ------------------------------- JAX glue ----------------------------------- #

def _build_patches(x, dtype=jnp.bfloat16):
    """x: (N, 1, 28, 28) NCHW -> (25, N, 256) bf16 patches feeding the kernel.

    patches[oh2*5 + ow2, n, (kh2*4 + kw2)*16 + (kh1*4 + kw1)]
        = x[n, 0, 4*oh2 + 2*kh2 + kh1, 4*ow2 + 2*kw2 + kw1]
    Casting to bf16 up-front halves the HBM traffic of the expanded slab.
    """
    n = x.shape[0]
    xs = x[:, 0].astype(dtype)                                       # (N, 28, 28)
    # conv1 im2col on the 13x13 conv1-output grid: last axis = (kh1, kw1)
    p1 = jnp.stack([xs[:, a:a + 26:2, b:b + 26:2]
                    for a in range(4) for b in range(4)], axis=-1)   # (N,13,13,16)
    # conv2 patch gather on the 5x5 conv2-output grid: axis 3 = (kh2, kw2)
    p2 = jnp.stack([p1[:, a:a + 9:2, b:b + 9:2, :]
                    for a in range(4) for b in range(4)], axis=3)    # (N,5,5,16,16)
    p2 = p2.transpose(1, 2, 0, 3, 4)                                 # (5,5,N,16,16)
    return p2.reshape(25, n, 256)


def prepare_params(params):
    """One-time weight prep (hoisted out of the per-forward path)."""
    f = params["w1"].shape[0]
    fc_dim = params["fc1_w"].shape[0]
    f32, bf16 = jnp.float32, jnp.bfloat16

    w1flat = params["w1"].astype(f32).reshape(f, 16).T               # (16,f), rows (kh1,kw1)
    # conv1 applied to all 16 conv2-window offsets at once: block-diagonal weight.
    w1k = jnp.kron(jnp.eye(16, dtype=f32), w1flat).astype(bf16)      # (256, 16f)
    b1w = jnp.tile(params["b1"].astype(f32), 16).reshape(1, 16 * f)

    # conv2 weight with rows ordered (kh2, kw2, c) to match w1k's column order.
    w2p = (params["w2"].astype(f32).transpose(2, 3, 1, 0)
           .reshape(16 * f, 2 * f).astype(bf16))
    b2 = params["b2"].astype(f32).reshape(1, 2 * f)

    # fc1 columns permuted from PyTorch's NCHW .view(N,-1) order (c2, oh2, ow2)
    # to the kernel's (oh2, ow2, c2) column-block order.
    fc1p = (params["fc1_w"].astype(f32)
            .reshape(fc_dim, 2 * f, 5, 5)
            .transpose(2, 3, 1, 0)
            .reshape(25 * 2 * f, fc_dim).astype(bf16))
    fb1 = params["fc1_b"].astype(f32).reshape(1, fc_dim)

    fc2r = params["fc2_w"].astype(f32).reshape(1, fc_dim)            # row, for VPU reduce
    fb2 = params["fc2_b"].astype(f32).reshape(1, 1)

    return dict(w1k=w1k, b1w=b1w, w2p=w2p, b2=b2,
                fc1p=fc1p, fb1=fb1, fc2r=fc2r, fb2=fb2)


def disc_forward(prep, x, tn=None):
    """x: (N, 1, 28, 28) NCHW -> (N, 1) sigmoid scores."""
    n = x.shape[0]
    if tn is None:
        tn = _DEFAULT_TN
    tn = min(tn, max(8, -(-n // 8) * 8))       # small batches: one 8-aligned tile
    tn = max(8, (tn // 8) * 8)                 # TN must be a multiple of 8 (sublane)
    n_pad = -(-n // tn) * tn
    if n_pad != n:
        x = jnp.pad(x, ((0, n_pad - n), (0, 0), (0, 0), (0, 0)))

    patches = _build_patches(x)                # (25, n_pad, 256) bf16
    c2 = prep["w2p"].shape[1]

    operands = (patches, prep["w1k"], prep["b1w"], prep["w2p"], prep["b2"],
                prep["fc1p"], prep["fb1"], prep["fc2r"], prep["fb2"])

    # patches: batch-tiled; weights/biases: constant index_map -> stay resident.
    in_specs = [pl.BlockSpec((25, tn, 256), lambda i: (0, i, 0))]
    in_specs += [pl.BlockSpec(a.shape, lambda i: (0, 0)) for a in operands[1:]]

    out = pl.pallas_call(
        _disc_kernel,
        out_shape=jax.ShapeDtypeStruct((n_pad, 1), jnp.float32),
        grid=(n_pad // tn,),
        in_specs=in_specs,
        out_specs=pl.BlockSpec((tn, 1), lambda i: (i, 0)),
        scratch_shapes=[pltpu.VMEM((tn, 25 * c2), jnp.float32)],
        compiler_params=pltpu.CompilerParams(
            dimension_semantics=("parallel",),
            vmem_limit_bytes=64 * 1024 * 1024),
    )(*operands)
    return out[:n]


# --------------------------- reference & init -------------------------------- #

def _reference_forward(params, x):
    """Pure-JAX reference with PyTorch semantics (sanity check only)."""
    dn = ("NCHW", "OIHW", "NCHW")
    hi = lax.Precision.HIGHEST

    def lrelu(v):
        return jnp.where(v >= 0.0, v, 0.2 * v)

    h = lax.conv_general_dilated(x, params["w1"], (2, 2), "VALID",
                                 dimension_numbers=dn, precision=hi)
    h = lrelu(h + params["b1"].reshape(1, -1, 1, 1))
    h = lax.conv_general_dilated(h, params["w2"], (2, 2), "VALID",
                                 dimension_numbers=dn, precision=hi)
    h = lrelu(h + params["b2"].reshape(1, -1, 1, 1))
    h = h.reshape(h.shape[0], -1)
    h = lrelu(jnp.dot(h, params["fc1_w"].T, precision=hi) + params["fc1_b"])
    z = jnp.dot(h, params["fc2_w"].T, precision=hi) + params["fc2_b"]
    return 1.0 / (1.0 + jnp.exp(-z))


def init_params(key, f_dim, fc_dim):
    """Deterministic init mimicking PyTorch default U(-1/sqrt(fan_in), 1/sqrt(fan_in))."""
    ks = jax.random.split(key, 8)

    def u(k, shape, fan_in):
        bound = 1.0 / float(fan_in) ** 0.5
        return jax.random.uniform(k, shape, jnp.float32, -bound, bound)

    return {
        "w1": u(ks[0], (f_dim, 1, 4, 4), 1 * 16),
        "b1": u(ks[1], (f_dim,), 1 * 16),
        "w2": u(ks[2], (2 * f_dim, f_dim, 4, 4), f_dim * 16),
        "b2": u(ks[3], (2 * f_dim,), f_dim * 16),
        "fc1_w": u(ks[4], (fc_dim, 2 * f_dim * 25), 2 * f_dim * 25),
        "fc1_b": u(ks[5], (fc_dim,), 2 * f_dim * 25),
        "fc2_w": u(ks[6], (1, fc_dim), fc_dim),
        "fc2_b": u(ks[7], (1,), fc_dim),
    }


if __name__ == "__main__":
    f_dim, fc_dim = 4, 32
    key = jax.random.PRNGKey(0)
    pkey, xkey, xkey2 = jax.random.split(key, 3)
    params = init_params(pkey, f_dim, fc_dim)
    prep = prepare_params(params)             # one-time weight prep, off the hot path

    # 28x28 single-channel input is implied by fc1's 2*f_dim*25 (5x5 after two convs).
    x = jax.random.normal(xkey, (2, 1, 28, 28), jnp.float32)
    y = jax.jit(disc_forward)(prep, x)
    jax.block_until_ready(y)
    assert y.shape == (2, 1) and y.dtype == jnp.float32
    assert bool(jnp.all((y >= 0.0) & (y <= 1.0)))
    y_ref = _reference_forward(params, x)
    assert bool(jnp.allclose(y, y_ref, atol=2e-2, rtol=0.0)), (y, y_ref)

    # Exercise the multi-tile grid + batch-padding path (TN=8 -> grid=(3,)).
    x2 = jax.random.normal(xkey2, (18, 1, 28, 28), jnp.float32)
    y2 = jax.jit(functools.partial(disc_forward, tn=8))(prep, x2)
    jax.block_until_ready(y2)
    y2_ref = _reference_forward(params, x2)
    assert y2.shape == (18, 1)
    assert bool(jnp.all((y2 >= 0.0) & (y2 <= 1.0)))
    assert bool(jnp.allclose(y2, y2_ref, atol=2e-2, rtol=0.0)), (y2, y2_ref)

    print("KERNEL_OK")
</pallas_src>

<mosaic_0001>
module attributes {stable_mosaic.version = 11 : i64} {
  func.func @_disc_kernel(%arg0: i32, %arg1: memref<25x8x256xbf16, #tpu.memory_space<vmem>>, %arg2: memref<256x64xbf16, #tpu.memory_space<vmem>>, %arg3: memref<1x64xf32, #tpu.memory_space<vmem>>, %arg4: memref<64x8xbf16, #tpu.memory_space<vmem>>, %arg5: memref<1x8xf32, #tpu.memory_space<vmem>>, %arg6: memref<200x32xbf16, #tpu.memory_space<vmem>>, %arg7: memref<1x32xf32, #tpu.memory_space<vmem>>, %arg8: memref<1x32xf32, #tpu.memory_space<vmem>>, %arg9: memref<1x1xf32, #tpu.memory_space<vmem>>, %arg10: memref<8x1xf32, #tpu.memory_space<vmem>>, %arg11: memref<8x200xf32, #tpu.memory_space<vmem>>) attributes {dimension_semantics = [#tpu.dimension_semantics<parallel>], iteration_bounds = array<i64: 1>, scalar_prefetch = 0 : i64, scratch_operands = 1 : i64, tpu.core_type = #tpu.core_type<tc>, window_params = [{transform_indices = @transform_0, window_bounds = array<i64: 25, 8, 256>}, {pipeline_mode = #tpu.pipeline_mode<synchronous>, transform_indices = @transform_1, window_bounds = array<i64: 256, 64>}, {pipeline_mode = #tpu.pipeline_mode<synchronous>, transform_indices = @transform_2, window_bounds = array<i64: 1, 64>}, {pipeline_mode = #tpu.pipeline_mode<synchronous>, transform_indices = @transform_3, window_bounds = array<i64: 64, 8>}, {pipeline_mode = #tpu.pipeline_mode<synchronous>, transform_indices = @transform_4, window_bounds = array<i64: 1, 8>}, {pipeline_mode = #tpu.pipeline_mode<synchronous>, transform_indices = @transform_5, window_bounds = array<i64: 200, 32>}, {pipeline_mode = #tpu.pipeline_mode<synchronous>, transform_indices = @transform_6, window_bounds = array<i64: 1, 32>}, {pipeline_mode = #tpu.pipeline_mode<synchronous>, transform_indices = @transform_7, window_bounds = array<i64: 1, 32>}, {pipeline_mode = #tpu.pipeline_mode<synchronous>, transform_indices = @transform_8, window_bounds = array<i64: 1, 1>}, {transform_indices = @transform_9, window_bounds = array<i64: 8, 1>}]} {
    %c0 = arith.constant 0 : index
    %c0_0 = arith.constant 0 : index
    %c0_1 = arith.constant 0 : index
    %0 = vector.load %arg1[%c0, %c0_0, %c0_1] : memref<25x8x256xbf16, #tpu.memory_space<vmem>>, vector<1x8x256xbf16>
    %1 = vector.shape_cast %0 : vector<1x8x256xbf16> to vector<8x256xbf16>
    %c0_2 = arith.constant 0 : index
    %c0_3 = arith.constant 0 : index
    %2 = vector.load %arg2[%c0_2, %c0_3] : memref<256x64xbf16, #tpu.memory_space<vmem>>, vector<256x64xbf16>
    %cst = arith.constant dense<0.000000e+00> : vector<8x64xf32>
    %3 = tpu.matmul %1, %2, %cst {dimension_numbers = #tpu.dot_dimension_numbers<[1], [0], [0], [1], [0, 0, 1, 1], [], []>} : vector<8x256xbf16>, vector<256x64xbf16>, vector<8x64xf32> -> vector<8x64xf32>
    %c0_4 = arith.constant 0 : index
    %c0_5 = arith.constant 0 : index
    %4 = vector.load %arg3[%c0_4, %c0_5] : memref<1x64xf32, #tpu.memory_space<vmem>>, vector<1x64xf32>
    %5 = vector.broadcast %4 : vector<1x64xf32> to vector<8x64xf32>
    %6 = arith.addf %3, %5 : vector<8x64xf32>
    %cst_6 = arith.constant 2.000000e-01 : f32
    %7 = vector.broadcast %cst_6 : f32 to vector<8x64xf32>
    %8 = arith.mulf %7, %6 : vector<8x64xf32>
    %9 = arith.maximumf %6, %8 : vector<8x64xf32>
    %10 = arith.truncf %9 : vector<8x64xf32> to vector<8x64xbf16>
    %c0_7 = arith.constant 0 : index
    %c0_8 = arith.constant 0 : index
    %11 = vector.load %arg4[%c0_7, %c0_8] : memref<64x8xbf16, #tpu.memory_space<vmem>>, vector<64x8xbf16>
    %cst_9 = arith.constant dense<0.000000e+00> : vector<8x8xf32>
    %12 = tpu.matmul %10, %11, %cst_9 {dimension_numbers = #tpu.dot_dimension_numbers<[1], [0], [0], [1], [0, 0, 1, 1], [], []>} : vector<8x64xbf16>, vector<64x8xbf16>, vector<8x8xf32> -> vector<8x8xf32>
    %c0_10 = arith.constant 0 : index
    %c0_11 = arith.constant 0 : index
    %13 = vector.load %arg5[%c0_10, %c0_11] : memref<1x8xf32, #tpu.memory_space<vmem>>, vector<1x8xf32>
    %14 = vector.broadcast %13 : vector<1x8xf32> to vector<8x8xf32>
    %15 = arith.addf %12, %14 : vector<8x8xf32>
    %cst_12 = arith.constant 2.000000e-01 : f32
    %16 = vector.broadcast %cst_12 : f32 to vector<8x8xf32>
    %17 = arith.mulf %16, %15 : vector<8x8xf32>
    %18 = arith.maximumf %15, %17 : vector<8x8xf32>
    %c0_13 = arith.constant 0 : index
    %c0_14 = arith.constant 0 : index
    %19 = vector.load %arg11[%c0_13, %c0_14] : memref<8x200xf32, #tpu.memory_space<vmem>>, vector<8x8xf32>
    tpu.vector_store %arg11[%c0_13, %c0_14], %18 {strides = array<i32>} : memref<8x200xf32, #tpu.memory_space<vmem>>, vector<8x8xf32>,
    %c1 = arith.constant 1 : index
    %c0_15 = arith.constant 0 : index
    %c0_16 = arith.constant 0 : index
    %20 = vector.load %arg1[%c1, %c0_15, %c0_16] : memref<25x8x256xbf16, #tpu.memory_space<vmem>>, vector<1x8x256xbf16>
    %21 = vector.shape_cast %20 : vector<1x8x256xbf16> to vector<8x256xbf16>
    %c0_17 = arith.constant 0 : index
    %c0_18 = arith.constant 0 : index
    %22 = vector.load %arg2[%c0_17, %c0_18] : memref<256x64xbf16, #tpu.memory_space<vmem>>, vector<256x64xbf16>
    %cst_19 = arith.constant dense<0.000000e+00> : vector<8x64xf32>
    %23 = tpu.matmul %21, %22, %cst_19 {dimension_numbers = #tpu.dot_dimension_numbers<[1], [0], [0], [1], [0, 0, 1, 1], [], []>} : vector<8x256xbf16>, vector<256x64xbf16>, vector<8x64xf32> -> vector<8x64xf32>
    %c0_20 = arith.constant 0 : index
    %c0_21 = arith.constant 0 : index
    %24 = vector.load %arg3[%c0_20, %c0_21] : memref<1x64xf32, #tpu.memory_space<vmem>>, vector<1x64xf32>
    %25 = vector.broadcast %24 : vector<1x64xf32> to vector<8x64xf32>
    %26 = arith.addf %23, %25 : vector<8x64xf32>
    %cst_22 = arith.constant 2.000000e-01 : f32
    %27 = vector.broadcast %cst_22 : f32 to vector<8x64xf32>
    %28 = arith.mulf %27, %26 : vector<8x64xf32>
    %29 = arith.maximumf %26, %28 : vector<8x64xf32>
    %30 = arith.truncf %29 : vector<8x64xf32> to vector<8x64xbf16>
    %c0_23 = arith.constant 0 : index
    %c0_24 = arith.constant 0 : index
    %31 = vector.load %arg4[%c0_23, %c0_24] : memref<64x8xbf16, #tpu.memory_space<vmem>>, vector<64x8xbf16>
    %cst_25 = arith.constant dense<0.000000e+00> : vector<8x8xf32>
    %32 = tpu.matmul %30, %31, %cst_25 {dimension_numbers = #tpu.dot_dimension_numbers<[1], [0], [0], [1], [0, 0, 1, 1], [], []>} : vector<8x64xbf16>, vector<64x8xbf16>, vector<8x8xf32> -> vector<8x8xf32>
    %c0_26 = arith.constant 0 : index
    %c0_27 = arith.constant 0 : index
    %33 = vector.load %arg5[%c0_26, %c0_27] : memref<1x8xf32, #tpu.memory_space<vmem>>, vector<1x8xf32>
    %34 = vector.broadcast %33 : vector<1x8xf32> to vector<8x8xf32>
    %35 = arith.addf %32, %34 : vector<8x8xf32>
    %cst_28 = arith.constant 2.000000e-01 : f32
    %36 = vector.broadcast %cst_28 : f32 to vector<8x8xf32>
    %37 = arith.mulf %36, %35 : vector<8x8xf32>
    %38 = arith.maximumf %35, %37 : vector<8x8xf32>
    %c0_29 = arith.constant 0 : index
    %c8 = arith.constant 8 : index
    %39 = vector.load %arg11[%c0_29, %c8] : memref<8x200xf32, #tpu.memory_space<vmem>>, vector<8x8xf32>
    tpu.vector_store %arg11[%c0_29, %c8], %38 {strides = array<i32>} : memref<8x200xf32, #tpu.memory_space<vmem>>, vector<8x8xf32>,
    %c2 = arith.constant 2 : index
    %c0_30 = arith.constant 0 : index
    %c0_31 = arith.constant 0 : index
    %40 = vector.load %arg1[%c2, %c0_30, %c0_31] : memref<25x8x256xbf16, #tpu.memory_space<vmem>>, vector<1x8x256xbf16>
    %41 = vector.shape_cast %40 : vector<1x8x256xbf16> to vector<8x256xbf16>
    %c0_32 = arith.constant 0 : index
    %c0_33 = arith.constant 0 : index
    %42 = vector.load %arg2[%c0_32, %c0_33] : memref<256x64xbf16, #tpu.memory_space<vmem>>, vector<256x64xbf16>
    %cst_34 = arith.constant dense<0.000000e+00> : vector<8x64xf32>
    %43 = tpu.matmul %41, %42, %cst_34 {dimension_numbers = #tpu.dot_dimension_numbers<[1], [0], [0], [1], [0, 0, 1, 1], [], []>} : vector<8x256xbf16>, vector<256x64xbf16>, vector<8x64xf32> -> vector<8x64xf32>
    %c0_35 = arith.constant 0 : index
    %c0_36 = arith.constant 0 : index
    %44 = vector.load %arg3[%c0_35, %c0_36] : memref<1x64xf32, #tpu.memory_space<vmem>>, vector<1x64xf32>
    %45 = vector.broadcast %44 : vector<1x64xf32> to vector<8x64xf32>
    %46 = arith.addf %43, %45 : vector<8x64xf32>
    %cst_37 = arith.constant 2.000000e-01 : f32
    %47 = vector.broadcast %cst_37 : f32 to vector<8x64xf32>
    %48 = arith.mulf %47, %46 : vector<8x64xf32>
    %49 = arith.maximumf %46, %48 : vector<8x64xf32>
    %50 = arith.truncf %49 : vector<8x64xf32> to vector<8x64xbf16>
    %c0_38 = arith.constant 0 : index
    %c0_39 = arith.constant 0 : index
    %51 = vector.load %arg4[%c0_38, %c0_39] : memref<64x8xbf16, #tpu.memory_space<vmem>>, vector<64x8xbf16>
    %cst_40 = arith.constant dense<0.000000e+00> : vector<8x8xf32>
    %52 = tpu.matmul %50, %51, %cst_40 {dimension_numbers = #tpu.dot_dimension_numbers<[1], [0], [0], [1], [0, 0, 1, 1], [], []>} : vector<8x64xbf16>, vector<64x8xbf16>, vector<8x8xf32> -> vector<8x8xf32>
    %c0_41 = arith.constant 0 : index
    %c0_42 = arith.constant 0 : index
    %53 = vector.load %arg5[%c0_41, %c0_42] : memref<1x8xf32, #tpu.memory_space<vmem>>, vector<1x8xf32>
    %54 = vector.broadcast %53 : vector<1x8xf32> to vector<8x8xf32>
    %55 = arith.addf %52, %54 : vector<8x8xf32>
    %cst_43 = arith.constant 2.000000e-01 : f32
    %56 = vector.broadcast %cst_43 : f32 to vector<8x8xf32>
    %57 = arith.mulf %56, %55 : vector<8x8xf32>
    %58 = arith.maximumf %55, %57 : vector<8x8xf32>
    %c0_44 = arith.constant 0 : index
    %c16 = arith.constant 16 : index
    %59 = vector.load %arg11[%c0_44, %c16] : memref<8x200xf32, #tpu.memory_space<vmem>>, vector<8x8xf32>
    tpu.vector_store %arg11[%c0_44, %c16], %58 {strides = array<i32>} : memref<8x200xf32, #tpu.memory_space<vmem>>, vector<8x8xf32>,
    %c3 = arith.constant 3 : index
    %c0_45 = arith.constant 0 : index
    %c0_46 = arith.constant 0 : index
    %60 = vector.load %arg1[%c3, %c0_45, %c0_46] : memref<25x8x256xbf16, #tpu.memory_space<vmem>>, vector<1x8x256xbf16>
    %61 = vector.shape_cast %60 : vector<1x8x256xbf16> to vector<8x256xbf16>
    %c0_47 = arith.constant 0 : index
    %c0_48 = arith.constant 0 : index
    %62 = vector.load %arg2[%c0_47, %c0_48] : memref<256x64xbf16, #tpu.memory_space<vmem>>, vector<256x64xbf16>
    %cst_49 = arith.constant dense<0.000000e+00> : vector<8x64xf32>
    %63 = tpu.matmul %61, %62, %cst_49 {dimension_numbers = #tpu.dot_dimension_numbers<[1], [0], [0], [1], [0, 0, 1, 1], [], []>} : vector<8x256xbf16>, vector<256x64xbf16>, vector<8x64xf32> -> vector<8x64xf32>
    %c0_50 = arith.constant 0 : index
    %c0_51 = arith.constant 0 : index
    %64 = vector.load %arg3[%c0_50, %c0_51] : memref<1x64xf32, #tpu.memory_space<vmem>>, vector<1x64xf32>
    %65 = vector.broadcast %64 : vector<1x64xf32> to vector<8x64xf32>
    %66 = arith.addf %63, %65 : vector<8x64xf32>
    %cst_52 = arith.constant 2.000000e-01 : f32
    %67 = vector.broadcast %cst_52 : f32 to vector<8x64xf32>
    %68 = arith.mulf %67, %66 : vector<8x64xf32>
    %69 = arith.maximumf %66, %68 : vector<8x64xf32>
    %70 = arith.truncf %69 : vector<8x64xf32> to vector<8x64xbf16>
    %c0_53 = arith.constant 0 : index
    %c0_54 = arith.constant 0 : index
    %71 = vector.load %arg4[%c0_53, %c0_54] : memref<64x8xbf16, #tpu.memory_space<vmem>>, vector<64x8xbf16>
    %cst_55 = arith.constant dense<0.000000e+00> : vector<8x8xf32>
    %72 = tpu.matmul %70, %71, %cst_55 {dimension_numbers = #tpu.dot_dimension_numbers<[1], [0], [0], [1], [0, 0, 1, 1], [], []>} : vector<8x64xbf16>, vector<64x8xbf16>, vector<8x8xf32> -> vector<8x8xf32>
    %c0_56 = arith.constant 0 : index
    %c0_57 = arith.constant 0 : index
    %73 = vector.load %arg5[%c0_56, %c0_57] : memref<1x8xf32, #tpu.memory_space<vmem>>, vector<1x8xf32>
    %74 = vector.broadcast %73 : vector<1x8xf32> to vector<8x8xf32>
    %75 = arith.addf %72, %74 : vector<8x8xf32>
    %cst_58 = arith.constant 2.000000e-01 : f32
    %76 = vector.broadcast %cst_58 : f32 to vector<8x8xf32>
    %77 = arith.mulf %76, %75 : vector<8x8xf32>
    %78 = arith.maximumf %75, %77 : vector<8x8xf32>
    %c0_59 = arith.constant 0 : index
    %c24 = arith.constant 24 : index
    %79 = vector.load %arg11[%c0_59, %c24] : memref<8x200xf32, #tpu.memory_space<vmem>>, vector<8x8xf32>
    tpu.vector_store %arg11[%c0_59, %c24], %78 {strides = array<i32>} : memref<8x200xf32, #tpu.memory_space<vmem>>, vector<8x8xf32>,
    %c4 = arith.constant 4 : index
    %c0_60 = arith.constant 0 : index
    %c0_61 = arith.constant 0 : index
    %80 = vector.load %arg1[%c4, %c0_60, %c0_61] : memref<25x8x256xbf16, #tpu.memory_space<vmem>>, vector<1x8x256xbf16>
    %81 = vector.shape_cast %80 : vector<1x8x256xbf16> to vector<8x256xbf16>
    %c0_62 = arith.constant 0 : index
    %c0_63 = arith.constant 0 : index
    %82 = vector.load %arg2[%c0_62, %c0_63] : memref<256x64xbf16, #tpu.memory_space<vmem>>, vector<256x64xbf16>
    %cst_64 = arith.constant dense<0.000000e+00> : vector<8x64xf32>
    %83 = tpu.matmul %81, %82, %cst_64 {dimension_numbers = #tpu.dot_dimension_numbers<[1], [0], [0], [1], [0, 0, 1, 1], [], []>} : vector<8x256xbf16>, vector<256x64xbf16>, vector<8x64xf32> -> vector<8x64xf32>
    %c0_65 = arith.constant 0 : index
    %c0_66 = arith.constant 0 : index
    %84 = vector.load %arg3[%c0_65, %c0_66] : memref<1x64xf32, #tpu.memory_space<vmem>>, vector<1x64xf32>
    %85 = vector.broadcast %84 : vector<1x64xf32> to vector<8x64xf32>
    %86 = arith.addf %83, %85 : vector<8x64xf32>
    %cst_67 = arith.constant 2.000000e-01 : f32
    %87 = vector.broadcast %cst_67 : f32 to vector<8x64xf32>
    %88 = arith.mulf %87, %86 : vector<8x64xf32>
    %89 = arith.maximumf %86, %88 : vector<8x64xf32>
    %90 = arith.truncf %89 : vector<8x64xf32> to vector<8x64xbf16>
    %c0_68 = arith.constant 0 : index
    %c0_69 = arith.constant 0 : index
    %91 = vector.load %arg4[%c0_68, %c0_69] : memref<64x8xbf16, #tpu.memory_space<vmem>>, vector<64x8xbf16>
    %cst_70 = arith.constant dense<0.000000e+00> : vector<8x8xf32>
    %92 = tpu.matmul %90, %91, %cst_70 {dimension_numbers = #tpu.dot_dimension_numbers<[1], [0], [0], [1], [0, 0, 1, 1], [], []>} : vector<8x64xbf16>, vector<64x8xbf16>, vector<8x8xf32> -> vector<8x8xf32>
    %c0_71 = arith.constant 0 : index
    %c0_72 = arith.constant 0 : index
    %93 = vector.load %arg5[%c0_71, %c0_72] : memref<1x8xf32, #tpu.memory_space<vmem>>, vector<1x8xf32>
    %94 = vector.broadcast %93 : vector<1x8xf32> to vector<8x8xf32>
    %95 = arith.addf %92, %94 : vector<8x8xf32>
    %cst_73 = arith.constant 2.000000e-01 : f32
    %96 = vector.broadcast %cst_73 : f32 to vector<8x8xf32>
    %97 = arith.mulf %96, %95 : vector<8x8xf32>
    %98 = arith.maximumf %95, %97 : vector<8x8xf32>
    %c0_74 = arith.constant 0 : index
    %c32 = arith.constant 32 : index
    %99 = vector.load %arg11[%c0_74, %c32] : memref<8x200xf32, #tpu.memory_space<vmem>>, vector<8x8xf32>
    tpu.vector_store %arg11[%c0_74, %c32], %98 {strides = array<i32>} : memref<8x200xf32, #tpu.memory_space<vmem>>, vector<8x8xf32>,
    %c5 = arith.constant 5 : index
    %c0_75 = arith.constant 0 : index
    %c0_76 = arith.constant 0 : index
    %100 = vector.load %arg1[%c5, %c0_75, %c0_76] : memref<25x8x256xbf16, #tpu.memory_space<vmem>>, vector<1x8x256xbf16>
    %101 = vector.shape_cast %100 : vector<1x8x256xbf16> to vector<8x256xbf16>
    %c0_77 = arith.constant 0 : index
    %c0_78 = arith.constant 0 : index
    %102 = vector.load %arg2[%c0_77, %c0_78] : memref<256x64xbf16, #tpu.memory_space<vmem>>, vector<256x64xbf16>
    %cst_79 = arith.constant dense<0.000000e+00> : vector<8x64xf32>
    %103 = tpu.matmul %101, %102, %cst_79 {dimension_numbers = #tpu.dot_dimension_numbers<[1], [0], [0], [1], [0, 0, 1, 1], [], []>} : vector<8x256xbf16>, vector<256x64xbf16>, vector<8x64xf32> -> vector<8x64xf32>
    %c0_80 = arith.constant 0 : index
    %c0_81 = arith.constant 0 : index
    %104 = vector.load %arg3[%c0_80, %c0_81] : memref<1x64xf32, #tpu.memory_space<vmem>>, vector<1x64xf32>
    %105 = vector.broadcast %104 : vector<1x64xf32> to vector<8x64xf32>
    %106 = arith.addf %103, %105 : vector<8x64xf32>
    %cst_82 = arith.constant 2.000000e-01 : f32
    %107 = vector.broadcast %cst_82 : f32 to vector<8x64xf32>
    %108 = arith.mulf %107, %106 : vector<8x64xf32>
    %109 = arith.maximumf %106, %108 : vector<8x64xf32>
    %110 = arith.truncf %109 : vector<8x64xf32> to vector<8x64xbf16>
    %c0_83 = arith.constant 0 : index
    %c0_84 = arith.constant 0 : index
    %111 = vector.load %arg4[%c0_83, %c0_84] : memref<64x8xbf16, #tpu.memory_space<vmem>>, vector<64x8xbf16>
    %cst_85 = arith.constant dense<0.000000e+00> : vector<8x8xf32>
    %112 = tpu.matmul %110, %111, %cst_85 {dimension_numbers = #tpu.dot_dimension_numbers<[1], [0], [0], [1], [0, 0, 1, 1], [], []>} : vector<8x64xbf16>, vector<64x8xbf16>, vector<8x8xf32> -> vector<8x8xf32>
    %c0_86 = arith.constant 0 : index
    %c0_87 = arith.constant 0 : index
    %113 = vector.load %arg5[%c0_86, %c0_87] : memref<1x8xf32, #tpu.memory_space<vmem>>, vector<1x8xf32>
    %114 = vector.broadcast %113 : vector<1x8xf32> to vector<8x8xf32>
    %115 = arith.addf %112, %114 : vector<8x8xf32>
    %cst_88 = arith.constant 2.000000e-01 : f32
    %116 = vector.broadcast %cst_88 : f32 to vector<8x8xf32>
    %117 = arith.mulf %116, %115 : vector<8x8xf32>
    %118 = arith.maximumf %115, %117 : vector<8x8xf32>
    %c0_89 = arith.constant 0 : index
    %c40 = arith.constant 40 : index
    %119 = vector.load %arg11[%c0_89, %c40] : memref<8x200xf32, #tpu.memory_space<vmem>>, vector<8x8xf32>
    tpu.vector_store %arg11[%c0_89, %c40], %118 {strides = array<i32>} : memref<8x200xf32, #tpu.memory_space<vmem>>, vector<8x8xf32>,
    %c6 = arith.constant 6 : index
    %c0_90 = arith.constant 0 : index
    %c0_91 = arith.constant 0 : index
    %120 = vector.load %arg1[%c6, %c0_90, %c0_91] : memref<25x8x256xbf16, #tpu.memory_space<vmem>>, vector<1x8x256xbf16>
    %121 = vector.shape_cast %120 : vector<1x8x256xbf16> to vector<8x256xbf16>
    %c0_92 = arith.constant 0 : index
    %c0_93 = arith.constant 0 : index
    %122 = vector.load %arg2[%c0_92, %c0_93] : memref<256x64xbf16, #tpu.memory_space<vmem>>, vector<256x64xbf16>
    %cst_94 = arith.constant dense<0.000000e+00> : vector<8x64xf32>
    %123 = tpu.matmul %121, %122, %cst_94 {dimension_numbers = #tpu.dot_dimension_numbers<[1], [0], [0], [1], [0, 0, 1, 1], [], []>} : vector<8x256xbf16>, vector<256x64xbf16>, vector<8x64xf32> -> vector<8x64xf32>
    %c0_95 = arith.constant 0 : index
    %c0_96 = arith.constant 0 : index
    %124 = vector.load %arg3[%c0_95, %c0_96] : memref<1x64xf32, #tpu.memory_space<vmem>>, vector<1x64xf32>
    %125 = vector.broadcast %124 : vector<1x64xf32> to vector<8x64xf32>
    %126 = arith.addf %123, %125 : vector<8x64xf32>
    %cst_97 = arith.constant 2.000000e-01 : f32
    %127 = vector.broadcast %cst_97 : f32 to vector<8x64xf32>
    %128 = arith.mulf %127, %126 : vector<8x64xf32>
    %129 = arith.maximumf %126, %128 : vector<8x64xf32>
    %130 = arith.truncf %129 : vector<8x64xf32> to vector<8x64xbf16>
    %c0_98 = arith.constant 0 : index
    %c0_99 = arith.constant 0 : index
    %131 = vector.load %arg4[%c0_98, %c0_99] : memref<64x8xbf16, #tpu.memory_space<vmem>>, vector<64x8xbf16>
    %cst_100 = arith.constant dense<0.000000e+00> : vector<8x8xf32>
    %132 = tpu.matmul %130, %131, %cst_100 {dimension_numbers = #tpu.dot_dimension_numbers<[1], [0], [0], [1], [0, 0, 1, 1], [], []>} : vector<8x64xbf16>, vector<64x8xbf16>, vector<8x8xf32> -> vector<8x8xf32>
    %c0_101 = arith.constant 0 : index
    %c0_102 = arith.constant 0 : index
    %133 = vector.load %arg5[%c0_101, %c0_102] : memref<1x8xf32, #tpu.memory_space<vmem>>, vector<1x8xf32>
    %134 = vector.broadcast %133 : vector<1x8xf32> to vector<8x8xf32>
    %135 = arith.addf %132, %134 : vector<8x8xf32>
    %cst_103 = arith.constant 2.000000e-01 : f32
    %136 = vector.broadcast %cst_103 : f32 to vector<8x8xf32>
    %137 = arith.mulf %136, %135 : vector<8x8xf32>
    %138 = arith.maximumf %135, %137 : vector<8x8xf32>
    %c0_104 = arith.constant 0 : index
    %c48 = arith.constant 48 : index
    %139 = vector.load %arg11[%c0_104, %c48] : memref<8x200xf32, #tpu.memory_space<vmem>>, vector<8x8xf32>
    tpu.vector_store %arg11[%c0_104, %c48], %138 {strides = array<i32>} : memref<8x200xf32, #tpu.memory_space<vmem>>, vector<8x8xf32>,
    %c7 = arith.constant 7 : index
    %c0_105 = arith.constant 0 : index
    %c0_106 = arith.constant 0 : index
    %140 = vector.load %arg1[%c7, %c0_105, %c0_106] : memref<25x8x256xbf16, #tpu.memory_space<vmem>>, vector<1x8x256xbf16>
    %141 = vector.shape_cast %140 : vector<1x8x256xbf16> to vector<8x256xbf16>
    %c0_107 = arith.constant 0 : index
    %c0_108 = arith.constant 0 : index
    %142 = vector.load %arg2[%c0_107, %c0_108] : memref<256x64xbf16, #tpu.memory_space<vmem>>, vector<256x64xbf16>
    %cst_109 = arith.constant dense<0.000000e+00> : vector<8x64xf32>
    %143 = tpu.matmul %141, %142, %cst_109 {dimension_numbers = #tpu.dot_dimension_numbers<[1], [0], [0], [1], [0, 0, 1, 1], [], []>} : vector<8x256xbf16>, vector<256x64xbf16>, vector<8x64xf32> -> vector<8x64xf32>
    %c0_110 = arith.constant 0 : index
    %c0_111 = arith.constant 0 : index
    %144 = vector.load %arg3[%c0_110, %c0_111] : memref<1x64xf32, #tpu.memory_space<vmem>>, vector<1x64xf32>
    %145 = vector.broadcast %144 : vector<1x64xf32> to vector<8x64xf32>
    %146 = arith.addf %143, %145 : vector<8x64xf32>
    %cst_112 = arith.constant 2.000000e-01 : f32
    %147 = vector.broadcast %cst_112 : f32 to vector<8x64xf32>
    %148 = arith.mulf %147, %146 : vector<8x64xf32>
    %149 = arith.maximumf %146, %148 : vector<8x64xf32>
    %150 = arith.truncf %149 : vector<8x64xf32> to vector<8x64xbf16>
    %c0_113 = arith.constant 0 : index
    %c0_114 = arith.constant 0 : index
    %151 = vector.load %arg4[%c0_113, %c0_114] : memref<64x8xbf16, #tpu.memory_space<vmem>>, vector<64x8xbf16>
    %cst_115 = arith.constant dense<0.000000e+00> : vector<8x8xf32>
    %152 = tpu.matmul %150, %151, %cst_115 {dimension_numbers = #tpu.dot_dimension_numbers<[1], [0], [0], [1], [0, 0, 1, 1], [], []>} : vector<8x64xbf16>, vector<64x8xbf16>, vector<8x8xf32> -> vector<8x8xf32>
    %c0_116 = arith.constant 0 : index
    %c0_117 = arith.constant 0 : index
    %153 = vector.load %arg5[%c0_116, %c0_117] : memref<1x8xf32, #tpu.memory_space<vmem>>, vector<1x8xf32>
    %154 = vector.broadcast %153 : vector<1x8xf32> to vector<8x8xf32>
    %155 = arith.addf %152, %154 : vector<8x8xf32>
    %cst_118 = arith.constant 2.000000e-01 : f32
    %156 = vector.broadcast %cst_118 : f32 to vector<8x8xf32>
    %157 = arith.mulf %156, %155 : vector<8x8xf32>
    %158 = arith.maximumf %155, %157 : vector<8x8xf32>
    %c0_119 = arith.constant 0 : index
    %c56 = arith.constant 56 : index
    %159 = vector.load %arg11[%c0_119, %c56] : memref<8x200xf32, #tpu.memory_space<vmem>>, vector<8x8xf32>
    tpu.vector_store %arg11[%c0_119, %c56], %158 {strides = array<i32>} : memref<8x200xf32, #tpu.memory_space<vmem>>, vector<8x8xf32>,
    %c8_120 = arith.constant 8 : index
    %c0_121 = arith.constant 0 : index
    %c0_122 = arith.constant 0 : index
    %160 = vector.load %arg1[%c8_120, %c0_121, %c0_122] : memref<25x8x256xbf16, #tpu.memory_space<vmem>>, vector<1x8x256xbf16>
    %161 = vector.shape_cast %160 : vector<1x8x256xbf16> to vector<8x256xbf16>
    %c0_123 = arith.constant 0 : index
    %c0_124 = arith.constant 0 : index
    %162 = vector.load %arg2[%c0_123, %c0_124] : memref<256x64xbf16, #tpu.memory_space<vmem>>, vector<256x64xbf16>
    %cst_125 = arith.constant dense<0.000000e+00> : vector<8x64xf32>
    %163 = tpu.matmul %161, %162, %cst_125 {dimension_numbers = #tpu.dot_dimension_numbers<[1], [0], [0], [1], [0, 0, 1, 1], [], []>} : vector<8x256xbf16>, vector<256x64xbf16>, vector<8x64xf32> -> vector<8x64xf32>
    %c0_126 = arith.constant 0 : index
    %c0_127 = arith.constant 0 : index
    %164 = vector.load %arg3[%c0_126, %c0_127] : memref<1x64xf32, #tpu.memory_space<vmem>>, vector<1x64xf32>
    %165 = vector.broadcast %164 : vector<1x64xf32> to vector<8x64xf32>
    %166 = arith.addf %163, %165 : vector<8x64xf32>
    %cst_128 = arith.constant 2.000000e-01 : f32
    %167 = vector.broadcast %cst_128 : f32 to vector<8x64xf32>
    %168 = arith.mulf %167, %166 : vector<8x64xf32>
    %169 = arith.maximumf %166, %168 : vector<8x64xf32>
    %170 = arith.truncf %169 : vector<8x64xf32> to vector<8x64xbf16>
    %c0_129 = arith.constant 0 : index
    %c0_130 = arith.constant 0 : index
    %171 = vector.load %arg4[%c0_129, %c0_130] : memref<64x8xbf16, #tpu.memory_space<vmem>>, vector<64x8xbf16>
    %cst_131 = arith.constant dense<0.000000e+00> : vector<8x8xf32>
    %172 = tpu.matmul %170, %171, %cst_131 {dimension_numbers = #tpu.dot_dimension_numbers<[1], [0], [0], [1], [0, 0, 1, 1], [], []>} : vector<8x64xbf16>, vector<64x8xbf16>, vector<8x8xf32> -> vector<8x8xf32>
    %c0_132 = arith.constant 0 : index
    %c0_133 = arith.constant 0 : index
    %173 = vector.load %arg5[%c0_132, %c0_133] : memref<1x8xf32, #tpu.memory_space<vmem>>, vector<1x8xf32>
    %174 = vector.broadcast %173 : vector<1x8xf32> to vector<8x8xf32>
    %175 = arith.addf %172, %174 : vector<8x8xf32>
    %cst_134 = arith.constant 2.000000e-01 : f32
    %176 = vector.broadcast %cst_134 : f32 to vector<8x8xf32>
    %177 = arith.mulf %176, %175 : vector<8x8xf32>
    %178 = arith.maximumf %175, %177 : vector<8x8xf32>
    %c0_135 = arith.constant 0 : index
    %c64 = arith.constant 64 : index
    %179 = vector.load %arg11[%c0_135, %c64] : memref<8x200xf32, #tpu.memory_space<vmem>>, vector<8x8xf32>
    tpu.vector_store %arg11[%c0_135, %c64], %178 {strides = array<i32>} : memref<8x200xf32, #tpu.memory_space<vmem>>, vector<8x8xf32>,
    %c9 = arith.constant 9 : index
    %c0_136 = arith.constant 0 : index
    %c0_137 = arith.constant 0 : index
    %180 = vector.load %arg1[%c9, %c0_136, %c0_137] : memref<25x8x256xbf16, #tpu.memory_space<vmem>>, vector<1x8x256xbf16>
    %181 = vector.shape_cast %180 : vector<1x8x256xbf16> to vector<8x256xbf16>
    %c0_138 = arith.constant 0 : index
    %c0_139 = arith.constant 0 : index
    %182 = vector.load %arg2[%c0_138, %c0_139] : memref<256x64xbf16, #tpu.memory_space<vmem>>, vector<256x64xbf16>
    %cst_140 = arith.constant dense<0.000000e+00> : vector<8x64xf32>
    %183 = tpu.matmul %181, %182, %cst_140 {dimension_numbers = #tpu.dot_dimension_numbers<[1], [0], [0], [1], [0, 0, 1, 1], [], []>} : vector<8x256xbf16>, vector<256x64xbf16>, vector<8x64xf32> -> vector<8x64xf32>
    %c0_141 = arith.constant 0 : index
    %c0_142 = arith.constant 0 : index
    %184 = vector.load %arg3[%c0_141, %c0_142] : memref<1x64xf32, #tpu.memory_space<vmem>>, vector<1x64xf32>
    %185 = vector.broadcast %184 : vector<1x64xf32> to vector<8x64xf32>
    %186 = arith.addf %183, %185 : vector<8x64xf32>
    %cst_143 = arith.constant 2.000000e-01 : f32
    %187 = vector.broadcast %cst_143 : f32 to vector<8x64xf32>
    %188 = arith.mulf %187, %186 : vector<8x64xf32>
    %189 = arith.maximumf %186, %188 : vector<8x64xf32>
    %190 = arith.truncf %189 : vector<8x64xf32> to vector<8x64xbf16>
    %c0_144 = arith.constant 0 : index
    %c0_145 = arith.constant 0 : index
    %191 = vector.load %arg4[%c0_144, %c0_145] : memref<64x8xbf16, #tpu.memory_space<vmem>>, vector<64x8xbf16>
    %cst_146 = arith.constant dense<0.000000e+00> : vector<8x8xf32>
    %192 = tpu.matmul %190, %191, %cst_146 {dimension_numbers = #tpu.dot_dimension_numbers<[1], [0], [0], [1], [0, 0, 1, 1], [], []>} : vector<8x64xbf16>, vector<64x8xbf16>, vector<8x8xf32> -> vector<8x8xf32>
    %c0_147 = arith.constant 0 : index
    %c0_148 = arith.constant 0 : index
    %193 = vector.load %arg5[%c0_147, %c0_148] : memref<1x8xf32, #tpu.memory_space<vmem>>, vector<1x8xf32>
    %194 = vector.broadcast %193 : vector<1x8xf32> to vector<8x8xf32>
    %195 = arith.addf %192, %194 : vector<8x8xf32>
    %cst_149 = arith.constant 2.000000e-01 : f32
    %196 = vector.broadcast %cst_149 : f32 to vector<8x8xf32>
    %197 = arith.mulf %196, %195 : vector<8x8xf32>
    %198 = arith.maximumf %195, %197 : vector<8x8xf32>
    %c0_150 = arith.constant 0 : index
    %c72 = arith.constant 72 : index
    %199 = vector.load %arg11[%c0_150, %c72] : memref<8x200xf32, #tpu.memory_space<vmem>>, vector<8x8xf32>
    tpu.vector_store %arg11[%c0_150, %c72], %198 {strides = array<i32>} : memref<8x200xf32, #tpu.memory_space<vmem>>, vector<8x8xf32>,
    %c10 = arith.constant 10 : index
    %c0_151 = arith.constant 0 : index
    %c0_152 = arith.constant 0 : index
    %200 = vector.load %arg1[%c10, %c0_151, %c0_152] : memref<25x8x256xbf16, #tpu.memory_space<vmem>>, vector<1x8x256xbf16>
    %201 = vector.shape_cast %200 : vector<1x8x256xbf16> to vector<8x256xbf16>
    %c0_153 = arith.constant 0 : index
    %c0_154 = arith.constant 0 : index
    %202 = vector.load %arg2[%c0_153, %c0_154] : memref<256x64xbf16, #tpu.memory_space<vmem>>, vector<256x64xbf16>
    %cst_155 = arith.constant dense<0.000000e+00> : vector<8x64xf32>
    %203 = tpu.matmul %201, %202, %cst_155 {dimension_numbers = #tpu.dot_dimension_numbers<[1], [0], [0], [1], [0, 0, 1, 1], [], []>} : vector<8x256xbf16>, vector<256x64xbf16>, vector<8x64xf32> -> vector<8x64xf32>
    %c0_156 = arith.constant 0 : index
    %c0_157 = arith.constant 0 : index
    %204 = vector.load %arg3[%c0_156, %c0_157] : memref<1x64xf32, #tpu.memory_space<vmem>>, vector<1x64xf32>
    %205 = vector.broadcast %204 : vector<1x64xf32> to vector<8x64xf32>
    %206 = arith.addf %203, %205 : vector<8x64xf32>
    %cst_158 = arith.constant 2.000000e-01 : f32
    %207 = vector.broadcast %cst_158 : f32 to vector<8x64xf32>
    %208 = arith.mulf %207, %206 : vector<8x64xf32>
    %209 = arith.maximumf %206, %208 : vector<8x64xf32>
    %210 = arith.truncf %209 : vector<8x64xf32> to vector<8x64xbf16>
    %c0_159 = arith.constant 0 : index
    %c0_160 = arith.constant 0 : index
    %211 = vector.load %arg4[%c0_159, %c0_160] : memref<64x8xbf16, #tpu.memory_space<vmem>>, vector<64x8xbf16>
    %cst_161 = arith.constant dense<0.000000e+00> : vector<8x8xf32>
    %212 = tpu.matmul %210, %211, %cst_161 {dimension_numbers = #tpu.dot_dimension_numbers<[1], [0], [0], [1], [0, 0, 1, 1], [], []>} : vector<8x64xbf16>, vector<64x8xbf16>, vector<8x8xf32> -> vector<8x8xf32>
    %c0_162 = arith.constant 0 : index
    %c0_163 = arith.constant 0 : index
    %213 = vector.load %arg5[%c0_162, %c0_163] : memref<1x8xf32, #tpu.memory_space<vmem>>, vector<1x8xf32>
    %214 = vector.broadcast %213 : vector<1x8xf32> to vector<8x8xf32>
    %215 = arith.addf %212, %214 : vector<8x8xf32>
    %cst_164 = arith.constant 2.000000e-01 : f32
    %216 = vector.broadcast %cst_164 : f32 to vector<8x8xf32>
    %217 = arith.mulf %216, %215 : vector<8x8xf32>
    %218 = arith.maximumf %215, %217 : vector<8x8xf32>
    %c0_165 = arith.constant 0 : index
    %c80 = arith.constant 80 : index
    %219 = vector.load %arg11[%c0_165, %c80] : memref<8x200xf32, #tpu.memory_space<vmem>>, vector<8x8xf32>
    tpu.vector_store %arg11[%c0_165, %c80], %218 {strides = array<i32>} : memref<8x200xf32, #tpu.memory_space<vmem>>, vector<8x8xf32>,
    %c11 = arith.constant 11 : index
    %c0_166 = arith.constant 0 : index
    %c0_167 = arith.constant 0 : index
    %220 = vector.load %arg1[%c11, %c0_166, %c0_167] : memref<25x8x256xbf16, #tpu.memory_space<vmem>>, vector<1x8x256xbf16>
    %221 = vector.shape_cast %220 : vector<1x8x256xbf16> to vector<8x256xbf16>
    %c0_168 = arith.constant 0 : index
    %c0_169 = arith.constant 0 : index
    %222 = vector.load %arg2[%c0_168, %c0_169] : memref<256x64xbf16, #tpu.memory_space<vmem>>, vector<256x64xbf16>
    %cst_170 = arith.constant dense<0.000000e+00> : vector<8x64xf32>
    %223 = tpu.matmul %221, %222, %cst_170 {dimension_numbers = #tpu.dot_dimension_numbers<[1], [0], [0], [1], [0, 0, 1, 1], [], []>} : vector<8x256xbf16>, vector<256x64xbf16>, vector<8x64xf32> -> vector<8x64xf32>
    %c0_171 = arith.constant 0 : index
    %c0_172 = arith.constant 0 : index
    %224 = vector.load %arg3[%c0_171, %c0_172] : memref<1x64xf32, #tpu.memory_space<vmem>>, vector<1x64xf32>
    %225 = vector.broadcast %224 : vector<1x64xf32> to vector<8x64xf32>
    %226 = arith.addf %223, %225 : vector<8x64xf32>
    %cst_173 = arith.constant 2.000000e-01 : f32
    %227 = vector.broadcast %cst_173 : f32 to vector<8x64xf32>
    %228 = arith.mulf %227, %226 : vector<8x64xf32>
    %229 = arith.maximumf %226, %228 : vector<8x64xf32>
    %230 = arith.truncf %229 : vector<8x64xf32> to vector<8x64xbf16>
    %c0_174 = arith.constant 0 : index
    %c0_175 = arith.constant 0 : index
    %231 = vector.load %arg4[%c0_174, %c0_175] : memref<64x8xbf16, #tpu.memory_space<vmem>>, vector<64x8xbf16>
    %cst_176 = arith.constant dense<0.000000e+00> : vector<8x8xf32>
    %232 = tpu.matmul %230, %231, %cst_176 {dimension_numbers = #tpu.dot_dimension_numbers<[1], [0], [0], [1], [0, 0, 1, 1], [], []>} : vector<8x64xbf16>, vector<64x8xbf16>, vector<8x8xf32> -> vector<8x8xf32>
    %c0_177 = arith.constant 0 : index
    %c0_178 = arith.constant 0 : index
    %233 = vector.load %arg5[%c0_177, %c0_178] : memref<1x8xf32, #tpu.memory_space<vmem>>, vector<1x8xf32>
    %234 = vector.broadcast %233 : vector<1x8xf32> to vector<8x8xf32>
    %235 = arith.addf %232, %234 : vector<8x8xf32>
    %cst_179 = arith.constant 2.000000e-01 : f32
    %236 = vector.broadcast %cst_179 : f32 to vector<8x8xf32>
    %237 = arith.mulf %236, %235 : vector<8x8xf32>
    %238 = arith.maximumf %235, %237 : vector<8x8xf32>
    %c0_180 = arith.constant 0 : index
    %c88 = arith.constant 88 : index
    %239 = vector.load %arg11[%c0_180, %c88] : memref<8x200xf32, #tpu.memory_space<vmem>>, vector<8x8xf32>
    tpu.vector_store %arg11[%c0_180, %c88], %238 {strides = array<i32>} : memref<8x200xf32, #tpu.memory_space<vmem>>, vector<8x8xf32>,
    %c12 = arith.constant 12 : index
    %c0_181 = arith.constant 0 : index
    %c0_182 = arith.constant 0 : index
    %240 = vector.load %arg1[%c12, %c0_181, %c0_182] : memref<25x8x256xbf16, #tpu.memory_space<vmem>>, vector<1x8x256xbf16>
    %241 = vector.shape_cast %240 : vector<1x8x256xbf16> to vector<8x256xbf16>
    %c0_183 = arith.constant 0 : index
    %c0_184 = arith.constant 0 : index
    %242 = vector.load %arg2[%c0_183, %c0_184] : memref<256x64xbf16, #tpu.memory_space<vmem>>, vector<256x64xbf16>
    %cst_185 = arith.constant dense<0.000000e+00> : vector<8x64xf32>
    %243 = tpu.matmul %241, %242, %cst_185 {dimension_numbers = #tpu.dot_dimension_numbers<[1], [0], [0], [1], [0, 0, 1, 1], [], []>} : vector<8x256xbf16>, vector<256x64xbf16>, vector<8x64xf32> -> vector<8x64xf32>
    %c0_186 = arith.constant 0 : index
    %c0_187 = arith.constant 0 : index
    %244 = vector.load %arg3[%c0_186, %c0_187] : memref<1x64xf32, #tpu.memory_space<vmem>>, vector<1x64xf32>
    %245 = vector.broadcast %244 : vector<1x64xf32> to vector<8x64xf32>
    %246 = arith.addf %243, %245 : vector<8x64xf32>
    %cst_188 = arith.constant 2.000000e-01 : f32
    %247 = vector.broadcast %cst_188 : f32 to vector<8x64xf32>
    %248 = arith.mulf %247, %246 : vector<8x64xf32>
    %249 = arith.maximumf %246, %248 : vector<8x64xf32>
    %250 = arith.truncf %249 : vector<8x64xf32> to vector<8x64xbf16>
    %c0_189 = arith.constant 0 : index
    %c0_190 = arith.constant 0 : index
    %251 = vector.load %arg4[%c0_189, %c0_190] : memref<64x8xbf16, #tpu.memory_space<vmem>>, vector<64x8xbf16>
    %cst_191 = arith.constant dense<0.000000e+00> : vector<8x8xf32>
    %252 = tpu.matmul %250, %251, %cst_191 {dimension_numbers = #tpu.dot_dimension_numbers<[1], [0], [0], [1], [0, 0, 1, 1], [], []>} : vector<8x64xbf16>, vector<64x8xbf16>, vector<8x8xf32> -> vector<8x8xf32>
    %c0_192 = arith.constant 0 : index
    %c0_193 = arith.constant 0 : index
    %253 = vector.load %arg5[%c0_192, %c0_193] : memref<1x8xf32, #tpu.memory_space<vmem>>, vector<1x8xf32>
    %254 = vector.broadcast %253 : vector<1x8xf32> to vector<8x8xf32>
    %255 = arith.addf %252, %254 : vector<8x8xf32>
    %cst_194 = arith.constant 2.000000e-01 : f32
    %256 = vector.broadcast %cst_194 : f32 to vector<8x8xf32>
    %257 = arith.mulf %256, %255 : vector<8x8xf32>
    %258 = arith.maximumf %255, %257 : vector<8x8xf32>
    %c0_195 = arith.constant 0 : index
    %c96 = arith.constant 96 : index
    %259 = vector.load %arg11[%c0_195, %c96] : memref<8x200xf32, #tpu.memory_space<vmem>>, vector<8x8xf32>
    tpu.vector_store %arg11[%c0_195, %c96], %258 {strides = array<i32>} : memref<8x200xf32, #tpu.memory_space<vmem>>, vector<8x8xf32>,
    %c13 = arith.constant 13 : index
    %c0_196 = arith.constant 0 : index
    %c0_197 = arith.constant 0 : index
    %260 = vector.load %arg1[%c13, %c0_196, %c0_197] : memref<25x8x256xbf16, #tpu.memory_space<vmem>>, vector<1x8x256xbf16>
    %261 = vector.shape_cast %260 : vector<1x8x256xbf16> to vector<8x256xbf16>
    %c0_198 = arith.constant 0 : index
    %c0_199 = arith.constant 0 : index
    %262 = vector.load %arg2[%c0_198, %c0_199] : memref<256x64xbf16, #tpu.memory_space<vmem>>, vector<256x64xbf16>
    %cst_200 = arith.constant dense<0.000000e+00> : vector<8x64xf32>
    %263 = tpu.matmul %261, %262, %cst_200 {dimension_numbers = #tpu.dot_dimension_numbers<[1], [0], [0], [1], [0, 0, 1, 1], [], []>} : vector<8x256xbf16>, vector<256x64xbf16>, vector<8x64xf32> -> vector<8x64xf32>
    %c0_201 = arith.constant 0 : index
    %c0_202 = arith.constant 0 : index
    %264 = vector.load %arg3[%c0_201, %c0_202] : memref<1x64xf32, #tpu.memory_space<vmem>>, vector<1x64xf32>
    %265 = vector.broadcast %264 : vector<1x64xf32> to vector<8x64xf32>
    %266 = arith.addf %263, %265 : vector<8x64xf32>
    %cst_203 = arith.constant 2.000000e-01 : f32
    %267 = vector.broadcast %cst_203 : f32 to vector<8x64xf32>
    %268 = arith.mulf %267, %266 : vector<8x64xf32>
    %269 = arith.maximumf %266, %268 : vector<8x64xf32>
    %270 = arith.truncf %269 : vector<8x64xf32> to vector<8x64xbf16>
    %c0_204 = arith.constant 0 : index
    %c0_205 = arith.constant 0 : index
    %271 = vector.load %arg4[%c0_204, %c0_205] : memref<64x8xbf16, #tpu.memory_space<vmem>>, vector<64x8xbf16>
    %cst_206 = arith.constant dense<0.000000e+00> : vector<8x8xf32>
    %272 = tpu.matmul %270, %271, %cst_206 {dimension_numbers = #tpu.dot_dimension_numbers<[1], [0], [0], [1], [0, 0, 1, 1], [], []>} : vector<8x64xbf16>, vector<64x8xbf16>, vector<8x8xf32> -> vector<8x8xf32>
    %c0_207 = arith.constant 0 : index
    %c0_208 = arith.constant 0 : index
    %273 = vector.load %arg5[%c0_207, %c0_208] : memref<1x8xf32, #tpu.memory_space<vmem>>, vector<1x8xf32>
    %274 = vector.broadcast %273 : vector<1x8xf32> to vector<8x8xf32>
    %275 = arith.addf %272, %274 : vector<8x8xf32>
    %cst_209 = arith.constant 2.000000e-01 : f32
    %276 = vector.broadcast %cst_209 : f32 to vector<8x8xf32>
    %277 = arith.mulf %276, %275 : vector<8x8xf32>
    %278 = arith.maximumf %275, %277 : vector<8x8xf32>
    %c0_210 = arith.constant 0 : index
    %c104 = arith.constant 104 : index
    %279 = vector.load %arg11[%c0_210, %c104] : memref<8x200xf32, #tpu.memory_space<vmem>>, vector<8x8xf32>
    tpu.vector_store %arg11[%c0_210, %c104], %278 {strides = array<i32>} : memref<8x200xf32, #tpu.memory_space<vmem>>, vector<8x8xf32>,
    %c14 = arith.constant 14 : index
    %c0_211 = arith.constant 0 : index
    %c0_212 = arith.constant 0 : index
    %280 = vector.load %arg1[%c14, %c0_211, %c0_212] : memref<25x8x256xbf16, #tpu.memory_space<vmem>>, vector<1x8x256xbf16>
    %281 = vector.shape_cast %280 : vector<1x8x256xbf16> to vector<8x256xbf16>
    %c0_213 = arith.constant 0 : index
    %c0_214 = arith.constant 0 : index
    %282 = vector.load %arg2[%c0_213, %c0_214] : memref<256x64xbf16, #tpu.memory_space<vmem>>, vector<256x64xbf16>
    %cst_215 = arith.constant dense<0.000000e+00> : vector<8x64xf32>
    %283 = tpu.matmul %281, %282, %cst_215 {dimension_numbers = #tpu.dot_dimension_numbers<[1], [0], [0], [1], [0, 0, 1, 1], [], []>} : vector<8x256xbf16>, vector<256x64xbf16>, vector<8x64xf32> -> vector<8x64xf32>
    %c0_216 = arith.constant 0 : index
    %c0_217 = arith.constant 0 : index
    %284 = vector.load %arg3[%c0_216, %c0_217] : memref<1x64xf32, #tpu.memory_space<vmem>>, vector<1x64xf32>
    %285 = vector.broadcast %284 : vector<1x64xf32> to vector<8x64xf32>
    %286 = arith.addf %283, %285 : vector<8x64xf32>
    %cst_218 = arith.constant 2.000000e-01 : f32
    %287 = vector.broadcast %cst_218 : f32 to vector<8x64xf32>
    %288 = arith.mulf %287, %286 : vector<8x64xf32>
    %289 = arith.maximumf %286, %288 : vector<8x64xf32>
    %290 = arith.truncf %289 : vector<8x64xf32> to vector<8x64xbf16>
    %c0_219 = arith.constant 0 : index
    %c0_220 = arith.constant 0 : index
    %291 = vector.load %arg4[%c0_219, %c0_220] : memref<64x8xbf16, #tpu.memory_space<vmem>>, vector<64x8xbf16>
    %cst_221 = arith.constant dense<0.000000e+00> : vector<8x8xf32>
    %292 = tpu.matmul %290, %291, %cst_221 {dimension_numbers = #tpu.dot_dimension_numbers<[1], [0], [0], [1], [0, 0, 1, 1], [], []>} : vector<8x64xbf16>, vector<64x8xbf16>, vector<8x8xf32> -> vector<8x8xf32>
    %c0_222 = arith.constant 0 : index
    %c0_223 = arith.constant 0 : index
    %293 = vector.load %arg5[%c0_222, %c0_223] : memref<1x8xf32, #tpu.memory_space<vmem>>, vector<1x8xf32>
    %294 = vector.broadcast %293 : vector<1x8xf32> to vector<8x8xf32>
    %295 = arith.addf %292, %294 : vector<8x8xf32>
    %cst_224 = arith.constant 2.000000e-01 : f32
    %296 = vector.broadcast %cst_224 : f32 to vector<8x8xf32>
    %297 = arith.mulf %296, %295 : vector<8x8xf32>
    %298 = arith.maximumf %295, %297 : vector<8x8xf32>
    %c0_225 = arith.constant 0 : index
    %c112 = arith.constant 112 : index
    %299 = vector.load %arg11[%c0_225, %c112] : memref<8x200xf32, #tpu.memory_space<vmem>>, vector<8x8xf32>
    tpu.vector_store %arg11[%c0_225, %c112], %298 {strides = array<i32>} : memref<8x200xf32, #tpu.memory_space<vmem>>, vector<8x8xf32>,
    %c15 = arith.constant 15 : index
    %c0_226 = arith.constant 0 : index
    %c0_227 = arith.constant 0 : index
    %300 = vector.load %arg1[%c15, %c0_226, %c0_227] : memref<25x8x256xbf16, #tpu.memory_space<vmem>>, vector<1x8x256xbf16>
    %301 = vector.shape_cast %300 : vector<1x8x256xbf16> to vector<8x256xbf16>
    %c0_228 = arith.constant 0 : index
    %c0_229 = arith.constant 0 : index
    %302 = vector.load %arg2[%c0_228, %c0_229] : memref<256x64xbf16, #tpu.memory_space<vmem>>, vector<256x64xbf16>
    %cst_230 = arith.constant dense<0.000000e+00> : vector<8x64xf32>
    %303 = tpu.matmul %301, %302, %cst_230 {dimension_numbers = #tpu.dot_dimension_numbers<[1], [0], [0], [1], [0, 0, 1, 1], [], []>} : vector<8x256xbf16>, vector<256x64xbf16>, vector<8x64xf32> -> vector<8x64xf32>
    %c0_231 = arith.constant 0 : index
    %c0_232 = arith.constant 0 : index
    %304 = vector.load %arg3[%c0_231, %c0_232] : memref<1x64xf32, #tpu.memory_space<vmem>>, vector<1x64xf32>
    %305 = vector.broadcast %304 : vector<1x64xf32> to vector<8x64xf32>
    %306 = arith.addf %303, %305 : vector<8x64xf32>
    %cst_233 = arith.constant 2.000000e-01 : f32
    %307 = vector.broadcast %cst_233 : f32 to vector<8x64xf32>
    %308 = arith.mulf %307, %306 : vector<8x64xf32>
    %309 = arith.maximumf %306, %308 : vector<8x64xf32>
    %310 = arith.truncf %309 : vector<8x64xf32> to vector<8x64xbf16>
    %c0_234 = arith.constant 0 : index
    %c0_235 = arith.constant 0 : index
    %311 = vector.load %arg4[%c0_234, %c0_235] : memref<64x8xbf16, #tpu.memory_space<vmem>>, vector<64x8xbf16>
    %cst_236 = arith.constant dense<0.000000e+00> : vector<8x8xf32>
    %312 = tpu.matmul %310, %311, %cst_236 {dimension_numbers = #tpu.dot_dimension_numbers<[1], [0], [0], [1], [0, 0, 1, 1], [], []>} : vector<8x64xbf16>, vector<64x8xbf16>, vector<8x8xf32> -> vector<8x8xf32>
    %c0_237 = arith.constant 0 : index
    %c0_238 = arith.constant 0 : index
    %313 = vector.load %arg5[%c0_237, %c0_238] : memref<1x8xf32, #tpu.memory_space<vmem>>, vector<1x8xf32>
    %314 = vector.broadcast %313 : vector<1x8xf32> to vector<8x8xf32>
    %315 = arith.addf %312, %314 : vector<8x8xf32>
    %cst_239 = arith.constant 2.000000e-01 : f32
    %316 = vector.broadcast %cst_239 : f32 to vector<8x8xf32>
    %317 = arith.mulf %316, %315 : vector<8x8xf32>
    %318 = arith.maximumf %315, %317 : vector<8x8xf32>
    %c0_240 = arith.constant 0 : index
    %c120 = arith.constant 120 : index
    %319 = vector.load %arg11[%c0_240, %c120] : memref<8x200xf32, #tpu.memory_space<vmem>>, vector<8x8xf32>
    tpu.vector_store %arg11[%c0_240, %c120], %318 {strides = array<i32>} : memref<8x200xf32, #tpu.memory_space<vmem>>, vector<8x8xf32>,
    %c16_241 = arith.constant 16 : index
    %c0_242 = arith.constant 0 : index
    %c0_243 = arith.constant 0 : index
    %320 = vector.load %arg1[%c16_241, %c0_242, %c0_243] : memref<25x8x256xbf16, #tpu.memory_space<vmem>>, vector<1x8x256xbf16>
    %321 = vector.shape_cast %320 : vector<1x8x256xbf16> to vector<8x256xbf16>
    %c0_244 = arith.constant 0 : index
    %c0_245 = arith.constant 0 : index
    %322 = vector.load %arg2[%c0_244, %c0_245] : memref<256x64xbf16, #tpu.memory_space<vmem>>, vector<256x64xbf16>
    %cst_246 = arith.constant dense<0.000000e+00> : vector<8x64xf32>
    %323 = tpu.matmul %321, %322, %cst_246 {dimension_numbers = #tpu.dot_dimension_numbers<[1], [0], [0], [1], [0, 0, 1, 1], [], []>} : vector<8x256xbf16>, vector<256x64xbf16>, vector<8x64xf32> -> vector<8x64xf32>
    %c0_247 = arith.constant 0 : index
    %c0_248 = arith.constant 0 : index
    %324 = vector.load %arg3[%c0_247, %c0_248] : memref<1x64xf32, #tpu.memory_space<vmem>>, vector<1x64xf32>
    %325 = vector.broadcast %324 : vector<1x64xf32> to vector<8x64xf32>
    %326 = arith.addf %323, %325 : vector<8x64xf32>
    %cst_249 = arith.constant 2.000000e-01 : f32
    %327 = vector.broadcast %cst_249 : f32 to vector<8x64xf32>
    %328 = arith.mulf %327, %326 : vector<8x64xf32>
    %329 = arith.maximumf %326, %328 : vector<8x64xf32>
    %330 = arith.truncf %329 : vector<8x64xf32> to vector<8x64xbf16>
    %c0_250 = arith.constant 0 : index
    %c0_251 = arith.constant 0 : index
    %331 = vector.load %arg4[%c0_250, %c0_251] : memref<64x8xbf16, #tpu.memory_space<vmem>>, vector<64x8xbf16>
    %cst_252 = arith.constant dense<0.000000e+00> : vector<8x8xf32>
    %332 = tpu.matmul %330, %331, %cst_252 {dimension_numbers = #tpu.dot_dimension_numbers<[1], [0], [0], [1], [0, 0, 1, 1], [], []>} : vector<8x64xbf16>, vector<64x8xbf16>, vector<8x8xf32> -> vector<8x8xf32>
    %c0_253 = arith.constant 0 : index
    %c0_254 = arith.constant 0 : index
    %333 = vector.load %arg5[%c0_253, %c0_254] : memref<1x8xf32, #tpu.memory_space<vmem>>, vector<1x8xf32>
    %334 = vector.broadcast %333 : vector<1x8xf32> to vector<8x8xf32>
    %335 = arith.addf %332, %334 : vector<8x8xf32>
    %cst_255 = arith.constant 2.000000e-01 : f32
    %336 = vector.broadcast %cst_255 : f32 to vector<8x8xf32>
    %337 = arith.mulf %336, %335 : vector<8x8xf32>
    %338 = arith.maximumf %335, %337 : vector<8x8xf32>
    %c0_256 = arith.constant 0 : index
    %c128 = arith.constant 128 : index
    %339 = vector.load %arg11[%c0_256, %c128] : memref<8x200xf32, #tpu.memory_space<vmem>>, vector<8x8xf32>
    tpu.vector_store %arg11[%c0_256, %c128], %338 {strides = array<i32>} : memref<8x200xf32, #tpu.memory_space<vmem>>, vector<8x8xf32>,
    %c17 = arith.constant 17 : index
    %c0_257 = arith.constant 0 : index
    %c0_258 = arith.constant 0 : index
    %340 = vector.load %arg1[%c17, %c0_257, %c0_258] : memref<25x8x256xbf16, #tpu.memory_space<vmem>>, vector<1x8x256xbf16>
    %341 = vector.shape_cast %340 : vector<1x8x256xbf16> to vector<8x256xbf16>
    %c0_259 = arith.constant 0 : index
    %c0_260 = arith.constant 0 : index
    %342 = vector.load %arg2[%c0_259, %c0_260] : memref<256x64xbf16, #tpu.memory_space<vmem>>, vector<256x64xbf16>
    %cst_261 = arith.constant dense<0.000000e+00> : vector<8x64xf32>
    %343 = tpu.matmul %341, %342, %cst_261 {dimension_numbers = #tpu.dot_dimension_numbers<[1], [0], [0], [1], [0, 0, 1, 1], [], []>} : vector<8x256xbf16>, vector<256x64xbf16>, vector<8x64xf32> -> vector<8x64xf32>
    %c0_262 = arith.constant 0 : index
    %c0_263 = arith.constant 0 : index
    %344 = vector.load %arg3[%c0_262, %c0_263] : memref<1x64xf32, #tpu.memory_space<vmem>>, vector<1x64xf32>
    %345 = vector.broadcast %344 : vector<1x64xf32> to vector<8x64xf32>
    %346 = arith.addf %343, %345 : vector<8x64xf32>
    %cst_264 = arith.constant 2.000000e-01 : f32
    %347 = vector.broadcast %cst_264 : f32 to vector<8x64xf32>
    %348 = arith.mulf %347, %346 : vector<8x64xf32>
    %349 = arith.maximumf %346, %348 : vector<8x64xf32>
    %350 = arith.truncf %349 : vector<8x64xf32> to vector<8x64xbf16>
    %c0_265 = arith.constant 0 : index
    %c0_266 = arith.constant 0 : index
    %351 = vector.load %arg4[%c0_265, %c0_266] : memref<64x8xbf16, #tpu.memory_space<vmem>>, vector<64x8xbf16>
    %cst_267 = arith.constant dense<0.000000e+00> : vector<8x8xf32>
    %352 = tpu.matmul %350, %351, %cst_267 {dimension_numbers = #tpu.dot_dimension_numbers<[1], [0], [0], [1], [0, 0, 1, 1], [], []>} : vector<8x64xbf16>, vector<64x8xbf16>, vector<8x8xf32> -> vector<8x8xf32>
    %c0_268 = arith.constant 0 : index
    %c0_269 = arith.constant 0 : index
    %353 = vector.load %arg5[%c0_268, %c0_269] : memref<1x8xf32, #tpu.memory_space<vmem>>, vector<1x8xf32>
    %354 = vector.broadcast %353 : vector<1x8xf32> to vector<8x8xf32>
    %355 = arith.addf %352, %354 : vector<8x8xf32>
    %cst_270 = arith.constant 2.000000e-01 : f32
    %356 = vector.broadcast %cst_270 : f32 to vector<8x8xf32>
    %357 = arith.mulf %356, %355 : vector<8x8xf32>
    %358 = arith.maximumf %355, %357 : vector<8x8xf32>
    %c0_271 = arith.constant 0 : index
    %c136 = arith.constant 136 : index
    %359 = vector.load %arg11[%c0_271, %c136] : memref<8x200xf32, #tpu.memory_space<vmem>>, vector<8x8xf32>
    tpu.vector_store %arg11[%c0_271, %c136], %358 {strides = array<i32>} : memref<8x200xf32, #tpu.memory_space<vmem>>, vector<8x8xf32>,
    %c18 = arith.constant 18 : index
    %c0_272 = arith.constant 0 : index
    %c0_273 = arith.constant 0 : index
    %360 = vector.load %arg1[%c18, %c0_272, %c0_273] : memref<25x8x256xbf16, #tpu.memory_space<vmem>>, vector<1x8x256xbf16>
    %361 = vector.shape_cast %360 : vector<1x8x256xbf16> to vector<8x256xbf16>
    %c0_274 = arith.constant 0 : index
    %c0_275 = arith.constant 0 : index
    %362 = vector.load %arg2[%c0_274, %c0_275] : memref<256x64xbf16, #tpu.memory_space<vmem>>, vector<256x64xbf16>
    %cst_276 = arith.constant dense<0.000000e+00> : vector<8x64xf32>
    %363 = tpu.matmul %361, %362, %cst_276 {dimension_numbers = #tpu.dot_dimension_numbers<[1], [0], [0], [1], [0, 0, 1, 1], [], []>} : vector<8x256xbf16>, vector<256x64xbf16>, vector<8x64xf32> -> vector<8x64xf32>
    %c0_277 = arith.constant 0 : index
    %c0_278 = arith.constant 0 : index
    %364 = vector.load %arg3[%c0_277, %c0_278] : memref<1x64xf32, #tpu.memory_space<vmem>>, vector<1x64xf32>
    %365 = vector.broadcast %364 : vector<1x64xf32> to vector<8x64xf32>
    %366 = arith.addf %363, %365 : vector<8x64xf32>
    %cst_279 = arith.constant 2.000000e-01 : f32
    %367 = vector.broadcast %cst_279 : f32 to vector<8x64xf32>
    %368 = arith.mulf %367, %366 : vector<8x64xf32>
    %369 = arith.maximumf %366, %368 : vector<8x64xf32>
    %370 = arith.truncf %369 : vector<8x64xf32> to vector<8x64xbf16>
    %c0_280 = arith.constant 0 : index
    %c0_281 = arith.constant 0 : index
    %371 = vector.load %arg4[%c0_280, %c0_281] : memref<64x8xbf16, #tpu.memory_space<vmem>>, vector<64x8xbf16>
    %cst_282 = arith.constant dense<0.000000e+00> : vector<8x8xf32>
    %372 = tpu.matmul %370, %371, %cst_282 {dimension_numbers = #tpu.dot_dimension_numbers<[1], [0], [0], [1], [0, 0, 1, 1], [], []>} : vector<8x64xbf16>, vector<64x8xbf16>, vector<8x8xf32> -> vector<8x8xf32>
    %c0_283 = arith.constant 0 : index
    %c0_284 = arith.constant 0 : index
    %373 = vector.load %arg5[%c0_283, %c0_284] : memref<1x8xf32, #tpu.memory_space<vmem>>, vector<1x8xf32>
    %374 = vector.broadcast %373 : vector<1x8xf32> to vector<8x8xf32>
    %375 = arith.addf %372, %374 : vector<8x8xf32>
    %cst_285 = arith.constant 2.000000e-01 : f32
    %376 = vector.broadcast %cst_285 : f32 to vector<8x8xf32>
    %377 = arith.mulf %376, %375 : vector<8x8xf32>
    %378 = arith.maximumf %375, %377 : vector<8x8xf32>
    %c0_286 = arith.constant 0 : index
    %c144 = arith.constant 144 : index
    %379 = vector.load %arg11[%c0_286, %c144] : memref<8x200xf32, #tpu.memory_space<vmem>>, vector<8x8xf32>
    tpu.vector_store %arg11[%c0_286, %c144], %378 {strides = array<i32>} : memref<8x200xf32, #tpu.memory_space<vmem>>, vector<8x8xf32>,
    %c19 = arith.constant 19 : index
    %c0_287 = arith.constant 0 : index
    %c0_288 = arith.constant 0 : index
    %380 = vector.load %arg1[%c19, %c0_287, %c0_288] : memref<25x8x256xbf16, #tpu.memory_space<vmem>>, vector<1x8x256xbf16>
    %381 = vector.shape_cast %380 : vector<1x8x256xbf16> to vector<8x256xbf16>
    %c0_289 = arith.constant 0 : index
    %c0_290 = arith.constant 0 : index
    %382 = vector.load %arg2[%c0_289, %c0_290] : memref<256x64xbf16, #tpu.memory_space<vmem>>, vector<256x64xbf16>
    %cst_291 = arith.constant dense<0.000000e+00> : vector<8x64xf32>
    %383 = tpu.matmul %381, %382, %cst_291 {dimension_numbers = #tpu.dot_dimension_numbers<[1], [0], [0], [1], [0, 0, 1, 1], [], []>} : vector<8x256xbf16>, vector<256x64xbf16>, vector<8x64xf32> -> vector<8x64xf32>
    %c0_292 = arith.constant 0 : index
    %c0_293 = arith.constant 0 : index
    %384 = vector.load %arg3[%c0_292, %c0_293] : memref<1x64xf32, #tpu.memory_space<vmem>>, vector<1x64xf32>
    %385 = vector.broadcast %384 : vector<1x64xf32> to vector<8x64xf32>
    %386 = arith.addf %383, %385 : vector<8x64xf32>
    %cst_294 = arith.constant 2.000000e-01 : f32
    %387 = vector.broadcast %cst_294 : f32 to vector<8x64xf32>
    %388 = arith.mulf %387, %386 : vector<8x64xf32>
    %389 = arith.maximumf %386, %388 : vector<8x64xf32>
    %390 = arith.truncf %389 : vector<8x64xf32> to vector<8x64xbf16>
    %c0_295 = arith.constant 0 : index
    %c0_296 = arith.constant 0 : index
    %391 = vector.load %arg4[%c0_295, %c0_296] : memref<64x8xbf16, #tpu.memory_space<vmem>>, vector<64x8xbf16>
    %cst_297 = arith.constant dense<0.000000e+00> : vector<8x8xf32>
    %392 = tpu.matmul %390, %391, %cst_297 {dimension_numbers = #tpu.dot_dimension_numbers<[1], [0], [0], [1], [0, 0, 1, 1], [], []>} : vector<8x64xbf16>, vector<64x8xbf16>, vector<8x8xf32> -> vector<8x8xf32>
    %c0_298 = arith.constant 0 : index
    %c0_299 = arith.constant 0 : index
    %393 = vector.load %arg5[%c0_298, %c0_299] : memref<1x8xf32, #tpu.memory_space<vmem>>, vector<1x8xf32>
    %394 = vector.broadcast %393 : vector<1x8xf32> to vector<8x8xf32>
    %395 = arith.addf %392, %394 : vector<8x8xf32>
    %cst_300 = arith.constant 2.000000e-01 : f32
    %396 = vector.broadcast %cst_300 : f32 to vector<8x8xf32>
    %397 = arith.mulf %396, %395 : vector<8x8xf32>
    %398 = arith.maximumf %395, %397 : vector<8x8xf32>
    %c0_301 = arith.constant 0 : index
    %c152 = arith.constant 152 : index
    %399 = vector.load %arg11[%c0_301, %c152] : memref<8x200xf32, #tpu.memory_space<vmem>>, vector<8x8xf32>
    tpu.vector_store %arg11[%c0_301, %c152], %398 {strides = array<i32>} : memref<8x200xf32, #tpu.memory_space<vmem>>, vector<8x8xf32>,
    %c20 = arith.constant 20 : index
    %c0_302 = arith.constant 0 : index
    %c0_303 = arith.constant 0 : index
    %400 = vector.load %arg1[%c20, %c0_302, %c0_303] : memref<25x8x256xbf16, #tpu.memory_space<vmem>>, vector<1x8x256xbf16>
    %401 = vector.shape_cast %400 : vector<1x8x256xbf16> to vector<8x256xbf16>
    %c0_304 = arith.constant 0 : index
    %c0_305 = arith.constant 0 : index
    %402 = vector.load %arg2[%c0_304, %c0_305] : memref<256x64xbf16, #tpu.memory_space<vmem>>, vector<256x64xbf16>
    %cst_306 = arith.constant dense<0.000000e+00> : vector<8x64xf32>
    %403 = tpu.matmul %401, %402, %cst_306 {dimension_numbers = #tpu.dot_dimension_numbers<[1], [0], [0], [1], [0, 0, 1, 1], [], []>} : vector<8x256xbf16>, vector<256x64xbf16>, vector<8x64xf32> -> vector<8x64xf32>
    %c0_307 = arith.constant 0 : index
    %c0_308 = arith.constant 0 : index
    %404 = vector.load %arg3[%c0_307, %c0_308] : memref<1x64xf32, #tpu.memory_space<vmem>>, vector<1x64xf32>
    %405 = vector.broadcast %404 : vector<1x64xf32> to vector<8x64xf32>
    %406 = arith.addf %403, %405 : vector<8x64xf32>
    %cst_309 = arith.constant 2.000000e-01 : f32
    %407 = vector.broadcast %cst_309 : f32 to vector<8x64xf32>
    %408 = arith.mulf %407, %406 : vector<8x64xf32>
    %409 = arith.maximumf %406, %408 : vector<8x64xf32>
    %410 = arith.truncf %409 : vector<8x64xf32> to vector<8x64xbf16>
    %c0_310 = arith.constant 0 : index
    %c0_311 = arith.constant 0 : index
    %411 = vector.load %arg4[%c0_310, %c0_311] : memref<64x8xbf16, #tpu.memory_space<vmem>>, vector<64x8xbf16>
    %cst_312 = arith.constant dense<0.000000e+00> : vector<8x8xf32>
    %412 = tpu.matmul %410, %411, %cst_312 {dimension_numbers = #tpu.dot_dimension_numbers<[1], [0], [0], [1], [0, 0, 1, 1], [], []>} : vector<8x64xbf16>, vector<64x8xbf16>, vector<8x8xf32> -> vector<8x8xf32>
    %c0_313 = arith.constant 0 : index
    %c0_314 = arith.constant 0 : index
    %413 = vector.load %arg5[%c0_313, %c0_314] : memref<1x8xf32, #tpu.memory_space<vmem>>, vector<1x8xf32>
    %414 = vector.broadcast %413 : vector<1x8xf32> to vector<8x8xf32>
    %415 = arith.addf %412, %414 : vector<8x8xf32>
    %cst_315 = arith.constant 2.000000e-01 : f32
    %416 = vector.broadcast %cst_315 : f32 to vector<8x8xf32>
    %417 = arith.mulf %416, %415 : vector<8x8xf32>
    %418 = arith.maximumf %415, %417 : vector<8x8xf32>
    %c0_316 = arith.constant 0 : index
    %c160 = arith.constant 160 : index
    %419 = vector.load %arg11[%c0_316, %c160] : memref<8x200xf32, #tpu.memory_space<vmem>>, vector<8x8xf32>
    tpu.vector_store %arg11[%c0_316, %c160], %418 {strides = array<i32>} : memref<8x200xf32, #tpu.memory_space<vmem>>, vector<8x8xf32>,
    %c21 = arith.constant 21 : index
    %c0_317 = arith.constant 0 : index
    %c0_318 = arith.constant 0 : index
    %420 = vector.load %arg1[%c21, %c0_317, %c0_318] : memref<25x8x256xbf16, #tpu.memory_space<vmem>>, vector<1x8x256xbf16>
    %421 = vector.shape_cast %420 : vector<1x8x256xbf16> to vector<8x256xbf16>
    %c0_319 = arith.constant 0 : index
    %c0_320 = arith.constant 0 : index
    %422 = vector.load %arg2[%c0_319, %c0_320] : memref<256x64xbf16, #tpu.memory_space<vmem>>, vector<256x64xbf16>
    %cst_321 = arith.constant dense<0.000000e+00> : vector<8x64xf32>
    %423 = tpu.matmul %421, %422, %cst_321 {dimension_numbers = #tpu.dot_dimension_numbers<[1], [0], [0], [1], [0, 0, 1, 1], [], []>} : vector<8x256xbf16>, vector<256x64xbf16>, vector<8x64xf32> -> vector<8x64xf32>
    %c0_322 = arith.constant 0 : index
    %c0_323 = arith.constant 0 : index
    %424 = vector.load %arg3[%c0_322, %c0_323] : memref<1x64xf32, #tpu.memory_space<vmem>>, vector<1x64xf32>
    %425 = vector.broadcast %424 : vector<1x64xf32> to vector<8x64xf32>
    %426 = arith.addf %423, %425 : vector<8x64xf32>
    %cst_324 = arith.constant 2.000000e-01 : f32
    %427 = vector.broadcast %cst_324 : f32 to vector<8x64xf32>
    %428 = arith.mulf %427, %426 : vector<8x64xf32>
    %429 = arith.maximumf %426, %428 : vector<8x64xf32>
    %430 = arith.truncf %429 : vector<8x64xf32> to vector<8x64xbf16>
    %c0_325 = arith.constant 0 : index
    %c0_326 = arith.constant 0 : index
    %431 = vector.load %arg4[%c0_325, %c0_326] : memref<64x8xbf16, #tpu.memory_space<vmem>>, vector<64x8xbf16>
    %cst_327 = arith.constant dense<0.000000e+00> : vector<8x8xf32>
    %432 = tpu.matmul %430, %431, %cst_327 {dimension_numbers = #tpu.dot_dimension_numbers<[1], [0], [0], [1], [0, 0, 1, 1], [], []>} : vector<8x64xbf16>, vector<64x8xbf16>, vector<8x8xf32> -> vector<8x8xf32>
    %c0_328 = arith.constant 0 : index
    %c0_329 = arith.constant 0 : index
    %433 = vector.load %arg5[%c0_328, %c0_329] : memref<1x8xf32, #tpu.memory_space<vmem>>, vector<1x8xf32>
    %434 = vector.broadcast %433 : vector<1x8xf32> to vector<8x8xf32>
    %435 = arith.addf %432, %434 : vector<8x8xf32>
    %cst_330 = arith.constant 2.000000e-01 : f32
    %436 = vector.broadcast %cst_330 : f32 to vector<8x8xf32>
    %437 = arith.mulf %436, %435 : vector<8x8xf32>
    %438 = arith.maximumf %435, %437 : vector<8x8xf32>
    %c0_331 = arith.constant 0 : index
    %c168 = arith.constant 168 : index
    %439 = vector.load %arg11[%c0_331, %c168] : memref<8x200xf32, #tpu.memory_space<vmem>>, vector<8x8xf32>
    tpu.vector_store %arg11[%c0_331, %c168], %438 {strides = array<i32>} : memref<8x200xf32, #tpu.memory_space<vmem>>, vector<8x8xf32>,
    %c22 = arith.constant 22 : index
    %c0_332 = arith.constant 0 : index
    %c0_333 = arith.constant 0 : index
    %440 = vector.load %arg1[%c22, %c0_332, %c0_333] : memref<25x8x256xbf16, #tpu.memory_space<vmem>>, vector<1x8x256xbf16>
    %441 = vector.shape_cast %440 : vector<1x8x256xbf16> to vector<8x256xbf16>
    %c0_334 = arith.constant 0 : index
    %c0_335 = arith.constant 0 : index
    %442 = vector.load %arg2[%c0_334, %c0_335] : memref<256x64xbf16, #tpu.memory_space<vmem>>, vector<256x64xbf16>
    %cst_336 = arith.constant dense<0.000000e+00> : vector<8x64xf32>
    %443 = tpu.matmul %441, %442, %cst_336 {dimension_numbers = #tpu.dot_dimension_numbers<[1], [0], [0], [1], [0, 0, 1, 1], [], []>} : vector<8x256xbf16>, vector<256x64xbf16>, vector<8x64xf32> -> vector<8x64xf32>
    %c0_337 = arith.constant 0 : index
    %c0_338 = arith.constant 0 : index
    %444 = vector.load %arg3[%c0_337, %c0_338] : memref<1x64xf32, #tpu.memory_space<vmem>>, vector<1x64xf32>
    %445 = vector.broadcast %444 : vector<1x64xf32> to vector<8x64xf32>
    %446 = arith.addf %443, %445 : vector<8x64xf32>
    %cst_339 = arith.constant 2.000000e-01 : f32
    %447 = vector.broadcast %cst_339 : f32 to vector<8x64xf32>
    %448 = arith.mulf %447, %446 : vector<8x64xf32>
    %449 = arith.maximumf %446, %448 : vector<8x64xf32>
    %450 = arith.truncf %449 : vector<8x64xf32> to vector<8x64xbf16>
    %c0_340 = arith.constant 0 : index
    %c0_341 = arith.constant 0 : index
    %451 = vector.load %arg4[%c0_340, %c0_341] : memref<64x8xbf16, #tpu.memory_space<vmem>>, vector<64x8xbf16>
    %cst_342 = arith.constant dense<0.000000e+00> : vector<8x8xf32>
    %452 = tpu.matmul %450, %451, %cst_342 {dimension_numbers = #tpu.dot_dimension_numbers<[1], [0], [0], [1], [0, 0, 1, 1], [], []>} : vector<8x64xbf16>, vector<64x8xbf16>, vector<8x8xf32> -> vector<8x8xf32>
    %c0_343 = arith.constant 0 : index
    %c0_344 = arith.constant 0 : index
    %453 = vector.load %arg5[%c0_343, %c0_344] : memref<1x8xf32, #tpu.memory_space<vmem>>, vector<1x8xf32>
    %454 = vector.broadcast %453 : vector<1x8xf32> to vector<8x8xf32>
    %455 = arith.addf %452, %454 : vector<8x8xf32>
    %cst_345 = arith.constant 2.000000e-01 : f32
    %456 = vector.broadcast %cst_345 : f32 to vector<8x8xf32>
    %457 = arith.mulf %456, %455 : vector<8x8xf32>
    %458 = arith.maximumf %455, %457 : vector<8x8xf32>
    %c0_346 = arith.constant 0 : index
    %c176 = arith.constant 176 : index
    %459 = vector.load %arg11[%c0_346, %c176] : memref<8x200xf32, #tpu.memory_space<vmem>>, vector<8x8xf32>
    tpu.vector_store %arg11[%c0_346, %c176], %458 {strides = array<i32>} : memref<8x200xf32, #tpu.memory_space<vmem>>, vector<8x8xf32>,
    %c23 = arith.constant 23 : index
    %c0_347 = arith.constant 0 : index
    %c0_348 = arith.constant 0 : index
    %460 = vector.load %arg1[%c23, %c0_347, %c0_348] : memref<25x8x256xbf16, #tpu.memory_space<vmem>>, vector<1x8x256xbf16>
    %461 = vector.shape_cast %460 : vector<1x8x256xbf16> to vector<8x256xbf16>
    %c0_349 = arith.constant 0 : index
    %c0_350 = arith.constant 0 : index
    %462 = vector.load %arg2[%c0_349, %c0_350] : memref<256x64xbf16, #tpu.memory_space<vmem>>, vector<256x64xbf16>
    %cst_351 = arith.constant dense<0.000000e+00> : vector<8x64xf32>
    %463 = tpu.matmul %461, %462, %cst_351 {dimension_numbers = #tpu.dot_dimension_numbers<[1], [0], [0], [1], [0, 0, 1, 1], [], []>} : vector<8x256xbf16>, vector<256x64xbf16>, vector<8x64xf32> -> vector<8x64xf32>
    %c0_352 = arith.constant 0 : index
    %c0_353 = arith.constant 0 : index
    %464 = vector.load %arg3[%c0_352, %c0_353] : memref<1x64xf32, #tpu.memory_space<vmem>>, vector<1x64xf32>
    %465 = vector.broadcast %464 : vector<1x64xf32> to vector<8x64xf32>
    %466 = arith.addf %463, %465 : vector<8x64xf32>
    %cst_354 = arith.constant 2.000000e-01 : f32
    %467 = vector.broadcast %cst_354 : f32 to vector<8x64xf32>
    %468 = arith.mulf %467, %466 : vector<8x64xf32>
    %469 = arith.maximumf %466, %468 : vector<8x64xf32>
    %470 = arith.truncf %469 : vector<8x64xf32> to vector<8x64xbf16>
    %c0_355 = arith.constant 0 : index
    %c0_356 = arith.constant 0 : index
    %471 = vector.load %arg4[%c0_355, %c0_356] : memref<64x8xbf16, #tpu.memory_space<vmem>>, vector<64x8xbf16>
    %cst_357 = arith.constant dense<0.000000e+00> : vector<8x8xf32>
    %472 = tpu.matmul %470, %471, %cst_357 {dimension_numbers = #tpu.dot_dimension_numbers<[1], [0], [0], [1], [0, 0, 1, 1], [], []>} : vector<8x64xbf16>, vector<64x8xbf16>, vector<8x8xf32> -> vector<8x8xf32>
    %c0_358 = arith.constant 0 : index
    %c0_359 = arith.constant 0 : index
    %473 = vector.load %arg5[%c0_358, %c0_359] : memref<1x8xf32, #tpu.memory_space<vmem>>, vector<1x8xf32>
    %474 = vector.broadcast %473 : vector<1x8xf32> to vector<8x8xf32>
    %475 = arith.addf %472, %474 : vector<8x8xf32>
    %cst_360 = arith.constant 2.000000e-01 : f32
    %476 = vector.broadcast %cst_360 : f32 to vector<8x8xf32>
    %477 = arith.mulf %476, %475 : vector<8x8xf32>
    %478 = arith.maximumf %475, %477 : vector<8x8xf32>
    %c0_361 = arith.constant 0 : index
    %c184 = arith.constant 184 : index
    %479 = vector.load %arg11[%c0_361, %c184] : memref<8x200xf32, #tpu.memory_space<vmem>>, vector<8x8xf32>
    tpu.vector_store %arg11[%c0_361, %c184], %478 {strides = array<i32>} : memref<8x200xf32, #tpu.memory_space<vmem>>, vector<8x8xf32>,
    %c24_362 = arith.constant 24 : index
    %c0_363 = arith.constant 0 : index
    %c0_364 = arith.constant 0 : index
    %480 = vector.load %arg1[%c24_362, %c0_363, %c0_364] : memref<25x8x256xbf16, #tpu.memory_space<vmem>>, vector<1x8x256xbf16>
    %481 = vector.shape_cast %480 : vector<1x8x256xbf16> to vector<8x256xbf16>
    %c0_365 = arith.constant 0 : index
    %c0_366 = arith.constant 0 : index
    %482 = vector.load %arg2[%c0_365, %c0_366] : memref<256x64xbf16, #tpu.memory_space<vmem>>, vector<256x64xbf16>
    %cst_367 = arith.constant dense<0.000000e+00> : vector<8x64xf32>
    %483 = tpu.matmul %481, %482, %cst_367 {dimension_numbers = #tpu.dot_dimension_numbers<[1], [0], [0], [1], [0, 0, 1, 1], [], []>} : vector<8x256xbf16>, vector<256x64xbf16>, vector<8x64xf32> -> vector<8x64xf32>
    %c0_368 = arith.constant 0 : index
    %c0_369 = arith.constant 0 : index
    %484 = vector.load %arg3[%c0_368, %c0_369] : memref<1x64xf32, #tpu.memory_space<vmem>>, vector<1x64xf32>
    %485 = vector.broadcast %484 : vector<1x64xf32> to vector<8x64xf32>
    %486 = arith.addf %483, %485 : vector<8x64xf32>
    %cst_370 = arith.constant 2.000000e-01 : f32
    %487 = vector.broadcast %cst_370 : f32 to vector<8x64xf32>
    %488 = arith.mulf %487, %486 : vector<8x64xf32>
    %489 = arith.maximumf %486, %488 : vector<8x64xf32>
    %490 = arith.truncf %489 : vector<8x64xf32> to vector<8x64xbf16>
    %c0_371 = arith.constant 0 : index
    %c0_372 = arith.constant 0 : index
    %491 = vector.load %arg4[%c0_371, %c0_372] : memref<64x8xbf16, #tpu.memory_space<vmem>>, vector<64x8xbf16>
    %cst_373 = arith.constant dense<0.000000e+00> : vector<8x8xf32>
    %492 = tpu.matmul %490, %491, %cst_373 {dimension_numbers = #tpu.dot_dimension_numbers<[1], [0], [0], [1], [0, 0, 1, 1], [], []>} : vector<8x64xbf16>, vector<64x8xbf16>, vector<8x8xf32> -> vector<8x8xf32>
    %c0_374 = arith.constant 0 : index
    %c0_375 = arith.constant 0 : index
    %493 = vector.load %arg5[%c0_374, %c0_375] : memref<1x8xf32, #tpu.memory_space<vmem>>, vector<1x8xf32>
    %494 = vector.broadcast %493 : vector<1x8xf32> to vector<8x8xf32>
    %495 = arith.addf %492, %494 : vector<8x8xf32>
    %cst_376 = arith.constant 2.000000e-01 : f32
    %496 = vector.broadcast %cst_376 : f32 to vector<8x8xf32>
    %497 = arith.mulf %496, %495 : vector<8x8xf32>
    %498 = arith.maximumf %495, %497 : vector<8x8xf32>
    %c0_377 = arith.constant 0 : index
    %c192 = arith.constant 192 : index
    %499 = vector.load %arg11[%c0_377, %c192] : memref<8x200xf32, #tpu.memory_space<vmem>>, vector<8x8xf32>
    tpu.vector_store %arg11[%c0_377, %c192], %498 {strides = array<i32>} : memref<8x200xf32, #tpu.memory_space<vmem>>, vector<8x8xf32>,
    %c0_378 = arith.constant 0 : index
    %c0_379 = arith.constant 0 : index
    %500 = vector.load %arg11[%c0_378, %c0_379] : memref<8x200xf32, #tpu.memory_space<vmem>>, vector<8x200xf32>
    %501 = arith.truncf %500 : vector<8x200xf32> to vector<8x200xbf16>
    %c0_380 = arith.constant 0 : index
    %c0_381 = arith.constant 0 : index
    %502 = vector.load %arg6[%c0_380, %c0_381] : memref<200x32xbf16, #tpu.memory_space<vmem>>, vector<200x32xbf16>
    %cst_382 = arith.constant dense<0.000000e+00> : vector<8x32xf32>
    %503 = tpu.matmul %501, %502, %cst_382 {dimension_numbers = #tpu.dot_dimension_numbers<[1], [0], [0], [1], [0, 0, 1, 1], [], []>} : vector<8x200xbf16>, vector<200x32xbf16>, vector<8x32xf32> -> vector<8x32xf32>
    %c0_383 = arith.constant 0 : index
    %c0_384 = arith.constant 0 : index
    %504 = vector.load %arg7[%c0_383, %c0_384] : memref<1x32xf32, #tpu.memory_space<vmem>>, vector<1x32xf32>
    %505 = vector.broadcast %504 : vector<1x32xf32> to vector<8x32xf32>
    %506 = arith.addf %503, %505 : vector<8x32xf32>
    %cst_385 = arith.constant 2.000000e-01 : f32
    %507 = vector.broadcast %cst_385 : f32 to vector<8x32xf32>
    %508 = arith.mulf %507, %506 : vector<8x32xf32>
    %509 = arith.maximumf %506, %508 : vector<8x32xf32>
    %c0_386 = arith.constant 0 : index
    %c0_387 = arith.constant 0 : index
    %510 = vector.load %arg8[%c0_386, %c0_387] : memref<1x32xf32, #tpu.memory_space<vmem>>, vector<1x32xf32>
    %511 = vector.broadcast %510 : vector<1x32xf32> to vector<8x32xf32>
    %512 = arith.mulf %509, %511 : vector<8x32xf32>
    %cst_388 = arith.constant dense<0.000000e+00> : vector<8xf32>
    %513 = vector.multi_reduction <add>, %512, %cst_388 [1] : vector<8x32xf32> to vector<8xf32>
    %514 = vector.shape_cast %513 : vector<8xf32> to vector<8x1xf32>
    %c0_389 = arith.constant 0 : index
    %c0_390 = arith.constant 0 : index
    %515 = vector.load %arg9[%c0_389, %c0_390] : memref<1x1xf32, #tpu.memory_space<vmem>>, vector<1x1xf32>
    %516 = vector.broadcast %515 : vector<1x1xf32> to vector<8x1xf32>
    %517 = arith.addf %514, %516 : vector<8x1xf32>
    %cst_391 = arith.constant 0.000000e+00 : f32
    %518 = vector.broadcast %cst_391 : f32 to vector<8x1xf32>
    %519 = arith.subf %518, %517 : vector<8x1xf32>
    %520 = math.exp %519 : vector<8x1xf32>
    %cst_392 = arith.constant 1.000000e+00 : f32
    %521 = vector.broadcast %cst_392 : f32 to vector<8x1xf32>
    %522 = arith.addf %521, %520 : vector<8x1xf32>
    %523 = tpu.reciprocal %522 : vector<8x1xf32> -> vector<8x1xf32>
    %c0_393 = arith.constant 0 : index
    %c0_394 = arith.constant 0 : index
    %524 = vector.load %arg10[%c0_393, %c0_394] : memref<8x1xf32, #tpu.memory_space<vmem>>, vector<8x1xf32>
    tpu.vector_store %arg10[%c0_393, %c0_394], %523 {strides = array<i32>} : memref<8x1xf32, #tpu.memory_space<vmem>>, vector<8x1xf32>,
    return
  }
  func.func @transform_0(%arg0: i32) -> (i32, i32, i32) {
    %c0_i32 = arith.constant 0 : i32
    %c0_i32_0 = arith.constant 0 : i32
    %c0_i32_1 = arith.constant 0 : i32
    return %c0_i32, %arg0, %c0_i32_0 : i32, i32, i32
  }
  func.func @transform_1(%arg0: i32) -> (i32, i32) {
    %c0_i32 = arith.constant 0 : i32
    %c0_i32_0 = arith.constant 0 : i32
    %c0_i32_1 = arith.constant 0 : i32
    return %c0_i32, %c0_i32_0 : i32, i32
  }
  func.func @transform_2(%arg0: i32) -> (i32, i32) {
    %c0_i32 = arith.constant 0 : i32
    %c0_i32_0 = arith.constant 0 : i32
    %c0_i32_1 = arith.constant 0 : i32
    return %c0_i32, %c0_i32_0 : i32, i32
  }
  func.func @transform_3(%arg0: i32) -> (i32, i32) {
    %c0_i32 = arith.constant 0 : i32
    %c0_i32_0 = arith.constant 0 : i32
    %c0_i32_1 = arith.constant 0 : i32
    return %c0_i32, %c0_i32_0 : i32, i32
  }
  func.func @transform_4(%arg0: i32) -> (i32, i32) {
    %c0_i32 = arith.constant 0 : i32
    %c0_i32_0 = arith.constant 0 : i32
    %c0_i32_1 = arith.constant 0 : i32
    return %c0_i32, %c0_i32_0 : i32, i32
  }
  func.func @transform_5(%arg0: i32) -> (i32, i32) {
    %c0_i32 = arith.constant 0 : i32
    %c0_i32_0 = arith.constant 0 : i32
    %c0_i32_1 = arith.constant 0 : i32
    return %c0_i32, %c0_i32_0 : i32, i32
  }
  func.func @transform_6(%arg0: i32) -> (i32, i32) {
    %c0_i32 = arith.constant 0 : i32
    %c0_i32_0 = arith.constant 0 : i32
    %c0_i32_1 = arith.constant 0 : i32
    return %c0_i32, %c0_i32_0 : i32, i32
  }
  func.func @transform_7(%arg0: i32) -> (i32, i32) {
    %c0_i32 = arith.constant 0 : i32
    %c0_i32_0 = arith.constant 0 : i32
    %c0_i32_1 = arith.constant 0 : i32
    return %c0_i32, %c0_i32_0 : i32, i32
  }
  func.func @transform_8(%arg0: i32) -> (i32, i32) {
    %c0_i32 = arith.constant 0 : i32
    %c0_i32_0 = arith.constant 0 : i32
    %c0_i32_1 = arith.constant 0 : i32
    return %c0_i32, %c0_i32_0 : i32, i32
  }
  func.func @transform_9(%arg0: i32) -> (i32, i32) {
    %c0_i32 = arith.constant 0 : i32
    %c0_i32_0 = arith.constant 0 : i32
    return %arg0, %c0_i32 : i32, i32
  }
}

</mosaic_0001>

<bundles_post_ra>
// kernel: disc_forward.1
= control target key start
LH: loop header
LB: loop body
LE: loop exit
PB: predicated region body
PF: predicated region fallthrough
CT: control target
= control target key end

     0   :  { %s10157_s0 = inlined_call_operand.hbm [shape: bf16[25,8,256], index: 0, kind: input, shape index: {}]   ;;  %s10158_s1 = inlined_call_operand.hbm [shape: bf16[256,64], index: 1, kind: input, shape index: {}]   ;;  %s10159_s2 = inlined_call_operand.hbm [shape: f32[1,64], index: 2, kind: input, shape index: {}]   ;;  %s10160_s3 = inlined_call_operand.hbm [shape: bf16[64,8], index: 3, kind: input, shape index: {}]   ;;  %s10161_s4 = inlined_call_operand.hbm [shape: f32[1,8], index: 4, kind: input, shape index: {}]   ;;  %s10162_s5 = inlined_call_operand.hbm [shape: bf16[200,32], index: 5, kind: input, shape index: {}]   ;;  %s10163_s6 = inlined_call_operand.hbm [shape: f32[1,32], index: 6, kind: input, shape index: {}]   ;;  %s10164_s7 = inlined_call_operand.hbm [shape: f32[1,32], index: 7, kind: input, shape index: {}]   ;;  %s10165_s8 = inlined_call_operand.<no memory space> [shape: f32[1,1], index: 8, kind: input, shape index: {}]   ;;  %s10166_s9 = inlined_call_operand.hbm [shape: f32[8,1], index: 9, kind: output, shape index: {}]  }
   0x1   :  { %v14_v0 = vstv %s10165_s8 }
   0x2   :  { %15 = vst [vmem:[#allocation3] sm:$0x1] %v14_v0 }
   0x3   :  { %16 = vsyncpa [#allocation5], 0 }
   0x4   :  { %17 = vsyncpa [#allocation8], 0 }
   0x5   :  { %18 = vsyncpa [#allocation11], 0 }
   0x6   :  { %19 = vsyncpa [#allocation14], 0 }
   0x7   :  { %20 = vsyncpa [#allocation17], 0 }
   0x8   :  { %21 = vsyncpa [#allocation6], 0  ;;  %s9676_s11 = smov [#allocation7]   ;;  %s9466_s15 = scalar_lea.hbm %s10158_s1, 2048 }
   0x9   :  { %s39_s12 = sshll.u32 %s9676_s11, 4  ;;  %p9467_p0 = scmp.ne.s32.totalorder %s10158_s1, %s9466_s15  ;;  %s40_s12 = int_to_ptr.vmem [resolvable:$true] %s39_s12 }
   0xa   :  { %p9470_p1 = scmp.lt.u32.totalorder %s9466_s15, %s10158_s1 }
   0xc   :  { %p9472_p2 = pnand %p9470_p1, %p9467_p0 }
   0xe   :  { %9475 = shalt.err (!%p9472_p2)
}
   0xf   :  { %s9476_s19 = scalar_lea.vmem %s40_s12, 2048  ;;  %p9481_p4 = scmp.lt.s32.totalorder %s40_s12, %s40_s12 }
  0x10   :  { %p9477_p3 = scmp.ne.s32.totalorder %s40_s12, %s9476_s19  ;;  %p9482_p5 = scmp.lt.s32.totalorder %s9476_s19, %s9476_s19 }
  0x12   :  { %p9483_p6 = por %p9482_p5, %p9481_p4 }
  0x14   :  { %p9484_p7 = pnand %p9483_p6, %p9477_p3 }
  0x16   :  { %9487 = shalt.err (!%p9484_p7)
}
  0x17   :  { %s9677_s20 = smov 64   ;;  %s9678_s21 = smov 4  }
  0x18   :  { %45 = dma.hbm_to_vmem [thread:$0]  %s10158_s1, 2048, %s40_s12, [#allocation8], %s9677_s20, %s9677_s20, %s9678_s21  }
  0x19   :  { %s9679_s24 = smov [#allocation10]   ;;  %s9680_s26 = smov [#allocation13]  }
  0x1a   :  { %s61_s25 = sshll.u32 %s9679_s24, 4  ;;  %s83_s27 = sshll.u32 %s9680_s26, 4  ;;  %s62_s25 = int_to_ptr.vmem [resolvable:$true] %s61_s25  ;;  %s84_s27 = int_to_ptr.vmem [resolvable:$true] %s83_s27 }
  0x1b   :  { %s9488_s30 = scalar_lea.hbm %s10160_s3, 512 }
  0x1c   :  { %p9489_p8 = scmp.ne.s32.totalorder %s10160_s3, %s9488_s30  ;;  %p9492_p9 = scmp.lt.u32.totalorder %s9488_s30, %s10160_s3 }
  0x1e   :  { %p9494_p10 = pnand %p9492_p9, %p9489_p8 }
  0x20   :  { %9497 = shalt.err (!%p9494_p10)
}
  0x21   :  { %s9498_s1 = scalar_lea.vmem %s62_s25, 512  ;;  %p9503_p12 = scmp.lt.s32.totalorder %s62_s25, %s62_s25 }
  0x22   :  { %p9499_p11 = scmp.ne.s32.totalorder %s62_s25, %s9498_s1  ;;  %p9504_p13 = scmp.lt.s32.totalorder %s9498_s1, %s9498_s1 }
  0x24   :  { %p9505_p0 = por %p9504_p13, %p9503_p12 }
  0x26   :  { %p9506_p1 = pnand %p9505_p0, %p9499_p11 }
  0x28   :  { %9509 = shalt.err (!%p9506_p1)
}
  0x29   :  { %67 = dma.hbm_to_vmem [thread:$0]  %s10160_s3, 512, %s62_s25, [#allocation11], %s9677_s20, %s9677_s20, %s9678_s21  }
  0x2a   :  { %s9510_s18 = scalar_lea.hbm %s10162_s5, 1600 }
  0x2b   :  { %p9511_p2 = scmp.ne.s32.totalorder %s10162_s5, %s9510_s18  ;;  %p9514_p3 = scmp.lt.u32.totalorder %s9510_s18, %s10162_s5 }
  0x2d   :  { %p9516_p4 = pnand %p9514_p3, %p9511_p2 }
  0x2f   :  { %9519 = shalt.err (!%p9516_p4)
}
  0x30   :  { %s9520_s24 = scalar_lea.vmem %s84_s27, 1600  ;;  %p9525_p6 = scmp.lt.s32.totalorder %s84_s27, %s84_s27 }
  0x31   :  { %p9521_p5 = scmp.ne.s32.totalorder %s84_s27, %s9520_s24  ;;  %p9526_p7 = scmp.lt.s32.totalorder %s9520_s24, %s9520_s24 }
  0x33   :  { %p9527_p8 = por %p9526_p7, %p9525_p6 }
  0x35   :  { %p9528_p9 = pnand %p9527_p8, %p9521_p5 }
  0x37   :  { %9531 = shalt.err (!%p9528_p9)
}
  0x38   :  { %89 = dma.hbm_to_vmem [thread:$0]  %s10162_s5, 1600, %s84_s27, [#allocation14], %s9677_s20, %s9677_s20, %s9678_s21  }
  0x39   :  { %s9681_s26 = smov [#allocation4]   ;;  %s9532_s10 = scalar_lea.hbm %s10157_s0, 3200 }
  0x3a   :  { %s27_s28 = sshll.u32 %s9681_s26, 4  ;;  %p9533_p10 = scmp.ne.s32.totalorder %s10157_s0, %s9532_s10  ;;  %s28_s28 = int_to_ptr.vmem [resolvable:$true] %s27_s28 }
  0x3b   :  { %p9536_p11 = scmp.lt.u32.totalorder %s9532_s10, %s10157_s0 }
  0x3d   :  { %p9538_p12 = pnand %p9536_p11, %p9533_p10 }
  0x3f   :  { %9541 = shalt.err (!%p9538_p12)
}
  0x40   :  { %s9542_s12 = scalar_lea.vmem %s28_s28, 3200  ;;  %p9547_p0 = scmp.lt.s32.totalorder %s28_s28, %s28_s28 }
  0x41   :  { %p9543_p13 = scmp.ne.s32.totalorder %s28_s28, %s9542_s12  ;;  %p9548_p1 = scmp.lt.s32.totalorder %s9542_s12, %s9542_s12 }
  0x43   :  { %p9549_p2 = por %p9548_p1, %p9547_p0 }
  0x45   :  { %p9550_p3 = pnand %p9549_p2, %p9543_p13 }
  0x47   :  { %9553 = shalt.err (!%p9550_p3)
}
  0x48   :  { %s9682_s5 = smov 128   ;;  %s9683_s21 = smov 8  }
  0x49   :  { %33 = dma.hbm_to_vmem [thread:$0]  %s10157_s0, 3200, %s28_s28, [#allocation5], %s9682_s5, %s9682_s5, %s9683_s21  }
  0x4a   :  { %s9684_s16 = smov [#allocation9]   ;;  %s9685_s18 = smov [#allocation12]  }
  0x4b   :  { %s52_s17 = sshll.u32 %s9684_s16, 4  ;;  %s74_s8 = sshll.u32 %s9685_s18, 4  ;;  %s53_s17 = int_to_ptr.vmem [resolvable:$true] %s52_s17  ;;  %s75_s8 = int_to_ptr.vmem [resolvable:$true] %s74_s8 }
  0x4c   :  { %s9554_s23 = scalar_lea.hbm %s10159_s2, 16 }
  0x4d   :  { %p9555_p4 = scmp.ne.s32.totalorder %s10159_s2, %s9554_s23  ;;  %p9558_p5 = scmp.lt.u32.totalorder %s9554_s23, %s10159_s2 }
  0x4f   :  { %p9560_p6 = pnand %p9558_p5, %p9555_p4 }
  0x51   :  { %9563 = shalt.err (!%p9560_p6)
}
  0x52   :  { %s9564_s0 = scalar_lea.vmem %s53_s17, 16  ;;  %s9568_s28 = scalar_lea.vmem %s53_s17, 32 }
  0x53   :  { %p9565_p7 = scmp.ne.s32.totalorder %s53_s17, %s9564_s0  ;;  %p9569_p8 = scmp.lt.s32.totalorder %s53_s17, %s53_s17 }
  0x54   :  { %p9570_p9 = scmp.lt.s32.totalorder %s9568_s28, %s9564_s0 }
  0x56   :  { %p9571_p10 = por %p9570_p9, %p9569_p8 }
  0x58   :  { %p9572_p11 = pnand %p9571_p10, %p9565_p7 }
  0x5a   :  { %9575 = shalt.err (!%p9572_p11)
}
  0x5b   :  { %55 = dma.hbm_to_vmem [thread:$0]  %s10159_s2, 16, %s53_s17, [#allocation8]  }
  0x5c   :  { %s9576_s13 = scalar_lea.hbm %s10161_s4, 16 }
  0x5d   :  { %p9577_p12 = scmp.ne.s32.totalorder %s10161_s4, %s9576_s13  ;;  %p9580_p13 = scmp.lt.u32.totalorder %s9576_s13, %s10161_s4 }
  0x5f   :  { %p9582_p0 = pnand %p9580_p13, %p9577_p12 }
  0x61   :  { %9585 = shalt.err (!%p9582_p0)
}
  0x62   :  { %s9586_s27 = scalar_lea.vmem %s75_s8, 16  ;;  %s9590_s15 = scalar_lea.vmem %s75_s8, 32 }
  0x63   :  { %p9587_p1 = scmp.ne.s32.totalorder %s75_s8, %s9586_s27  ;;  %p9591_p2 = scmp.lt.s32.totalorder %s75_s8, %s75_s8 }
  0x64   :  { %p9592_p3 = scmp.lt.s32.totalorder %s9590_s15, %s9586_s27 }
  0x66   :  { %p9593_p4 = por %p9592_p3, %p9591_p2 }
  0x68   :  { %p9594_p5 = pnand %p9593_p4, %p9587_p1 }
  0x6a   :  { %9597 = shalt.err (!%p9594_p5)
}
  0x6b   :  { %77 = dma.hbm_to_vmem [thread:$0]  %s10161_s4, 16, %s75_s8, [#allocation11]  }
  0x6c   :  { %s9686_s17 = smov [#allocation15]   ;;  %s9687_s19 = smov [#allocation16]  }
  0x6d   :  { %s96_s18 = sshll.u32 %s9686_s17, 4  ;;  %s106_s22 = sshll.u32 %s9687_s19, 4  ;;  %s97_s18 = int_to_ptr.vmem [resolvable:$true] %s96_s18  ;;  %s107_s22 = int_to_ptr.vmem [resolvable:$true] %s106_s22 }
  0x6e   :  { %s9598_s3 = scalar_lea.hbm %s10163_s6, 16 }
  0x6f   :  { %p9599_p6 = scmp.ne.s32.totalorder %s10163_s6, %s9598_s3  ;;  %p9602_p7 = scmp.lt.u32.totalorder %s9598_s3, %s10163_s6 }
  0x71   :  { %p9604_p8 = pnand %p9602_p7, %p9599_p6 }
  0x73   :  { %9607 = shalt.err (!%p9604_p8)
}
  0x74   :  { %s9608_s4 = scalar_lea.vmem %s97_s18, 16  ;;  %s9612_s8 = scalar_lea.vmem %s97_s18, 32 }
  0x75   :  { %p9609_p9 = scmp.ne.s32.totalorder %s97_s18, %s9608_s4  ;;  %p9613_p10 = scmp.lt.s32.totalorder %s97_s18, %s97_s18 }
  0x76   :  { %p9614_p11 = scmp.lt.s32.totalorder %s9612_s8, %s9608_s4 }
  0x78   :  { %p9615_p12 = por %p9614_p11, %p9613_p10 }
  0x7a   :  { %p9616_p13 = pnand %p9615_p12, %p9609_p9 }
  0x7c   :  { %9619 = shalt.err (!%p9616_p13)
}
  0x7d   :  { %99 = dma.hbm_to_vmem [thread:$0]  %s10163_s6, 16, %s97_s18, [#allocation14]  }
  0x7e   :  { %s9620_s13 = scalar_lea.hbm %s10164_s7, 16 }
  0x7f   :  { %p9621_p0 = scmp.ne.s32.totalorder %s10164_s7, %s9620_s13  ;;  %p9624_p1 = scmp.lt.u32.totalorder %s9620_s13, %s10164_s7 }
  0x81   :  { %p9626_p2 = pnand %p9624_p1, %p9621_p0 }
  0x83   :  { %9629 = shalt.err (!%p9626_p2)
}
  0x84   :  { %s9630_s27 = scalar_lea.vmem %s107_s22, 16  ;;  %s9634_s15 = scalar_lea.vmem %s107_s22, 32 }
  0x85   :  { %p9631_p3 = scmp.ne.s32.totalorder %s107_s22, %s9630_s27  ;;  %p9635_p4 = scmp.lt.s32.totalorder %s107_s22, %s107_s22 }
  0x86   :  { %p9636_p5 = scmp.lt.s32.totalorder %s9634_s15, %s9630_s27 }
  0x88   :  { %p9637_p6 = por %p9636_p5, %p9635_p4 }
  0x8a   :  { %p9638_p7 = pnand %p9637_p6, %p9631_p3 }
  0x8c   :  { %9641 = shalt.err (!%p9638_p7)
}
  0x8d   :  { %109 = dma.hbm_to_vmem [thread:$0]  %s10164_s7, 16, %s107_s22, [#allocation17]  }
  0x8e   :  { %9664 = dma.done.wait [#allocation5], 3200  }
  0x8f   :  { %9665 = vsyncadd [#allocation5], 4294964096 }
  0x90   :  { %9666 = dma.done.wait [#allocation8], 2064  }
  0x91   :  { %9667 = vsyncadd [#allocation8], 4294965232 }
  0x92   :  { %9668 = dma.done.wait [#allocation11], 528  }
  0x93   :  { %9669 = vsyncadd [#allocation11], 4294966768 }
  0x94   :  { %9670 = dma.done.wait [#allocation14], 1616  }
  0x95   :  { %9671 = vsyncadd [#allocation14], 4294965680 }
  0x96   :  { %9672 = dma.done.wait [#allocation17], 16  }
  0x97   :  { %9673 = vsyncadd [#allocation17], 4294967280  ;;  %v8898_v1 = vld [vmem:[#allocation7 + $0x40] sm:$0xff]   ;;  %v8900_v3 = vld [vmem:[#allocation7 + $0x48] sm:$0xff]   ;;  %v9688_v36 = vmov 0.0   ;;  %vm9689_vm0 = vmmov 0  }
  0x98   :  { %v8899_v2 = vld [vmem:[#allocation7] sm:$0xff]   ;;  %7894 = vmatprep.subr.bf16.mxu0 %v8898_v1  ;;  %v8901_v4 = vld [vmem:[#allocation7 + $0x8] sm:$0xff]   ;;  %v8902_v5 = vld [vmem:[#allocation7 + $0x50] sm:$0xff]   ;;  %vm362_vm1 = vcmask 523264   ;;  %vm408_vm2 = vcmask 64512   ;;  %vm685_vm3 = vcmask 130112  }
  0x99   :  { %7895 = vmatpush3.bf16.msra.mxu0 %v8899_v2  ;;  %v8903_v6 = vld [vmem:[#allocation7 + $0x10] sm:$0xff]   ;;  %v8904_v7 = vld [vmem:[#allocation7 + $0x58] sm:$0xff]   ;;  %v8906_v8 = vld [vmem:[#allocation7 + $0x40] sm:$0xff]   ;;  %s9690_s7 = smov 16   ;;  %vm962_vm4 = vcmask 195712   ;;  %s9691_s16 = smov 24  }
  0x9a   :  { %7896 = vmatprep.subr.bf16.mxu0 %v8900_v3  ;;  %v8907_v9 = vld [vmem:[#allocation7] sm:$0xff]   ;;  %v8905_v10 = vld [vmem:[#allocation7 + $0x18] sm:$0xff]   ;;  %7921 = vmatprep.subr.bf16.mxu1 %v8906_v8  ;;  %v8910_v12 = vld [vmem:[#allocation7 + $0x48] sm:$0xff]   ;;  %vm1239_vm5 = vcmask 261312   ;;  %s9692_s17 = smov 32   ;;  %vm1516_vm6 = vcmask 326912  }
  0x9b   :  { %7922 = vmatpush3.bf16.msra.mxu1 %v8907_v9  ;;  %v8908_v11 = vld [vmem:[#allocation7 + $0x60] sm:$0xff]   ;;  %v8911_v13 = vld [vmem:[#allocation7 + $0x8] sm:$0xff]   ;;  %v8914_v16 = vld [vmem:[#allocation7 + $0x50] sm:$0xff]   ;;  %s9693_s18 = smov 40   ;;  %vm1793_vm7 = vcmask 392512   ;;  %s9694_s19 = smov 48  }
  0x9c   :  { %v8909_v14 = vld [vmem:[#allocation7 + $0x20] sm:$0xff]   ;;  %7923 = vmatprep.subr.bf16.mxu1 %v8910_v12  ;;  %v8912_v15 = vld [vmem:[#allocation7 + $0x68] sm:$0xff]   ;;  %v8915_v17 = vld [vmem:[#allocation7 + $0x10] sm:$0xff]   ;;  %vm2070_vm8 = vcmask 458112   ;;  %s9695_s22 = smov 56   ;;  %vm2347_vm9 = vcmask 523712  }
  0x9d   :  { %7897 = vmatpush3.bf16.msra.mxu0 %v8901_v4  ;;  %v8913_v18 = vld [vmem:[#allocation7 + $0x28] sm:$0xff]   ;;  %v8916_v19 = vld [vmem:[#allocation7 + $0x70] sm:$0xff]   ;;  %v8918_v20 = vld [vmem:[#allocation7 + $0x58] sm:$0xff]   ;;  %vm2624_vm10 = vcmask 589312   ;;  %s9696_s23 = smov 72   ;;  %vm2901_vm11 = vcmask 654912  }
  0x9e   :  { %7898 = vmatprep.subr.bf16.mxu0 %v8902_v5  ;;  %v8919_v21 = vld [vmem:[#allocation7 + $0x18] sm:$0xff]   ;;  %v8917_v22 = vld [vmem:[#allocation7 + $0x30] sm:$0xff]   ;;  %v8922_v24 = vld [vmem:[#allocation7 + $0x60] sm:$0xff]   ;;  %s9697_s24 = smov 80   ;;  %vm3178_vm12 = vcmask 720512   ;;  %s9698_s3 = smov 88  }
  0x9f   :  { %7924 = vmatpush3.bf16.msra.mxu1 %v8911_v13  ;;  %v8920_v23 = vld [vmem:[#allocation7 + $0x78] sm:$0xff]   ;;  %v8923_v26 = vld [vmem:[#allocation7 + $0x20] sm:$0xff]   ;;  %v8926_v29 = vld [vmem:[#allocation7 + $0x68] sm:$0xff]   ;;  %vm3455_vm13 = vcmask 786112   ;;  %s9699_s25 = smov 96   ;;  %vm3732_vm14 = vcmask 851712  }
  0xa0   :  { %7925 = vmatprep.subr.bf16.mxu1 %v8914_v16  ;;  %v8921_v25 = vld [vmem:[#allocation7 + $0x38] sm:$0xff]   ;;  %v8927_v30 = vld [vmem:[#allocation7 + $0x28] sm:$0xff]   ;;  %v8928_v31 = vld [vmem:[#allocation7 + $0x70] sm:$0xff]   ;;  %s9700_s26 = smov 104   ;;  %vm4009_vm15 = vcmask 917312   ;;  %s9701_s0 = smov 112  }
  0xa1   :  { %7899 = vmatpush3.bf16.msra.mxu0 %v8903_v6  ;;  %v137_v27 = vld [vmem:[#allocation4] sm:$0xff]  ;;  %v8929_v33 = vld [vmem:[#allocation7 + $0x30] sm:$0xff]   ;;  %v411_v35 = vld [vmem:[#allocation4 + $0x8] sm:$0xff]  ;;  %s9702_s28 = smov 120  }
  0xa2   :  { %7900 = vmatprep.subr.bf16.mxu0 %v8904_v7  ;;  %v7254_v28 = vcombine.high %v137_v27, %v137_v27  ;;  %v7253_v32 = vcombine.low %v137_v27, %v137_v27  ;;  %v8930_v34 = vld [vmem:[#allocation7 + $0x78] sm:$0xff]   ;;  %v7279_v38 = vcombine.high %v411_v35, %v411_v35  ;;  %v8934_v39 = vld [vmem:[#allocation10] sm:$0xff]   ;;  %v7278_v40 = vcombine.low %v411_v35, %v411_v35  ;;  %v8935_v41 = vld [vmem:[#allocation10 + $0x8] sm:$0xff]  }
  0xa3   :  { %7926 = vmatpush3.bf16.msra.mxu1 %v8915_v17  ;;  %v8931_v37 = vld [vmem:[#allocation7 + $0x38] sm:$0xff]   ;;  %v9874_v44 = vld [vmem:[#allocation9] ss:$0 sm:$0xff]  ;;  %v8938_v54 = vld [vmem:[#allocation10] sm:$0xff]  }
  0xa4   :  { %7927 = vmatprep.subr.bf16.mxu1 %v8918_v20  ;;  %312 = vmatprep.mubr.bf16.mxu0 %v7254_v28  ;;  %v8936_v42 = vld [vmem:[#allocation10 + $0x10] sm:$0xff]   ;;  %v8937_v43 = vld [vmem:[#allocation10 + $0x18] sm:$0xff]   ;;  %v8939_v60 = vld [vmem:[#allocation10 + $0x8] sm:$0xff]  }
  0xa5   :  { %7901 = vmatpush3.bf16.msra.mxu0 %v8905_v10  ;;  %586 = vmatprep.mubr.bf16.mxu1 %v7279_v38  ;;  %v8940_v63 = vld [vmem:[#allocation10 + $0x10] sm:$0xff]   ;;  %v8941_v0 = vld [vmem:[#allocation10 + $0x18] sm:$0xff]   ;;  %v688_v2 = vld [vmem:[#allocation4 + $0x10] sm:$0xff] }
  0xa6   :  { %7902 = vmatprep.subr.bf16.mxu0 %v8908_v11  ;;  %v8942_v1 = vld [vmem:[#allocation7 + $0x40] sm:$0xff]   ;;  %v8944_v5 = vld [vmem:[#allocation7 + $0x48] sm:$0xff]   ;;  %v7304_v6 = vcombine.high %v688_v2, %v688_v2  ;;  %v8946_v9 = vld [vmem:[#allocation7 + $0x50] sm:$0xff]  }
  0xa7   :  { %7928 = vmatpush3.bf16.msra.mxu1 %v8919_v21  ;;  %v8943_v4 = vld [vmem:[#allocation7] sm:$0xff]   ;;  %v8945_v8 = vld [vmem:[#allocation7 + $0x8] sm:$0xff]   ;;  %v8947_v10 = vld [vmem:[#allocation7 + $0x10] sm:$0xff]   ;;  %v7303_v21 = vcombine.low %v688_v2, %v688_v2 }
  0xa8   :  { %7929 = vmatprep.subr.bf16.mxu1 %v8922_v24  ;;  %v8948_v11 = vld [vmem:[#allocation7 + $0x58] sm:$0xff]   ;;  %v8950_v13 = vld [vmem:[#allocation7 + $0x60] sm:$0xff]   ;;  %v8953_v16 = vld [vmem:[#allocation7 + $0x28] sm:$0xff]  }
  0xa9   :  { %7903 = vmatpush3.bf16.msra.mxu0 %v8909_v14  ;;  %v8949_v12 = vld [vmem:[#allocation7 + $0x18] sm:$0xff]   ;;  %v8951_v14 = vld [vmem:[#allocation7 + $0x20] sm:$0xff]   ;;  %v8954_v17 = vld [vmem:[#allocation7 + $0x70] sm:$0xff]  }
  0xaa   :  { %7904 = vmatprep.subr.bf16.mxu0 %v8912_v15  ;;  %v8952_v15 = vld [vmem:[#allocation7 + $0x68] sm:$0xff]   ;;  %v8957_v20 = vld [vmem:[#allocation7 + $0x38] sm:$0xff]   ;;  %v9891_v27 = vld [vmem:[#allocation12] ss:$0 sm:$0xff] }
  0xab   :  { %7930 = vmatpush3.bf16.msra.mxu1 %v8923_v26  ;;  %v8962_v24 = vld [vmem:[#allocation10 + $0x10] sm:$0xff]   ;;  %v8964_v26 = vld [vmem:[#allocation7 + $0x40] sm:$0xff]  }
  0xac   :  { %7931 = vmatprep.subr.bf16.mxu1 %v8926_v29  ;;  %v8977_v2 = vld [vmem:[#allocation7 + $0x30] sm:$0xff]  }
  0xad   :  { %7905 = vmatpush3.bf16.msra.mxu0 %v8913_v18  ;;  %v8955_v18 = vld [vmem:[#allocation7 + $0x30] sm:$0xff]  }
  0xae   :  { %7906 = vmatprep.subr.bf16.mxu0 %v8916_v19  ;;  %v8956_v19 = vld [vmem:[#allocation7 + $0x78] sm:$0xff]  }
  0xaf   :  { %7932 = vmatpush3.bf16.msra.mxu1 %v8927_v30 }
  0xb0   :  { %7933 = vmatprep.subr.bf16.mxu1 %v8928_v31 }
  0xb1   :  { %7907 = vmatpush3.bf16.msra.mxu0 %v8917_v22  ;;  %v8960_v22 = vld [vmem:[#allocation10] sm:$0xff]  }
  0xb2   :  { %7908 = vmatprep.subr.bf16.mxu0 %v8920_v23  ;;  %v8961_v23 = vld [vmem:[#allocation10 + $0x8] sm:$0xff]  }
  0xb3   :  { %7934 = vmatpush3.bf16.msra.mxu1 %v8929_v33 }
  0xb4   :  { %7935 = vmatprep.subr.bf16.mxu1 %v8930_v34 }
  0xb5   :  { %7909 = vmatpush3.bf16.msra.mxu0 %v8921_v25  ;;  %v8963_v25 = vld [vmem:[#allocation10 + $0x18] sm:$0xff]  }
  0xb6   :  { %8569 = vmatprep.subr.bf16.mxu0 %v9688_v36 }
  0xb7   :  { %7936 = vmatpush3.bf16.msra.mxu1 %v8931_v37 }
  0xb8   :  { %313 = vmatmul.mubr.bf16.vlgmr.msra.gmra.mrb[0].mxu0 %v7253_v32  ;;  %8593 = vmatprep.subr.bf16.mxu1 %v9688_v36 }
  0xb9   :  { %8570 = vmatpush3.bf16.msra.mxu0 %v8934_v39  ;;  %8577 = vmatprep.mubr.msk.bf16.mxu0 %vm9689_vm0, %v9688_v36 }
  0xba   :  { %8571 = vmatprep.subr.bf16.mxu0 %v9688_v36  ;;  %587 = vmatmul.mubr.bf16.vlgmr.msra.gmra.mrb[0].mxu1 %v7278_v40 }
  0xbb   :  { %8601 = vmatprep.mubr.msk.bf16.mxu1 %vm9689_vm0, %v9688_v36  ;;  %8594 = vmatpush3.bf16.msra.mxu1 %v8960_v22 }
  0xbc   :  { %8595 = vmatprep.subr.bf16.mxu1 %v9688_v36 }
  0xbd   :  { %8572 = vmatpush3.bf16.msra.mxu0 %v8935_v41 }
  0xbe   :  { %8573 = vmatprep.subr.bf16.mxu0 %v9688_v36 }
  0xbf   :  { %8596 = vmatpush3.bf16.msra.mxu1 %v8961_v23 }
  0xc0   :  { %8597 = vmatprep.subr.bf16.mxu1 %v9688_v36 }
  0xc1   :  { %8574 = vmatpush3.bf16.msra.mxu0 %v8936_v42 }
  0xc2   :  { %8575 = vmatprep.subr.bf16.mxu0 %v9688_v36 }
  0xc3   :  { %8598 = vmatpush3.bf16.msra.mxu1 %v8962_v24  ;;  %v9908_v24 = vld [vmem:[#allocation9] ss:$0 sm:$0xff] }
  0xc4   :  { %8599 = vmatprep.subr.bf16.mxu1 %v9688_v36 }
  0xc5   :  { %8576 = vmatpush3.bf16.msra.mxu0 %v8937_v43 }
  0xc6   :  { %8581 = vmatprep.subr.bf16.mxu0 %v9688_v36 }
  0xc7   :  { %8600 = vmatpush3.bf16.msra.mxu1 %v8963_v25 }
  0xc8   :  { %7975 = vmatprep.subr.bf16.mxu1 %v8964_v26 }
 0x18b   :  { %v7910_v45 = vpop.f32.mrb[0].mxu0 }
 0x18c   :  { %v7911_v46 = vpop.f32.mrb[1].mxu0 }
 0x18d   :  { %v7912_v47 = vadd.f32 %v7911_v46, %v7910_v45  ;;  %v7913_v48 = vpop.f32.mrb[2].mxu0  ;;  %v7937_v53 = vpop.f32.mrb[0].mxu1 }
 0x18e   :  { %v7914_v49 = vpop.f32.mrb[3].mxu0  ;;  %v7938_v55 = vpop.f32.mrb[1].mxu1 }
 0x18f   :  { %v315_v50 = vadd.f32 %v7912_v47, %v9874_v44  ;;  %v7939_v57 = vadd.f32 %v7938_v55, %v7937_v53  ;;  %v7940_v58 = vpop.f32.mrb[2].mxu1  ;;  %v8965_v53 = vld [vmem:[#allocation7] sm:$0xff]  }
 0x190   :  { %v7941_v59 = vpop.f32.mrb[3].mxu1  ;;  %v8968_v58 = vld [vmem:[#allocation7 + $0x50] sm:$0xff]  }
 0x191   :  { %v320_v51 = vmul.f32 0.2, %v315_v50  ;;  %v589_v61 = vadd.f32 %v7939_v57, %v9874_v44  ;;  %v8967_v57 = vld [vmem:[#allocation7 + $0x8] sm:$0xff]   ;;  %v8969_v59 = vld [vmem:[#allocation7 + $0x10] sm:$0xff]  }
 0x193   :  { %v321_v52 = vmax.f32 %v315_v50, %v320_v51  ;;  %v594_v62 = vmul.f32 0.2, %v589_v61  ;;  %v965_v51 = vld [vmem:[#allocation4 + $0x18] sm:$0xff] }
 0x195   :  { %v322_v56 = vpack.c.bf16 %v321_v52, %v321_v52  ;;  %v595_v3 = vmax.f32 %v589_v61, %v594_v62  ;;  %v8972_v61 = vld [vmem:[#allocation7 + $0x60] sm:$0xff]  }
 0x196   :  { %v8973_v62 = vld [vmem:[#allocation7 + $0x20] sm:$0xff]  }
 0x197   :  { %8578 = vmatmul.mubr.msk.bf16.vlgmr.msra.gmra.mrb[4].mxu0 %vm362_vm1, %v322_v56  ;;  %v596_v7 = vpack.c.bf16 %v595_v3, %v595_v3  ;;  %v8966_v56 = vld [vmem:[#allocation7 + $0x48] sm:$0xff]   ;;  %v8978_v3 = vld [vmem:[#allocation7 + $0x78] sm:$0xff]  }
 0x198   :  { %8582 = vmatpush3.bf16.msra.mxu0 %v8938_v54  ;;  %8589 = vmatprep.mubr.msk.bf16.mxu0 %vm9689_vm0, %v9688_v36  ;;  %v7329_v54 = vcombine.high %v965_v51, %v965_v51 }
 0x199   :  { %8583 = vmatprep.subr.bf16.mxu0 %v9688_v36 }
 0x19c   :  { %8584 = vmatpush3.bf16.msra.mxu0 %v8939_v60  ;;  %v8970_v60 = vld [vmem:[#allocation7 + $0x58] sm:$0xff]  }
 0x19d   :  { %8585 = vmatprep.subr.bf16.mxu0 %v9688_v36 }
 0x1a0   :  { %8586 = vmatpush3.bf16.msra.mxu0 %v8940_v63  ;;  %v8974_v63 = vld [vmem:[#allocation7 + $0x68] sm:$0xff]  }
 0x1a1   :  { %8587 = vmatprep.subr.bf16.mxu0 %v9688_v36 }
 0x1a4   :  { %8588 = vmatpush3.bf16.msra.mxu0 %v8941_v0  ;;  %v8975_v0 = vld [vmem:[#allocation7 + $0x28] sm:$0xff]  }
 0x1a5   :  { %7948 = vmatprep.subr.bf16.mxu0 %v8942_v1  ;;  %v8976_v1 = vld [vmem:[#allocation7 + $0x70] sm:$0xff]  }
 0x1a7   :  { %8590 = vmatmul.mubr.msk.bf16.vlgmr.msra.gmra.mrb[8].mxu0 %vm362_vm1, %v596_v7  ;;  %v8982_v7 = vld [vmem:[#allocation10] sm:$0xff]  }
 0x1a8   :  { %7949 = vmatpush3.bf16.msra.mxu0 %v8943_v4  ;;  %863 = vmatprep.mubr.bf16.mxu0 %v7304_v6  ;;  %v8979_v4 = vld [vmem:[#allocation7 + $0x38] sm:$0xff]  }
 0x1a9   :  { %7950 = vmatprep.subr.bf16.mxu0 %v8944_v5  ;;  %v7328_v5 = vcombine.low %v965_v51, %v965_v51  ;;  %v9004_v51 = vld [vmem:[#allocation10] sm:$0xff]  }
 0x1ac   :  { %7951 = vmatpush3.bf16.msra.mxu0 %v8945_v8  ;;  %v8983_v8 = vld [vmem:[#allocation10 + $0x8] sm:$0xff]  }
 0x1ad   :  { %7952 = vmatprep.subr.bf16.mxu0 %v8946_v9  ;;  %v8984_v9 = vld [vmem:[#allocation10 + $0x10] sm:$0xff]  }
 0x1b0   :  { %7953 = vmatpush3.bf16.msra.mxu0 %v8947_v10  ;;  %v8985_v10 = vld [vmem:[#allocation10 + $0x18] sm:$0xff]  }
 0x1b1   :  { %7954 = vmatprep.subr.bf16.mxu0 %v8948_v11  ;;  %v8986_v11 = vld [vmem:[#allocation7 + $0x40] sm:$0xff]  }
 0x1b4   :  { %7955 = vmatpush3.bf16.msra.mxu0 %v8949_v12 }
 0x1b5   :  { %7956 = vmatprep.subr.bf16.mxu0 %v8950_v13 }
 0x1b8   :  { %7957 = vmatpush3.bf16.msra.mxu0 %v8951_v14 }
 0x1b9   :  { %7958 = vmatprep.subr.bf16.mxu0 %v8952_v15 }
 0x1bc   :  { %7959 = vmatpush3.bf16.msra.mxu0 %v8953_v16 }
 0x1bd   :  { %7960 = vmatprep.subr.bf16.mxu0 %v8954_v17 }
 0x1c0   :  { %7961 = vmatpush3.bf16.msra.mxu0 %v8955_v18 }
 0x1c1   :  { %7962 = vmatprep.subr.bf16.mxu0 %v8956_v19 }
 0x1c4   :  { %7963 = vmatpush3.bf16.msra.mxu0 %v8957_v20 }
 0x1c5   :  { %8605 = vmatprep.subr.bf16.mxu0 %v9688_v36 }
 0x1c7   :  { %864 = vmatmul.mubr.bf16.vlgmr.msra.gmra.mrb[12].mxu0 %v7303_v21 }
 0x1c8   :  { %8613 = vmatprep.mubr.msk.bf16.mxu0 %vm9689_vm0, %v9688_v36  ;;  %8606 = vmatpush3.bf16.msra.mxu0 %v8982_v7  ;;  %v9009_v7 = vld [vmem:[#allocation7] sm:$0xff]  }
 0x1c9   :  { %8607 = vmatprep.subr.bf16.mxu0 %v9688_v36 }
 0x1cc   :  { %8608 = vmatpush3.bf16.msra.mxu0 %v8983_v8 }
 0x1cd   :  { %8609 = vmatprep.subr.bf16.mxu0 %v9688_v36 }
 0x1d0   :  { %8610 = vmatpush3.bf16.msra.mxu0 %v8984_v9 }
 0x1d1   :  { %8611 = vmatprep.subr.bf16.mxu0 %v9688_v36 }
 0x1d4   :  { %8612 = vmatpush3.bf16.msra.mxu0 %v8985_v10  ;;  %v9010_v10 = vld [vmem:[#allocation7 + $0x48] sm:$0xff]  }
 0x1d5   :  { %8002 = vmatprep.subr.bf16.mxu0 %v8986_v11  ;;  %v9011_v11 = vld [vmem:[#allocation7 + $0x8] sm:$0xff]  }
 0x26a   :  { %v400_v28 = vpop.f32.mrb[4].mxu0 }
 0x26b   :  { %v401_v29 = vadd.f32 %v9891_v27, %v400_v28  ;;  %v8579_v30 = vpop.f32.mrb[5].mxu0  ;;  %v1242_v28 = vld [vmem:[#allocation4 + $0x20] sm:$0xff] }
 0x26c   :  { %v403_v31 = vpop.f32.mrb[6].mxu0  ;;  %v8987_v30 = vld [vmem:[#allocation7] sm:$0xff]  }
 0x26d   :  { %v406_v32 = vmul.f32 0.2, %v401_v29  ;;  %v8580_v33 = vpop.f32.mrb[7].mxu0  ;;  %v7354_v31 = vcombine.high %v1242_v28, %v1242_v28 }
 0x26e   :  { %v8988_v33 = vld [vmem:[#allocation7 + $0x48] sm:$0xff]  }
 0x26f   :  { %v407_v34 = vmax.f32 %v401_v29, %v406_v32 }
 0x271   :  { %409 = vst.msk [vmem:[#allocation2] sm:$0xff] %vm408_vm2, %v407_v34  ;;  %v8989_v34 = vld [vmem:[#allocation7 + $0x8] sm:$0xff]  }
 0x27a   :  { %v673_v35 = vpop.f32.mrb[8].mxu0 }
 0x27b   :  { %v674_v37 = vadd.f32 %v9891_v27, %v673_v35  ;;  %v8591_v38 = vpop.f32.mrb[9].mxu0  ;;  %v8990_v35 = vld [vmem:[#allocation7 + $0x50] sm:$0xff]  }
 0x27c   :  { %v676_v39 = vpop.f32.mrb[10].mxu0  ;;  %v8992_v38 = vld [vmem:[#allocation7 + $0x58] sm:$0xff]  }
 0x27d   :  { %v8592_v40 = vpop.f32.mrb[11].mxu0  ;;  %v679_v41 = vmul.f32 0.2, %v674_v37  ;;  %v8993_v39 = vld [vmem:[#allocation7 + $0x18] sm:$0xff]  }
 0x27e   :  { %v8994_v40 = vld [vmem:[#allocation7 + $0x60] sm:$0xff]  }
 0x27f   :  { %v680_v42 = vmax.f32 %v674_v37, %v679_v41  ;;  %v8991_v37 = vld [vmem:[#allocation7 + $0x10] sm:$0xff]   ;;  %v8995_v41 = vld [vmem:[#allocation7 + $0x20] sm:$0xff]  }
 0x281   :  { %682 = vrot.lane.b32.xlu0 %v680_v42, %s9683_s21  ;;  %v8996_v42 = vld [vmem:[#allocation7 + $0x68] sm:$0xff]  }
 0x29a   :  { %v7964_v43 = vpop.f32.mrb[12].mxu0 }
 0x29b   :  { %v7965_v45 = vpop.f32.mrb[13].mxu0 }
 0x29c   :  { %v7966_v46 = vadd.f32 %v7965_v45, %v7964_v43  ;;  %v7967_v47 = vpop.f32.mrb[14].mxu0  ;;  %v8997_v43 = vld [vmem:[#allocation7 + $0x28] sm:$0xff]   ;;  %v8998_v45 = vld [vmem:[#allocation7 + $0x70] sm:$0xff]  }
 0x29d   :  { %v7968_v48 = vpop.f32.mrb[15].mxu0  ;;  %v9000_v47 = vld [vmem:[#allocation7 + $0x78] sm:$0xff]  }
 0x29e   :  { %v866_v49 = vadd.f32 %v7966_v46, %v9874_v44  ;;  %v8971_v44 = vld [vmem:[#allocation7 + $0x18] sm:$0xff]   ;;  %v8999_v46 = vld [vmem:[#allocation7 + $0x30] sm:$0xff]  }
 0x29f   :  { %v9001_v48 = vld [vmem:[#allocation7 + $0x38] sm:$0xff]  }
 0x2a0   :  { %v871_v50 = vmul.f32 0.2, %v866_v49 }
 0x2a2   :  { %v872_v52 = vmax.f32 %v866_v49, %v871_v50  ;;  %v7353_v49 = vcombine.low %v1242_v28, %v1242_v28  ;;  %v9026_v28 = vld [vmem:[#allocation10] sm:$0xff]  }
 0x2a4   :  { %v873_v55 = vpack.c.bf16 %v872_v52, %v872_v52  ;;  %v9005_v52 = vld [vmem:[#allocation10 + $0x8] sm:$0xff]  }
 0x2a6   :  { %8602 = vmatmul.mubr.msk.bf16.vlgmr.msra.gmra.mrb[4].mxu1 %vm362_vm1, %v873_v55  ;;  %v9008_v55 = vld [vmem:[#allocation7 + $0x40] sm:$0xff]  }
 0x2a7   :  { %7976 = vmatpush3.bf16.msra.mxu1 %v8965_v53  ;;  %1140 = vmatprep.mubr.bf16.mxu1 %v7329_v54  ;;  %v9006_v53 = vld [vmem:[#allocation10 + $0x10] sm:$0xff]   ;;  %v9007_v54 = vld [vmem:[#allocation10 + $0x18] sm:$0xff]  }
 0x2a8   :  { %7977 = vmatprep.subr.bf16.mxu1 %v8966_v56 }
 0x2ab   :  { %7978 = vmatpush3.bf16.msra.mxu1 %v8967_v57 }
 0x2ac   :  { %7979 = vmatprep.subr.bf16.mxu1 %v8968_v58 }
 0x2af   :  { %7980 = vmatpush3.bf16.msra.mxu1 %v8969_v59 }
 0x2b0   :  { %7981 = vmatprep.subr.bf16.mxu1 %v8970_v60 }
 0x2b3   :  { %7982 = vmatpush3.bf16.msra.mxu1 %v8971_v44 }
 0x2b4   :  { %7983 = vmatprep.subr.bf16.mxu1 %v8972_v61 }
 0x2b7   :  { %7984 = vmatpush3.bf16.msra.mxu1 %v8973_v62 }
 0x2b8   :  { %7985 = vmatprep.subr.bf16.mxu1 %v8974_v63 }
 0x2bb   :  { %7986 = vmatpush3.bf16.msra.mxu1 %v8975_v0 }
 0x2bc   :  { %7987 = vmatprep.subr.bf16.mxu1 %v8976_v1 }
 0x2bf   :  { %7988 = vmatpush3.bf16.msra.mxu1 %v8977_v2 }
 0x2c0   :  { %7989 = vmatprep.subr.bf16.mxu1 %v8978_v3 }
 0x2c3   :  { %7990 = vmatpush3.bf16.msra.mxu1 %v8979_v4 }
 0x2c4   :  { %8617 = vmatprep.subr.bf16.mxu1 %v9688_v36 }
 0x2c6   :  { %1141 = vmatmul.mubr.bf16.vlgmr.msra.gmra.mrb[8].mxu1 %v7328_v5  ;;  %v1519_v5 = vld [vmem:[#allocation4 + $0x28] sm:$0xff] }
 0x2c7   :  { %8625 = vmatprep.mubr.msk.bf16.mxu1 %vm9689_vm0, %v9688_v36  ;;  %8618 = vmatpush3.bf16.msra.mxu1 %v9004_v51  ;;  %v7379_v8 = vcombine.high %v1519_v5, %v1519_v5  ;;  %v9031_v51 = vld [vmem:[#allocation7] sm:$0xff]  }
 0x2c8   :  { %8619 = vmatprep.subr.bf16.mxu1 %v9688_v36 }
 0x2cb   :  { %8620 = vmatpush3.bf16.msra.mxu1 %v9005_v52 }
 0x2cc   :  { %8621 = vmatprep.subr.bf16.mxu1 %v9688_v36 }
 0x2cf   :  { %8622 = vmatpush3.bf16.msra.mxu1 %v9006_v53 }
 0x2d0   :  { %8623 = vmatprep.subr.bf16.mxu1 %v9688_v36 }
 0x2d3   :  { %8624 = vmatpush3.bf16.msra.mxu1 %v9007_v54  ;;  %v9032_v54 = vld [vmem:[#allocation7 + $0x48] sm:$0xff]  }
 0x2d4   :  { %8029 = vmatprep.subr.bf16.mxu1 %v9008_v55  ;;  %v9033_v55 = vld [vmem:[#allocation7 + $0x8] sm:$0xff]  }
 0x2f3   :  { %v683_v6 = vpop.permute.xlu0 %682 }
 0x2f4   :  { %686 = vst.msk [vmem:[#allocation2] sm:$0xff] %vm685_vm3, %v683_v6 }
 0x379   :  { %v950_v12 = vpop.f32.mrb[4].mxu1 }
 0x37a   :  { %v951_v13 = vadd.f32 %v9891_v27, %v950_v12  ;;  %v8603_v14 = vpop.f32.mrb[5].mxu1  ;;  %v9012_v12 = vld [vmem:[#allocation7 + $0x50] sm:$0xff]  }
 0x37b   :  { %v953_v15 = vpop.f32.mrb[6].mxu1  ;;  %v9014_v14 = vld [vmem:[#allocation7 + $0x58] sm:$0xff]  }
 0x37c   :  { %v956_v16 = vmul.f32 0.2, %v951_v13  ;;  %v8604_v17 = vpop.f32.mrb[7].mxu1  ;;  %v9015_v15 = vld [vmem:[#allocation7 + $0x18] sm:$0xff]  }
 0x37d   :  { %v9017_v17 = vld [vmem:[#allocation7 + $0x20] sm:$0xff]  }
 0x37e   :  { %v957_v18 = vmax.f32 %v951_v13, %v956_v16  ;;  %v9013_v13 = vld [vmem:[#allocation7 + $0x10] sm:$0xff]   ;;  %v9016_v16 = vld [vmem:[#allocation7 + $0x60] sm:$0xff]  }
 0x380   :  { %959 = vrot.lane.b32.xlu0 %v957_v18, %s9690_s7  ;;  %v9018_v18 = vld [vmem:[#allocation7 + $0x68] sm:$0xff]  }
 0x399   :  { %v7991_v19 = vpop.f32.mrb[8].mxu1 }
 0x39a   :  { %v7992_v20 = vpop.f32.mrb[9].mxu1 }
 0x39b   :  { %v7993_v21 = vadd.f32 %v7992_v20, %v7991_v19  ;;  %v7994_v22 = vpop.f32.mrb[10].mxu1  ;;  %v9019_v19 = vld [vmem:[#allocation7 + $0x28] sm:$0xff]   ;;  %v9020_v20 = vld [vmem:[#allocation7 + $0x70] sm:$0xff]  }
 0x39c   :  { %v7995_v23 = vpop.f32.mrb[11].mxu1  ;;  %v9022_v22 = vld [vmem:[#allocation7 + $0x78] sm:$0xff]  }
 0x39d   :  { %v1143_v25 = vadd.f32 %v9908_v24, %v7993_v21  ;;  %v9021_v21 = vld [vmem:[#allocation7 + $0x30] sm:$0xff]   ;;  %v9023_v23 = vld [vmem:[#allocation7 + $0x38] sm:$0xff]  }
 0x39f   :  { %v1148_v26 = vmul.f32 0.2, %v1143_v25 }
 0x3a1   :  { %v1149_v29 = vmax.f32 %v1143_v25, %v1148_v26  ;;  %v7378_v25 = vcombine.low %v1519_v5, %v1519_v5  ;;  %v9049_v5 = vld [vmem:[#allocation10 + $0x8] sm:$0xff]  }
 0x3a3   :  { %v1150_v32 = vpack.c.bf16 %v1149_v29, %v1149_v29  ;;  %v9027_v29 = vld [vmem:[#allocation10 + $0x8] sm:$0xff]  }
 0x3a5   :  { %8614 = vmatmul.mubr.msk.bf16.vlgmr.msra.gmra.mrb[16].mxu0 %vm362_vm1, %v1150_v32  ;;  %v9030_v32 = vld [vmem:[#allocation7 + $0x40] sm:$0xff]  }
 0x3a6   :  { %8003 = vmatpush3.bf16.msra.mxu0 %v8987_v30  ;;  %1417 = vmatprep.mubr.bf16.mxu0 %v7354_v31  ;;  %v9028_v30 = vld [vmem:[#allocation10 + $0x10] sm:$0xff]   ;;  %v9029_v31 = vld [vmem:[#allocation10 + $0x18] sm:$0xff]  }
 0x3a7   :  { %8004 = vmatprep.subr.bf16.mxu0 %v8988_v33 }
 0x3aa   :  { %8005 = vmatpush3.bf16.msra.mxu0 %v8989_v34 }
 0x3ab   :  { %8006 = vmatprep.subr.bf16.mxu0 %v8990_v35 }
 0x3ae   :  { %8007 = vmatpush3.bf16.msra.mxu0 %v8991_v37 }
 0x3af   :  { %8008 = vmatprep.subr.bf16.mxu0 %v8992_v38 }
 0x3b2   :  { %8009 = vmatpush3.bf16.msra.mxu0 %v8993_v39 }
 0x3b3   :  { %8010 = vmatprep.subr.bf16.mxu0 %v8994_v40 }
 0x3b6   :  { %8011 = vmatpush3.bf16.msra.mxu0 %v8995_v41 }
 0x3b7   :  { %8012 = vmatprep.subr.bf16.mxu0 %v8996_v42 }
 0x3ba   :  { %8013 = vmatpush3.bf16.msra.mxu0 %v8997_v43 }
 0x3bb   :  { %8014 = vmatprep.subr.bf16.mxu0 %v8998_v45 }
 0x3be   :  { %8015 = vmatpush3.bf16.msra.mxu0 %v8999_v46 }
 0x3bf   :  { %8016 = vmatprep.subr.bf16.mxu0 %v9000_v47 }
 0x3c2   :  { %8017 = vmatpush3.bf16.msra.mxu0 %v9001_v48 }
 0x3c3   :  { %8629 = vmatprep.subr.bf16.mxu0 %v9688_v36 }
 0x3c5   :  { %1418 = vmatmul.mubr.bf16.vlgmr.msra.gmra.mrb[20].mxu0 %v7353_v49  ;;  %v1796_v49 = vld [vmem:[#allocation4 + $0x30] sm:$0xff] }
 0x3c6   :  { %8637 = vmatprep.mubr.msk.bf16.mxu0 %vm9689_vm0, %v9688_v36  ;;  %8630 = vmatpush3.bf16.msra.mxu0 %v9026_v28  ;;  %v7404_v52 = vcombine.high %v1796_v49, %v1796_v49 }
 0x3c7   :  { %8631 = vmatprep.subr.bf16.mxu0 %v9688_v36 }
 0x3ca   :  { %8632 = vmatpush3.bf16.msra.mxu0 %v9027_v29 }
 0x3cb   :  { %8633 = vmatprep.subr.bf16.mxu0 %v9688_v36 }
 0x3ce   :  { %8634 = vmatpush3.bf16.msra.mxu0 %v9028_v30  ;;  %v9054_v30 = vld [vmem:[#allocation7 + $0x48] sm:$0xff]  }
 0x3cf   :  { %8635 = vmatprep.subr.bf16.mxu0 %v9688_v36 }
 0x3d2   :  { %8636 = vmatpush3.bf16.msra.mxu0 %v9029_v31  ;;  %v9055_v31 = vld [vmem:[#allocation7 + $0x8] sm:$0xff]  }
 0x3d3   :  { %8056 = vmatprep.subr.bf16.mxu0 %v9030_v32  ;;  %v9056_v32 = vld [vmem:[#allocation7 + $0x50] sm:$0xff]  }
 0x3f2   :  { %v960_v50 = vpop.permute.xlu0 %959 }
 0x3f3   :  { %963 = vst.msk [vmem:[#allocation2] sm:$0xff] %vm962_vm4, %v960_v50 }
 0x478   :  { %v1227_v56 = vpop.f32.mrb[16].mxu0 }
 0x479   :  { %v1228_v57 = vadd.f32 %v9891_v27, %v1227_v56  ;;  %v8615_v58 = vpop.f32.mrb[17].mxu0  ;;  %v9034_v56 = vld [vmem:[#allocation7 + $0x50] sm:$0xff]  }
 0x47a   :  { %v1230_v59 = vpop.f32.mrb[18].mxu0  ;;  %v9036_v58 = vld [vmem:[#allocation7 + $0x58] sm:$0xff]  }
 0x47b   :  { %v1233_v60 = vmul.f32 0.2, %v1228_v57  ;;  %v8616_v44 = vpop.f32.mrb[19].mxu0  ;;  %v9038_v59 = vld [vmem:[#allocation7 + $0x60] sm:$0xff]  }
 0x47c   :  { %v9040_v44 = vld [vmem:[#allocation7 + $0x68] sm:$0xff]  }
 0x47d   :  { %v1234_v61 = vmax.f32 %v1228_v57, %v1233_v60  ;;  %v9035_v57 = vld [vmem:[#allocation7 + $0x10] sm:$0xff]   ;;  %v9039_v60 = vld [vmem:[#allocation7 + $0x20] sm:$0xff]  }
 0x47f   :  { %1236 = vrot.lane.b32.xlu1 %v1234_v61, %s9691_s16  ;;  %v9041_v61 = vld [vmem:[#allocation7 + $0x28] sm:$0xff]  }
 0x498   :  { %v8018_v62 = vpop.f32.mrb[20].mxu0 }
 0x499   :  { %v8019_v63 = vpop.f32.mrb[21].mxu0 }
 0x49a   :  { %v8020_v0 = vadd.f32 %v8019_v63, %v8018_v62  ;;  %v8021_v1 = vpop.f32.mrb[22].mxu0  ;;  %v9042_v62 = vld [vmem:[#allocation7 + $0x70] sm:$0xff]  }
 0x49b   :  { %v8022_v2 = vpop.f32.mrb[23].mxu0  ;;  %v9043_v63 = vld [vmem:[#allocation7 + $0x30] sm:$0xff]   ;;  %v9045_v1 = vld [vmem:[#allocation7 + $0x38] sm:$0xff]  }
 0x49c   :  { %v1420_v3 = vadd.f32 %v9908_v24, %v8020_v0  ;;  %v9044_v0 = vld [vmem:[#allocation7 + $0x78] sm:$0xff]   ;;  %v7403_v2 = vcombine.low %v1796_v49, %v1796_v49  ;;  %v9071_v49 = vld [vmem:[#allocation10 + $0x8] sm:$0xff]  }
 0x49e   :  { %v1425_v4 = vmul.f32 0.2, %v1420_v3 }
 0x4a0   :  { %v1426_v6 = vmax.f32 %v1420_v3, %v1425_v4  ;;  %v9048_v4 = vld [vmem:[#allocation10] sm:$0xff]  }
 0x4a2   :  { %v1427_v9 = vpack.c.bf16 %v1426_v6, %v1426_v6  ;;  %v9050_v6 = vld [vmem:[#allocation10 + $0x10] sm:$0xff]  }
 0x4a4   :  { %8626 = vmatmul.mubr.msk.bf16.vlgmr.msra.gmra.mrb[12].mxu1 %vm362_vm1, %v1427_v9 }
 0x4a5   :  { %8030 = vmatpush3.bf16.msra.mxu1 %v9009_v7  ;;  %1694 = vmatprep.mubr.bf16.mxu1 %v7379_v8  ;;  %v9051_v7 = vld [vmem:[#allocation10 + $0x18] sm:$0xff]  }
 0x4a6   :  { %8031 = vmatprep.subr.bf16.mxu1 %v9010_v10  ;;  %v9052_v8 = vld [vmem:[#allocation7 + $0x40] sm:$0xff]  }
 0x4a9   :  { %8032 = vmatpush3.bf16.msra.mxu1 %v9011_v11 }
 0x4aa   :  { %8033 = vmatprep.subr.bf16.mxu1 %v9012_v12 }
 0x4ad   :  { %8034 = vmatpush3.bf16.msra.mxu1 %v9013_v13 }
 0x4ae   :  { %8035 = vmatprep.subr.bf16.mxu1 %v9014_v14 }
 0x4b1   :  { %8036 = vmatpush3.bf16.msra.mxu1 %v9015_v15 }
 0x4b2   :  { %8037 = vmatprep.subr.bf16.mxu1 %v9016_v16 }
 0x4b5   :  { %8038 = vmatpush3.bf16.msra.mxu1 %v9017_v17  ;;  %v9943_v17 = vld [vmem:[#allocation9] ss:$0 sm:$0xff] }
 0x4b6   :  { %8039 = vmatprep.subr.bf16.mxu1 %v9018_v18 }
 0x4b9   :  { %8040 = vmatpush3.bf16.msra.mxu1 %v9019_v19 }
 0x4ba   :  { %8041 = vmatprep.subr.bf16.mxu1 %v9020_v20 }
 0x4bd   :  { %8042 = vmatpush3.bf16.msra.mxu1 %v9021_v21 }
 0x4be   :  { %8043 = vmatprep.subr.bf16.mxu1 %v9022_v22 }
 0x4c1   :  { %8044 = vmatpush3.bf16.msra.mxu1 %v9023_v23 }
 0x4c2   :  { %8641 = vmatprep.subr.bf16.mxu1 %v9688_v36 }
 0x4c4   :  { %1695 = vmatmul.mubr.bf16.vlgmr.msra.gmra.mrb[16].mxu1 %v7378_v25  ;;  %v2073_v25 = vld [vmem:[#allocation4 + $0x38] sm:$0xff] }
 0x4c5   :  { %8649 = vmatprep.mubr.msk.bf16.mxu1 %vm9689_vm0, %v9688_v36  ;;  %8642 = vmatpush3.bf16.msra.mxu1 %v9048_v4  ;;  %v7429_v28 = vcombine.high %v2073_v25, %v2073_v25  ;;  %v9075_v4 = vld [vmem:[#allocation7] sm:$0xff]  }
 0x4c6   :  { %8643 = vmatprep.subr.bf16.mxu1 %v9688_v36 }
 0x4c9   :  { %8644 = vmatpush3.bf16.msra.mxu1 %v9049_v5 }
 0x4ca   :  { %8645 = vmatprep.subr.bf16.mxu1 %v9688_v36 }
 0x4cd   :  { %8646 = vmatpush3.bf16.msra.mxu1 %v9050_v6 }
 0x4ce   :  { %8647 = vmatprep.subr.bf16.mxu1 %v9688_v36 }
 0x4d1   :  { %8648 = vmatpush3.bf16.msra.mxu1 %v9051_v7  ;;  %v9076_v7 = vld [vmem:[#allocation7 + $0x48] sm:$0xff]  }
 0x4d2   :  { %8083 = vmatprep.subr.bf16.mxu1 %v9052_v8  ;;  %v9077_v8 = vld [vmem:[#allocation7 + $0x8] sm:$0xff]  }
 0x4f1   :  { %v1237_v26 = vpop.permute.xlu1 %1236 }
 0x4f2   :  { %1240 = vst.msk [vmem:[#allocation2] sm:$0xff] %vm1239_vm5, %v1237_v26  ;;  %v9053_v26 = vld [vmem:[#allocation7] sm:$0xff]  }
 0x577   :  { %v1504_v33 = vpop.f32.mrb[12].mxu1 }
 0x578   :  { %v1505_v34 = vadd.f32 %v9891_v27, %v1504_v33  ;;  %v8627_v35 = vpop.f32.mrb[13].mxu1  ;;  %v9057_v33 = vld [vmem:[#allocation7 + $0x10] sm:$0xff]  }
 0x579   :  { %v1507_v37 = vpop.f32.mrb[14].mxu1  ;;  %v9059_v35 = vld [vmem:[#allocation7 + $0x18] sm:$0xff]  }
 0x57a   :  { %v1510_v38 = vmul.f32 0.2, %v1505_v34  ;;  %v8628_v39 = vpop.f32.mrb[15].mxu1  ;;  %v9060_v37 = vld [vmem:[#allocation7 + $0x60] sm:$0xff]  }
 0x57b   :  { %v9062_v39 = vld [vmem:[#allocation7 + $0x68] sm:$0xff]  }
 0x57c   :  { %v1511_v40 = vmax.f32 %v1505_v34, %v1510_v38  ;;  %v9058_v34 = vld [vmem:[#allocation7 + $0x58] sm:$0xff]   ;;  %v9061_v38 = vld [vmem:[#allocation7 + $0x20] sm:$0xff]  }
 0x57e   :  { %1513 = vrot.lane.b32.xlu1 %v1511_v40, %s9692_s17  ;;  %v9063_v40 = vld [vmem:[#allocation7 + $0x28] sm:$0xff]  }
 0x597   :  { %v8045_v41 = vpop.f32.mrb[16].mxu1 }
 0x598   :  { %v8046_v42 = vpop.f32.mrb[17].mxu1 }
 0x599   :  { %v8047_v43 = vadd.f32 %v8046_v42, %v8045_v41  ;;  %v8048_v45 = vpop.f32.mrb[18].mxu1  ;;  %v9064_v41 = vld [vmem:[#allocation7 + $0x70] sm:$0xff]  }
 0x59a   :  { %v8049_v46 = vpop.f32.mrb[19].mxu1  ;;  %v9065_v42 = vld [vmem:[#allocation7 + $0x30] sm:$0xff]   ;;  %v9067_v45 = vld [vmem:[#allocation7 + $0x38] sm:$0xff]  }
 0x59b   :  { %v1697_v47 = vadd.f32 %v9908_v24, %v8047_v43  ;;  %v9037_v24 = vld [vmem:[#allocation7 + $0x18] sm:$0xff]   ;;  %v7428_v46 = vcombine.low %v2073_v25, %v2073_v25  ;;  %v9092_v25 = vld [vmem:[#allocation10] sm:$0xff]  }
 0x59c   :  { %v9066_v43 = vld [vmem:[#allocation7 + $0x78] sm:$0xff]  }
 0x59d   :  { %v1702_v48 = vmul.f32 0.2, %v1697_v47 }
 0x59f   :  { %v1703_v50 = vmax.f32 %v1697_v47, %v1702_v48  ;;  %v9070_v48 = vld [vmem:[#allocation10] sm:$0xff]  }
 0x5a1   :  { %v1704_v53 = vpack.c.bf16 %v1703_v50, %v1703_v50  ;;  %v9072_v50 = vld [vmem:[#allocation10 + $0x10] sm:$0xff]  }
 0x5a3   :  { %8638 = vmatmul.mubr.msk.bf16.vlgmr.msra.gmra.mrb[24].mxu0 %vm362_vm1, %v1704_v53  ;;  %v9954_v53 = vld [vmem:[#allocation12] ss:$0 sm:$0xff] }
 0x5a4   :  { %8057 = vmatpush3.bf16.msra.mxu0 %v9031_v51  ;;  %1971 = vmatprep.mubr.bf16.mxu0 %v7404_v52  ;;  %v9073_v51 = vld [vmem:[#allocation10 + $0x18] sm:$0xff]  }
 0x5a5   :  { %8058 = vmatprep.subr.bf16.mxu0 %v9032_v54  ;;  %v9074_v52 = vld [vmem:[#allocation7 + $0x40] sm:$0xff]  }
 0x5a8   :  { %8059 = vmatpush3.bf16.msra.mxu0 %v9033_v55 }
 0x5a9   :  { %8060 = vmatprep.subr.bf16.mxu0 %v9034_v56 }
 0x5ac   :  { %8061 = vmatpush3.bf16.msra.mxu0 %v9035_v57 }
 0x5ad   :  { %8062 = vmatprep.subr.bf16.mxu0 %v9036_v58 }
 0x5b0   :  { %8063 = vmatpush3.bf16.msra.mxu0 %v9037_v24 }
 0x5b1   :  { %8064 = vmatprep.subr.bf16.mxu0 %v9038_v59 }
 0x5b4   :  { %8065 = vmatpush3.bf16.msra.mxu0 %v9039_v60 }
 0x5b5   :  { %8066 = vmatprep.subr.bf16.mxu0 %v9040_v44 }
 0x5b8   :  { %8067 = vmatpush3.bf16.msra.mxu0 %v9041_v61 }
 0x5b9   :  { %8068 = vmatprep.subr.bf16.mxu0 %v9042_v62 }
 0x5bc   :  { %8069 = vmatpush3.bf16.msra.mxu0 %v9043_v63 }
 0x5bd   :  { %8070 = vmatprep.subr.bf16.mxu0 %v9044_v0 }
 0x5c0   :  { %8071 = vmatpush3.bf16.msra.mxu0 %v9045_v1 }
 0x5c1   :  { %8653 = vmatprep.subr.bf16.mxu0 %v9688_v36 }
 0x5c3   :  { %1972 = vmatmul.mubr.bf16.vlgmr.msra.gmra.mrb[28].mxu0 %v7403_v2  ;;  %v2350_v2 = vld [vmem:[#allocation4 + $0x40] sm:$0xff] }
 0x5c4   :  { %8661 = vmatprep.mubr.msk.bf16.mxu0 %vm9689_vm0, %v9688_v36  ;;  %8654 = vmatpush3.bf16.msra.mxu0 %v9070_v48  ;;  %v7454_v5 = vcombine.high %v2350_v2, %v2350_v2  ;;  %v9097_v48 = vld [vmem:[#allocation7] sm:$0xff]  }
 0x5c5   :  { %8655 = vmatprep.subr.bf16.mxu0 %v9688_v36 }
 0x5c8   :  { %8656 = vmatpush3.bf16.msra.mxu0 %v9071_v49 }
 0x5c9   :  { %8657 = vmatprep.subr.bf16.mxu0 %v9688_v36 }
 0x5cc   :  { %8658 = vmatpush3.bf16.msra.mxu0 %v9072_v50 }
 0x5cd   :  { %8659 = vmatprep.subr.bf16.mxu0 %v9688_v36 }
 0x5d0   :  { %8660 = vmatpush3.bf16.msra.mxu0 %v9073_v51  ;;  %v9098_v51 = vld [vmem:[#allocation7 + $0x48] sm:$0xff]  }
 0x5d1   :  { %8110 = vmatprep.subr.bf16.mxu0 %v9074_v52  ;;  %v9099_v52 = vld [vmem:[#allocation7 + $0x8] sm:$0xff]  }
 0x5f0   :  { %v1514_v3 = vpop.permute.xlu1 %1513 }
 0x5f1   :  { %1517 = vst.msk [vmem:[#allocation2] sm:$0xff] %vm1516_vm6, %v1514_v3 }
 0x676   :  { %v1781_v9 = vpop.f32.mrb[24].mxu0 }
 0x677   :  { %v1782_v10 = vadd.f32 %v9891_v27, %v1781_v9  ;;  %v8639_v11 = vpop.f32.mrb[25].mxu0  ;;  %v9078_v9 = vld [vmem:[#allocation7 + $0x50] sm:$0xff]  }
 0x678   :  { %v1784_v12 = vpop.f32.mrb[26].mxu0  ;;  %v9080_v11 = vld [vmem:[#allocation7 + $0x58] sm:$0xff]  }
 0x679   :  { %v1787_v13 = vmul.f32 0.2, %v1782_v10  ;;  %v8640_v14 = vpop.f32.mrb[27].mxu0  ;;  %v9081_v12 = vld [vmem:[#allocation7 + $0x18] sm:$0xff]  }
 0x67a   :  { %v9083_v14 = vld [vmem:[#allocation7 + $0x20] sm:$0xff]  }
 0x67b   :  { %v1788_v15 = vmax.f32 %v1782_v10, %v1787_v13  ;;  %v9079_v10 = vld [vmem:[#allocation7 + $0x10] sm:$0xff]   ;;  %v9082_v13 = vld [vmem:[#allocation7 + $0x60] sm:$0xff]  }
 0x67d   :  { %1790 = vrot.lane.b32.xlu0 %v1788_v15, %s9693_s18  ;;  %v9084_v15 = vld [vmem:[#allocation7 + $0x68] sm:$0xff]  }
 0x696   :  { %v8072_v16 = vpop.f32.mrb[28].mxu0 }
 0x697   :  { %v8073_v18 = vpop.f32.mrb[29].mxu0 }
 0x698   :  { %v8074_v19 = vadd.f32 %v8073_v18, %v8072_v16  ;;  %v8075_v20 = vpop.f32.mrb[30].mxu0  ;;  %v9085_v16 = vld [vmem:[#allocation7 + $0x28] sm:$0xff]   ;;  %v9086_v18 = vld [vmem:[#allocation7 + $0x70] sm:$0xff]  }
 0x699   :  { %v8076_v21 = vpop.f32.mrb[31].mxu0  ;;  %v9088_v20 = vld [vmem:[#allocation7 + $0x78] sm:$0xff]  }
 0x69a   :  { %v1974_v22 = vadd.f32 %v8074_v19, %v9943_v17  ;;  %v9087_v19 = vld [vmem:[#allocation7 + $0x30] sm:$0xff]   ;;  %v9089_v21 = vld [vmem:[#allocation7 + $0x38] sm:$0xff]  }
 0x69c   :  { %v1979_v23 = vmul.f32 0.2, %v1974_v22 }
 0x69e   :  { %v1980_v27 = vmax.f32 %v1974_v22, %v1979_v23  ;;  %v7453_v22 = vcombine.low %v2350_v2, %v2350_v2  ;;  %v9114_v2 = vld [vmem:[#allocation10] sm:$0xff]  }
 0x6a0   :  { %v1981_v29 = vpack.c.bf16 %v1980_v27, %v1980_v27  ;;  %v9093_v27 = vld [vmem:[#allocation10 + $0x8] sm:$0xff]  }
 0x6a2   :  { %8650 = vmatmul.mubr.msk.bf16.vlgmr.msra.gmra.mrb[20].mxu1 %vm362_vm1, %v1981_v29  ;;  %v9096_v29 = vld [vmem:[#allocation7 + $0x40] sm:$0xff]  }
 0x6a3   :  { %8084 = vmatpush3.bf16.msra.mxu1 %v9053_v26  ;;  %2248 = vmatprep.mubr.bf16.mxu1 %v7429_v28  ;;  %v9094_v26 = vld [vmem:[#allocation10 + $0x10] sm:$0xff]   ;;  %v9095_v28 = vld [vmem:[#allocation10 + $0x18] sm:$0xff]  }
 0x6a4   :  { %8085 = vmatprep.subr.bf16.mxu1 %v9054_v30 }
 0x6a7   :  { %8086 = vmatpush3.bf16.msra.mxu1 %v9055_v31 }
 0x6a8   :  { %8087 = vmatprep.subr.bf16.mxu1 %v9056_v32 }
 0x6ab   :  { %8088 = vmatpush3.bf16.msra.mxu1 %v9057_v33 }
 0x6ac   :  { %8089 = vmatprep.subr.bf16.mxu1 %v9058_v34 }
 0x6af   :  { %8090 = vmatpush3.bf16.msra.mxu1 %v9059_v35 }
 0x6b0   :  { %8091 = vmatprep.subr.bf16.mxu1 %v9060_v37 }
 0x6b3   :  { %8092 = vmatpush3.bf16.msra.mxu1 %v9061_v38 }
 0x6b4   :  { %8093 = vmatprep.subr.bf16.mxu1 %v9062_v39 }
 0x6b7   :  { %8094 = vmatpush3.bf16.msra.mxu1 %v9063_v40 }
 0x6b8   :  { %8095 = vmatprep.subr.bf16.mxu1 %v9064_v41 }
 0x6bb   :  { %8096 = vmatpush3.bf16.msra.mxu1 %v9065_v42 }
 0x6bc   :  { %8097 = vmatprep.subr.bf16.mxu1 %v9066_v43 }
 0x6bf   :  { %8098 = vmatpush3.bf16.msra.mxu1 %v9067_v45 }
 0x6c0   :  { %8665 = vmatprep.subr.bf16.mxu1 %v9688_v36 }
 0x6c2   :  { %2249 = vmatmul.mubr.bf16.vlgmr.msra.gmra.mrb[24].mxu1 %v7428_v46  ;;  %v2627_v46 = vld [vmem:[#allocation4 + $0x48] sm:$0xff] }
 0x6c3   :  { %8673 = vmatprep.mubr.msk.bf16.mxu1 %vm9689_vm0, %v9688_v36  ;;  %8666 = vmatpush3.bf16.msra.mxu1 %v9092_v25  ;;  %v7479_v49 = vcombine.high %v2627_v46, %v2627_v46  ;;  %v9119_v25 = vld [vmem:[#allocation7] sm:$0xff]  }
 0x6c4   :  { %8667 = vmatprep.subr.bf16.mxu1 %v9688_v36 }
 0x6c7   :  { %8668 = vmatpush3.bf16.msra.mxu1 %v9093_v27 }
 0x6c8   :  { %8669 = vmatprep.subr.bf16.mxu1 %v9688_v36 }
 0x6cb   :  { %8670 = vmatpush3.bf16.msra.mxu1 %v9094_v26 }
 0x6cc   :  { %8671 = vmatprep.subr.bf16.mxu1 %v9688_v36 }
 0x6cf   :  { %8672 = vmatpush3.bf16.msra.mxu1 %v9095_v28  ;;  %v9120_v28 = vld [vmem:[#allocation7 + $0x48] sm:$0xff]  }
 0x6d0   :  { %8137 = vmatprep.subr.bf16.mxu1 %v9096_v29  ;;  %v9121_v29 = vld [vmem:[#allocation7 + $0x8] sm:$0xff]  }
 0x6ef   :  { %v1791_v47 = vpop.permute.xlu0 %1790 }
 0x6f0   :  { %1794 = vst.msk [vmem:[#allocation2] sm:$0xff] %vm1793_vm7, %v1791_v47 }
 0x775   :  { %v2058_v54 = vpop.f32.mrb[20].mxu1 }
 0x776   :  { %v2059_v55 = vadd.f32 %v9954_v53, %v2058_v54  ;;  %v8651_v56 = vpop.f32.mrb[21].mxu1  ;;  %v9100_v54 = vld [vmem:[#allocation7 + $0x50] sm:$0xff]  }
 0x777   :  { %v2061_v57 = vpop.f32.mrb[22].mxu1  ;;  %v9102_v56 = vld [vmem:[#allocation7 + $0x58] sm:$0xff]  }
 0x778   :  { %v2064_v58 = vmul.f32 0.2, %v2059_v55  ;;  %v8652_v24 = vpop.f32.mrb[23].mxu1  ;;  %v9103_v57 = vld [vmem:[#allocation7 + $0x18] sm:$0xff]  }
 0x779   :  { %v9105_v24 = vld [vmem:[#allocation7 + $0x20] sm:$0xff]  }
 0x77a   :  { %v2065_v59 = vmax.f32 %v2059_v55, %v2064_v58  ;;  %v9101_v55 = vld [vmem:[#allocation7 + $0x10] sm:$0xff]   ;;  %v9104_v58 = vld [vmem:[#allocation7 + $0x60] sm:$0xff]  }
 0x77c   :  { %2067 = vrot.lane.b32.xlu1 %v2065_v59, %s9694_s19  ;;  %v9106_v59 = vld [vmem:[#allocation7 + $0x68] sm:$0xff]  }
 0x795   :  { %v8099_v60 = vpop.f32.mrb[24].mxu1 }
 0x796   :  { %v8100_v44 = vpop.f32.mrb[25].mxu1 }
 0x797   :  { %v8101_v61 = vadd.f32 %v8100_v44, %v8099_v60  ;;  %v8102_v62 = vpop.f32.mrb[26].mxu1  ;;  %v9107_v60 = vld [vmem:[#allocation7 + $0x28] sm:$0xff]   ;;  %v9108_v44 = vld [vmem:[#allocation7 + $0x70] sm:$0xff]  }
 0x798   :  { %v8103_v63 = vpop.f32.mrb[27].mxu1  ;;  %v9110_v62 = vld [vmem:[#allocation7 + $0x78] sm:$0xff]  }
 0x799   :  { %v2251_v0 = vadd.f32 %v8101_v61, %v9943_v17  ;;  %v9109_v61 = vld [vmem:[#allocation7 + $0x30] sm:$0xff]   ;;  %v9111_v63 = vld [vmem:[#allocation7 + $0x38] sm:$0xff]  }
 0x79b   :  { %v2256_v1 = vmul.f32 0.2, %v2251_v0 }
 0x79d   :  { %v2257_v3 = vmax.f32 %v2251_v0, %v2256_v1  ;;  %v7478_v0 = vcombine.low %v2627_v46, %v2627_v46  ;;  %v9136_v46 = vld [vmem:[#allocation10] sm:$0xff]  }
 0x79f   :  { %v2258_v6 = vpack.c.bf16 %v2257_v3, %v2257_v3  ;;  %v9115_v3 = vld [vmem:[#allocation10 + $0x8] sm:$0xff]  }
 0x7a1   :  { %8662 = vmatmul.mubr.msk.bf16.vlgmr.msra.gmra.mrb[32].mxu0 %vm362_vm1, %v2258_v6  ;;  %v9118_v6 = vld [vmem:[#allocation7 + $0x40] sm:$0xff]  }
 0x7a2   :  { %8111 = vmatpush3.bf16.msra.mxu0 %v9075_v4  ;;  %2525 = vmatprep.mubr.bf16.mxu0 %v7454_v5  ;;  %v9116_v4 = vld [vmem:[#allocation10 + $0x10] sm:$0xff]   ;;  %v9117_v5 = vld [vmem:[#allocation10 + $0x18] sm:$0xff]  }
 0x7a3   :  { %8112 = vmatprep.subr.bf16.mxu0 %v9076_v7 }
 0x7a6   :  { %8113 = vmatpush3.bf16.msra.mxu0 %v9077_v8 }
 0x7a7   :  { %8114 = vmatprep.subr.bf16.mxu0 %v9078_v9 }
 0x7aa   :  { %8115 = vmatpush3.bf16.msra.mxu0 %v9079_v10 }
 0x7ab   :  { %8116 = vmatprep.subr.bf16.mxu0 %v9080_v11 }
 0x7ae   :  { %8117 = vmatpush3.bf16.msra.mxu0 %v9081_v12 }
 0x7af   :  { %8118 = vmatprep.subr.bf16.mxu0 %v9082_v13 }
 0x7b2   :  { %8119 = vmatpush3.bf16.msra.mxu0 %v9083_v14 }
 0x7b3   :  { %8120 = vmatprep.subr.bf16.mxu0 %v9084_v15 }
 0x7b6   :  { %8121 = vmatpush3.bf16.msra.mxu0 %v9085_v16 }
 0x7b7   :  { %8122 = vmatprep.subr.bf16.mxu0 %v9086_v18 }
 0x7ba   :  { %8123 = vmatpush3.bf16.msra.mxu0 %v9087_v19 }
 0x7bb   :  { %8124 = vmatprep.subr.bf16.mxu0 %v9088_v20 }
 0x7be   :  { %8125 = vmatpush3.bf16.msra.mxu0 %v9089_v21 }
 0x7bf   :  { %8677 = vmatprep.subr.bf16.mxu0 %v9688_v36 }
 0x7c1   :  { %2526 = vmatmul.mubr.bf16.vlgmr.msra.gmra.mrb[36].mxu0 %v7453_v22  ;;  %v2904_v22 = vld [vmem:[#allocation4 + $0x50] sm:$0xff] }
 0x7c2   :  { %8685 = vmatprep.mubr.msk.bf16.mxu0 %vm9689_vm0, %v9688_v36  ;;  %8678 = vmatpush3.bf16.msra.mxu0 %v9114_v2  ;;  %v7504_v27 = vcombine.high %v2904_v22, %v2904_v22  ;;  %v9141_v2 = vld [vmem:[#allocation7] sm:$0xff]  }
 0x7c3   :  { %8679 = vmatprep.subr.bf16.mxu0 %v9688_v36 }
 0x7c6   :  { %8680 = vmatpush3.bf16.msra.mxu0 %v9115_v3 }
 0x7c7   :  { %8681 = vmatprep.subr.bf16.mxu0 %v9688_v36 }
 0x7ca   :  { %8682 = vmatpush3.bf16.msra.mxu0 %v9116_v4 }
 0x7cb   :  { %8683 = vmatprep.subr.bf16.mxu0 %v9688_v36 }
 0x7ce   :  { %8684 = vmatpush3.bf16.msra.mxu0 %v9117_v5  ;;  %v9142_v5 = vld [vmem:[#allocation7 + $0x48] sm:$0xff]  }
 0x7cf   :  { %8164 = vmatprep.subr.bf16.mxu0 %v9118_v6  ;;  %v9143_v6 = vld [vmem:[#allocation7 + $0x8] sm:$0xff]  }
 0x7ee   :  { %v2068_v23 = vpop.permute.xlu1 %2067 }
 0x7ef   :  { %2071 = vst.msk [vmem:[#allocation2] sm:$0xff] %vm2070_vm8, %v2068_v23 }
 0x874   :  { %v2335_v30 = vpop.f32.mrb[32].mxu0 }
 0x875   :  { %v2336_v31 = vadd.f32 %v9954_v53, %v2335_v30  ;;  %v8663_v32 = vpop.f32.mrb[33].mxu0  ;;  %v9122_v30 = vld [vmem:[#allocation7 + $0x50] sm:$0xff]  }
 0x876   :  { %v2338_v33 = vpop.f32.mrb[34].mxu0  ;;  %v9124_v32 = vld [vmem:[#allocation7 + $0x58] sm:$0xff]  }
 0x877   :  { %v2341_v34 = vmul.f32 0.2, %v2336_v31  ;;  %v8664_v35 = vpop.f32.mrb[35].mxu0  ;;  %v9125_v33 = vld [vmem:[#allocation7 + $0x18] sm:$0xff]  }
 0x878   :  { %v9127_v35 = vld [vmem:[#allocation7 + $0x20] sm:$0xff]  }
 0x879   :  { %v2342_v37 = vmax.f32 %v2336_v31, %v2341_v34  ;;  %v9123_v31 = vld [vmem:[#allocation7 + $0x10] sm:$0xff]   ;;  %v9126_v34 = vld [vmem:[#allocation7 + $0x60] sm:$0xff]  }
 0x87b   :  { %2344 = vrot.lane.b32.xlu0 %v2342_v37, %s9695_s22  ;;  %v9128_v37 = vld [vmem:[#allocation7 + $0x68] sm:$0xff]  }
 0x894   :  { %v8126_v38 = vpop.f32.mrb[36].mxu0 }
 0x895   :  { %v8127_v39 = vpop.f32.mrb[37].mxu0 }
 0x896   :  { %v8128_v40 = vadd.f32 %v8127_v39, %v8126_v38  ;;  %v8129_v41 = vpop.f32.mrb[38].mxu0  ;;  %v9129_v38 = vld [vmem:[#allocation7 + $0x28] sm:$0xff]   ;;  %v9130_v39 = vld [vmem:[#allocation7 + $0x70] sm:$0xff]  }
 0x897   :  { %v8130_v42 = vpop.f32.mrb[39].mxu0  ;;  %v9132_v41 = vld [vmem:[#allocation7 + $0x78] sm:$0xff]  }
 0x898   :  { %v2528_v43 = vadd.f32 %v8128_v40, %v9943_v17  ;;  %v9131_v40 = vld [vmem:[#allocation7 + $0x30] sm:$0xff]   ;;  %v9133_v42 = vld [vmem:[#allocation7 + $0x38] sm:$0xff]  }
 0x89a   :  { %v2533_v45 = vmul.f32 0.2, %v2528_v43 }
 0x89c   :  { %v2534_v47 = vmax.f32 %v2528_v43, %v2533_v45  ;;  %v7503_v43 = vcombine.low %v2904_v22, %v2904_v22  ;;  %v9159_v22 = vld [vmem:[#allocation10 + $0x8] sm:$0xff]  }
 0x89e   :  { %v2535_v50 = vpack.c.bf16 %v2534_v47, %v2534_v47  ;;  %v9137_v47 = vld [vmem:[#allocation10 + $0x8] sm:$0xff]  }
 0x8a0   :  { %8674 = vmatmul.mubr.msk.bf16.vlgmr.msra.gmra.mrb[28].mxu1 %vm362_vm1, %v2535_v50  ;;  %v9140_v50 = vld [vmem:[#allocation7 + $0x40] sm:$0xff]  }
 0x8a1   :  { %8138 = vmatpush3.bf16.msra.mxu1 %v9097_v48  ;;  %2802 = vmatprep.mubr.bf16.mxu1 %v7479_v49  ;;  %v9138_v48 = vld [vmem:[#allocation10 + $0x10] sm:$0xff]   ;;  %v9139_v49 = vld [vmem:[#allocation10 + $0x18] sm:$0xff]  }
 0x8a2   :  { %8139 = vmatprep.subr.bf16.mxu1 %v9098_v51 }
 0x8a5   :  { %8140 = vmatpush3.bf16.msra.mxu1 %v9099_v52 }
 0x8a6   :  { %8141 = vmatprep.subr.bf16.mxu1 %v9100_v54 }
 0x8a9   :  { %8142 = vmatpush3.bf16.msra.mxu1 %v9101_v55 }
 0x8aa   :  { %8143 = vmatprep.subr.bf16.mxu1 %v9102_v56 }
 0x8ad   :  { %8144 = vmatpush3.bf16.msra.mxu1 %v9103_v57 }
 0x8ae   :  { %8145 = vmatprep.subr.bf16.mxu1 %v9104_v58 }
 0x8b1   :  { %8146 = vmatpush3.bf16.msra.mxu1 %v9105_v24 }
 0x8b2   :  { %8147 = vmatprep.subr.bf16.mxu1 %v9106_v59 }
 0x8b5   :  { %8148 = vmatpush3.bf16.msra.mxu1 %v9107_v60 }
 0x8b6   :  { %8149 = vmatprep.subr.bf16.mxu1 %v9108_v44 }
 0x8b9   :  { %8150 = vmatpush3.bf16.msra.mxu1 %v9109_v61 }
 0x8ba   :  { %8151 = vmatprep.subr.bf16.mxu1 %v9110_v62 }
 0x8bd   :  { %8152 = vmatpush3.bf16.msra.mxu1 %v9111_v63 }
 0x8be   :  { %8689 = vmatprep.subr.bf16.mxu1 %v9688_v36 }
 0x8c0   :  { %2803 = vmatmul.mubr.bf16.vlgmr.msra.gmra.mrb[32].mxu1 %v7478_v0  ;;  %v3181_v0 = vld [vmem:[#allocation4 + $0x58] sm:$0xff] }
 0x8c1   :  { %8697 = vmatprep.mubr.msk.bf16.mxu1 %vm9689_vm0, %v9688_v36  ;;  %8690 = vmatpush3.bf16.msra.mxu1 %v9136_v46  ;;  %v7529_v3 = vcombine.high %v3181_v0, %v3181_v0 }
 0x8c2   :  { %8691 = vmatprep.subr.bf16.mxu1 %v9688_v36 }
 0x8c5   :  { %8692 = vmatpush3.bf16.msra.mxu1 %v9137_v47 }
 0x8c6   :  { %8693 = vmatprep.subr.bf16.mxu1 %v9688_v36 }
 0x8c9   :  { %8694 = vmatpush3.bf16.msra.mxu1 %v9138_v48  ;;  %v9164_v48 = vld [vmem:[#allocation7 + $0x48] sm:$0xff]  }
 0x8ca   :  { %8695 = vmatprep.subr.bf16.mxu1 %v9688_v36 }
 0x8cd   :  { %8696 = vmatpush3.bf16.msra.mxu1 %v9139_v49  ;;  %v9165_v49 = vld [vmem:[#allocation7 + $0x8] sm:$0xff]  }
 0x8ce   :  { %8191 = vmatprep.subr.bf16.mxu1 %v9140_v50  ;;  %v9166_v50 = vld [vmem:[#allocation7 + $0x50] sm:$0xff]  }
 0x8ed   :  { %v2345_v1 = vpop.permute.xlu0 %2344 }
 0x8ee   :  { %2348 = vst.msk [vmem:[#allocation2] sm:$0xff] %vm2347_vm9, %v2345_v1 }
 0x973   :  { %v2612_v7 = vpop.f32.mrb[28].mxu1 }
 0x974   :  { %v2613_v8 = vadd.f32 %v9954_v53, %v2612_v7  ;;  %v8675_v9 = vpop.f32.mrb[29].mxu1  ;;  %v9144_v7 = vld [vmem:[#allocation7 + $0x50] sm:$0xff]  }
 0x975   :  { %v2615_v10 = vpop.f32.mrb[30].mxu1  ;;  %v9146_v9 = vld [vmem:[#allocation7 + $0x58] sm:$0xff]  }
 0x976   :  { %v2618_v11 = vmul.f32 0.2, %v2613_v8  ;;  %v8676_v12 = vpop.f32.mrb[31].mxu1  ;;  %v9148_v10 = vld [vmem:[#allocation7 + $0x60] sm:$0xff]  }
 0x977   :  { %v9150_v12 = vld [vmem:[#allocation7 + $0x68] sm:$0xff]  }
 0x978   :  { %v2619_v13 = vmax.f32 %v2613_v8, %v2618_v11  ;;  %v9145_v8 = vld [vmem:[#allocation7 + $0x10] sm:$0xff]   ;;  %v9149_v11 = vld [vmem:[#allocation7 + $0x20] sm:$0xff]  }
 0x97a   :  { %2621 = vrot.lane.b32.xlu0 %v2619_v13, %s9677_s20  ;;  %v9151_v13 = vld [vmem:[#allocation7 + $0x28] sm:$0xff]  }
 0x993   :  { %v8153_v14 = vpop.f32.mrb[32].mxu1 }
 0x994   :  { %v8154_v15 = vpop.f32.mrb[33].mxu1 }
 0x995   :  { %v8155_v16 = vadd.f32 %v8154_v15, %v8153_v14  ;;  %v8156_v18 = vpop.f32.mrb[34].mxu1  ;;  %v9152_v14 = vld [vmem:[#allocation7 + $0x70] sm:$0xff]  }
 0x996   :  { %v8157_v19 = vpop.f32.mrb[35].mxu1  ;;  %v9153_v15 = vld [vmem:[#allocation7 + $0x30] sm:$0xff]   ;;  %v9155_v18 = vld [vmem:[#allocation7 + $0x38] sm:$0xff]  }
 0x997   :  { %v2805_v20 = vadd.f32 %v8155_v16, %v9943_v17  ;;  %v9154_v16 = vld [vmem:[#allocation7 + $0x78] sm:$0xff]   ;;  %v7528_v19 = vcombine.low %v3181_v0, %v3181_v0  ;;  %v9181_v0 = vld [vmem:[#allocation10 + $0x8] sm:$0xff]  }
 0x999   :  { %v2810_v21 = vmul.f32 0.2, %v2805_v20 }
 0x99b   :  { %v2811_v23 = vmax.f32 %v2805_v20, %v2810_v21  ;;  %v9158_v21 = vld [vmem:[#allocation10] sm:$0xff]  }
 0x99d   :  { %v2812_v26 = vpack.c.bf16 %v2811_v23, %v2811_v23  ;;  %v9160_v23 = vld [vmem:[#allocation10 + $0x10] sm:$0xff]  }
 0x99f   :  { %8686 = vmatmul.mubr.msk.bf16.vlgmr.msra.gmra.mrb[40].mxu0 %vm362_vm1, %v2812_v26 }
 0x9a0   :  { %8165 = vmatpush3.bf16.msra.mxu0 %v9119_v25  ;;  %3079 = vmatprep.mubr.bf16.mxu0 %v7504_v27  ;;  %v9161_v25 = vld [vmem:[#allocation10 + $0x18] sm:$0xff]  }
 0x9a1   :  { %8166 = vmatprep.subr.bf16.mxu0 %v9120_v28  ;;  %v9162_v27 = vld [vmem:[#allocation7 + $0x40] sm:$0xff]  }
 0x9a4   :  { %8167 = vmatpush3.bf16.msra.mxu0 %v9121_v29 }
 0x9a5   :  { %8168 = vmatprep.subr.bf16.mxu0 %v9122_v30 }
 0x9a8   :  { %8169 = vmatpush3.bf16.msra.mxu0 %v9123_v31 }
 0x9a9   :  { %8170 = vmatprep.subr.bf16.mxu0 %v9124_v32 }
 0x9ac   :  { %8171 = vmatpush3.bf16.msra.mxu0 %v9125_v33 }
 0x9ad   :  { %8172 = vmatprep.subr.bf16.mxu0 %v9126_v34 }
 0x9b0   :  { %8173 = vmatpush3.bf16.msra.mxu0 %v9127_v35  ;;  %v9999_v35 = vld [vmem:[#allocation9] ss:$0 sm:$0xff] }
 0x9b1   :  { %8174 = vmatprep.subr.bf16.mxu0 %v9128_v37 }
 0x9b4   :  { %8175 = vmatpush3.bf16.msra.mxu0 %v9129_v38 }
 0x9b5   :  { %8176 = vmatprep.subr.bf16.mxu0 %v9130_v39 }
 0x9b8   :  { %8177 = vmatpush3.bf16.msra.mxu0 %v9131_v40 }
 0x9b9   :  { %8178 = vmatprep.subr.bf16.mxu0 %v9132_v41 }
 0x9bc   :  { %8179 = vmatpush3.bf16.msra.mxu0 %v9133_v42 }
 0x9bd   :  { %8701 = vmatprep.subr.bf16.mxu0 %v9688_v36 }
 0x9bf   :  { %3080 = vmatmul.mubr.bf16.vlgmr.msra.gmra.mrb[44].mxu0 %v7503_v43  ;;  %v3458_v43 = vld [vmem:[#allocation4 + $0x60] sm:$0xff] }
 0x9c0   :  { %8709 = vmatprep.mubr.msk.bf16.mxu0 %vm9689_vm0, %v9688_v36  ;;  %8702 = vmatpush3.bf16.msra.mxu0 %v9158_v21  ;;  %v7554_v46 = vcombine.high %v3458_v43, %v3458_v43  ;;  %v9185_v21 = vld [vmem:[#allocation7] sm:$0xff]  }
 0x9c1   :  { %8703 = vmatprep.subr.bf16.mxu0 %v9688_v36 }
 0x9c4   :  { %8704 = vmatpush3.bf16.msra.mxu0 %v9159_v22 }
 0x9c5   :  { %8705 = vmatprep.subr.bf16.mxu0 %v9688_v36 }
 0x9c8   :  { %8706 = vmatpush3.bf16.msra.mxu0 %v9160_v23 }
 0x9c9   :  { %8707 = vmatprep.subr.bf16.mxu0 %v9688_v36 }
 0x9cc   :  { %8708 = vmatpush3.bf16.msra.mxu0 %v9161_v25  ;;  %v9186_v25 = vld [vmem:[#allocation7 + $0x48] sm:$0xff]  }
 0x9cd   :  { %8218 = vmatprep.subr.bf16.mxu0 %v9162_v27  ;;  %v9187_v27 = vld [vmem:[#allocation7 + $0x8] sm:$0xff]  }
 0x9ec   :  { %v2622_v45 = vpop.permute.xlu0 %2621 }
 0x9ed   :  { %2625 = vst.msk [vmem:[#allocation2] sm:$0xff] %vm2624_vm10, %v2622_v45 }
 0xa72   :  { %v2889_v51 = vpop.f32.mrb[40].mxu0 }
 0xa73   :  { %v2890_v52 = vadd.f32 %v9954_v53, %v2889_v51  ;;  %v8687_v54 = vpop.f32.mrb[41].mxu0  ;;  %v9167_v51 = vld [vmem:[#allocation7 + $0x10] sm:$0xff]  }
 0xa74   :  { %v2892_v55 = vpop.f32.mrb[42].mxu0  ;;  %v9169_v54 = vld [vmem:[#allocation7 + $0x18] sm:$0xff]  }
 0xa75   :  { %v2895_v56 = vmul.f32 0.2, %v2890_v52  ;;  %v8688_v57 = vpop.f32.mrb[43].mxu0  ;;  %v9170_v55 = vld [vmem:[#allocation7 + $0x60] sm:$0xff]  }
 0xa76   :  { %v9172_v57 = vld [vmem:[#allocation7 + $0x68] sm:$0xff]  }
 0xa77   :  { %v2896_v58 = vmax.f32 %v2890_v52, %v2895_v56  ;;  %v9168_v52 = vld [vmem:[#allocation7 + $0x58] sm:$0xff]   ;;  %v9171_v56 = vld [vmem:[#allocation7 + $0x20] sm:$0xff]  }
 0xa79   :  { %2898 = vrot.lane.b32.xlu0 %v2896_v58, %s9696_s23  ;;  %v9173_v58 = vld [vmem:[#allocation7 + $0x28] sm:$0xff]  }
 0xa92   :  { %v8180_v24 = vpop.f32.mrb[44].mxu0 }
 0xa93   :  { %v8181_v59 = vpop.f32.mrb[45].mxu0 }
 0xa94   :  { %v8182_v60 = vadd.f32 %v8181_v59, %v8180_v24  ;;  %v8183_v44 = vpop.f32.mrb[46].mxu0  ;;  %v9174_v24 = vld [vmem:[#allocation7 + $0x70] sm:$0xff]  }
 0xa95   :  { %v8184_v61 = vpop.f32.mrb[47].mxu0  ;;  %v9175_v59 = vld [vmem:[#allocation7 + $0x30] sm:$0xff]   ;;  %v9177_v44 = vld [vmem:[#allocation7 + $0x38] sm:$0xff]  }
 0xa96   :  { %v3082_v62 = vadd.f32 %v8182_v60, %v9943_v17  ;;  %v9147_v17 = vld [vmem:[#allocation7 + $0x18] sm:$0xff]   ;;  %v7553_v61 = vcombine.low %v3458_v43, %v3458_v43  ;;  %v9202_v43 = vld [vmem:[#allocation10] sm:$0xff]  }
 0xa97   :  { %v9176_v60 = vld [vmem:[#allocation7 + $0x78] sm:$0xff]  }
 0xa98   :  { %v3087_v63 = vmul.f32 0.2, %v3082_v62 }
 0xa9a   :  { %v3088_v1 = vmax.f32 %v3082_v62, %v3087_v63  ;;  %v9180_v63 = vld [vmem:[#allocation10] sm:$0xff]  }
 0xa9c   :  { %v3089_v4 = vpack.c.bf16 %v3088_v1, %v3088_v1  ;;  %v9182_v1 = vld [vmem:[#allocation10 + $0x10] sm:$0xff]  }
 0xa9e   :  { %8698 = vmatmul.mubr.msk.bf16.vlgmr.msra.gmra.mrb[36].mxu1 %vm362_vm1, %v3089_v4  ;;  %v10009_v4 = vld [vmem:[#allocation12] ss:$0 sm:$0xff] }
 0xa9f   :  { %8192 = vmatpush3.bf16.msra.mxu1 %v9141_v2  ;;  %3356 = vmatprep.mubr.bf16.mxu1 %v7529_v3  ;;  %v9183_v2 = vld [vmem:[#allocation10 + $0x18] sm:$0xff]  }
 0xaa0   :  { %8193 = vmatprep.subr.bf16.mxu1 %v9142_v5  ;;  %v9184_v3 = vld [vmem:[#allocation7 + $0x40] sm:$0xff]  }
 0xaa3   :  { %8194 = vmatpush3.bf16.msra.mxu1 %v9143_v6 }
 0xaa4   :  { %8195 = vmatprep.subr.bf16.mxu1 %v9144_v7 }
 0xaa7   :  { %8196 = vmatpush3.bf16.msra.mxu1 %v9145_v8 }
 0xaa8   :  { %8197 = vmatprep.subr.bf16.mxu1 %v9146_v9 }
 0xaab   :  { %8198 = vmatpush3.bf16.msra.mxu1 %v9147_v17 }
 0xaac   :  { %8199 = vmatprep.subr.bf16.mxu1 %v9148_v10 }
 0xaaf   :  { %8200 = vmatpush3.bf16.msra.mxu1 %v9149_v11 }
 0xab0   :  { %8201 = vmatprep.subr.bf16.mxu1 %v9150_v12 }
 0xab3   :  { %8202 = vmatpush3.bf16.msra.mxu1 %v9151_v13 }
 0xab4   :  { %8203 = vmatprep.subr.bf16.mxu1 %v9152_v14 }
 0xab7   :  { %8204 = vmatpush3.bf16.msra.mxu1 %v9153_v15 }
 0xab8   :  { %8205 = vmatprep.subr.bf16.mxu1 %v9154_v16 }
 0xabb   :  { %8206 = vmatpush3.bf16.msra.mxu1 %v9155_v18 }
 0xabc   :  { %8713 = vmatprep.subr.bf16.mxu1 %v9688_v36 }
 0xabe   :  { %3357 = vmatmul.mubr.bf16.vlgmr.msra.gmra.mrb[40].mxu1 %v7528_v19  ;;  %v3735_v19 = vld [vmem:[#allocation4 + $0x68] sm:$0xff] }
 0xabf   :  { %8721 = vmatprep.mubr.msk.bf16.mxu1 %vm9689_vm0, %v9688_v36  ;;  %8714 = vmatpush3.bf16.msra.mxu1 %v9180_v63  ;;  %v7579_v22 = vcombine.high %v3735_v19, %v3735_v19  ;;  %v9207_v63 = vld [vmem:[#allocation7] sm:$0xff]  }
 0xac0   :  { %8715 = vmatprep.subr.bf16.mxu1 %v9688_v36 }
 0xac3   :  { %8716 = vmatpush3.bf16.msra.mxu1 %v9181_v0 }
 0xac4   :  { %8717 = vmatprep.subr.bf16.mxu1 %v9688_v36 }
 0xac7   :  { %8718 = vmatpush3.bf16.msra.mxu1 %v9182_v1 }
 0xac8   :  { %8719 = vmatprep.subr.bf16.mxu1 %v9688_v36 }
 0xacb   :  { %8720 = vmatpush3.bf16.msra.mxu1 %v9183_v2  ;;  %v9208_v2 = vld [vmem:[#allocation7 + $0x48] sm:$0xff]  }
 0xacc   :  { %8245 = vmatprep.subr.bf16.mxu1 %v9184_v3  ;;  %v9209_v3 = vld [vmem:[#allocation7 + $0x8] sm:$0xff]  }
 0xaeb   :  { %v2899_v20 = vpop.permute.xlu0 %2898 }
 0xaec   :  { %2902 = vst.msk [vmem:[#allocation2] sm:$0xff] %vm2901_vm11, %v2899_v20  ;;  %vm4286_vm11 = vcmask 982912  }
 0xb71   :  { %v3166_v26 = vpop.f32.mrb[36].mxu1 }
 0xb72   :  { %v3167_v28 = vadd.f32 %v9954_v53, %v3166_v26  ;;  %v8699_v29 = vpop.f32.mrb[37].mxu1  ;;  %v9163_v53 = vld [vmem:[#allocation7] sm:$0xff]   ;;  %v9188_v26 = vld [vmem:[#allocation7 + $0x50] sm:$0xff]  }
 0xb73   :  { %v3169_v30 = vpop.f32.mrb[38].mxu1  ;;  %v9190_v29 = vld [vmem:[#allocation7 + $0x58] sm:$0xff]  }
 0xb74   :  { %v3172_v31 = vmul.f32 0.2, %v3167_v28  ;;  %v8700_v32 = vpop.f32.mrb[39].mxu1  ;;  %v9191_v30 = vld [vmem:[#allocation7 + $0x18] sm:$0xff]  }
 0xb75   :  { %v9193_v32 = vld [vmem:[#allocation7 + $0x20] sm:$0xff]  }
 0xb76   :  { %v3173_v33 = vmax.f32 %v3167_v28, %v3172_v31  ;;  %v9189_v28 = vld [vmem:[#allocation7 + $0x10] sm:$0xff]   ;;  %v9192_v31 = vld [vmem:[#allocation7 + $0x60] sm:$0xff]  }
 0xb78   :  { %3175 = vrot.lane.b32.xlu0 %v3173_v33, %s9697_s24  ;;  %v9194_v33 = vld [vmem:[#allocation7 + $0x68] sm:$0xff]  }
 0xb91   :  { %v8207_v34 = vpop.f32.mrb[40].mxu1 }
 0xb92   :  { %v8208_v37 = vpop.f32.mrb[41].mxu1 }
 0xb93   :  { %v8209_v38 = vadd.f32 %v8208_v37, %v8207_v34  ;;  %v8210_v39 = vpop.f32.mrb[42].mxu1  ;;  %v9195_v34 = vld [vmem:[#allocation7 + $0x28] sm:$0xff]   ;;  %v9196_v37 = vld [vmem:[#allocation7 + $0x70] sm:$0xff]  }
 0xb94   :  { %v8211_v40 = vpop.f32.mrb[43].mxu1  ;;  %v9198_v39 = vld [vmem:[#allocation7 + $0x78] sm:$0xff]  }
 0xb95   :  { %v3359_v41 = vadd.f32 %v8209_v38, %v9999_v35  ;;  %v9197_v38 = vld [vmem:[#allocation7 + $0x30] sm:$0xff]   ;;  %v9199_v40 = vld [vmem:[#allocation7 + $0x38] sm:$0xff]  }
 0xb97   :  { %v3364_v42 = vmul.f32 0.2, %v3359_v41 }
 0xb99   :  { %v3365_v45 = vmax.f32 %v3359_v41, %v3364_v42  ;;  %v7578_v41 = vcombine.low %v3735_v19, %v3735_v19  ;;  %v9224_v19 = vld [vmem:[#allocation10] sm:$0xff]  }
 0xb9b   :  { %v3366_v47 = vpack.c.bf16 %v3365_v45, %v3365_v45  ;;  %v9203_v45 = vld [vmem:[#allocation10 + $0x8] sm:$0xff]  }
 0xb9d   :  { %8710 = vmatmul.mubr.msk.bf16.vlgmr.msra.gmra.mrb[48].mxu0 %vm362_vm1, %v3366_v47  ;;  %v9206_v47 = vld [vmem:[#allocation7 + $0x40] sm:$0xff]  }
 0xb9e   :  { %8219 = vmatpush3.bf16.msra.mxu0 %v9163_v53  ;;  %3633 = vmatprep.mubr.bf16.mxu0 %v7554_v46  ;;  %v9204_v53 = vld [vmem:[#allocation10 + $0x10] sm:$0xff]   ;;  %v9205_v46 = vld [vmem:[#allocation10 + $0x18] sm:$0xff]  }
 0xb9f   :  { %8220 = vmatprep.subr.bf16.mxu0 %v9164_v48 }
 0xba2   :  { %8221 = vmatpush3.bf16.msra.mxu0 %v9165_v49 }
 0xba3   :  { %8222 = vmatprep.subr.bf16.mxu0 %v9166_v50 }
 0xba6   :  { %8223 = vmatpush3.bf16.msra.mxu0 %v9167_v51 }
 0xba7   :  { %8224 = vmatprep.subr.bf16.mxu0 %v9168_v52 }
 0xbaa   :  { %8225 = vmatpush3.bf16.msra.mxu0 %v9169_v54 }
 0xbab   :  { %8226 = vmatprep.subr.bf16.mxu0 %v9170_v55 }
 0xbae   :  { %8227 = vmatpush3.bf16.msra.mxu0 %v9171_v56 }
 0xbaf   :  { %8228 = vmatprep.subr.bf16.mxu0 %v9172_v57 }
 0xbb2   :  { %8229 = vmatpush3.bf16.msra.mxu0 %v9173_v58 }
 0xbb3   :  { %8230 = vmatprep.subr.bf16.mxu0 %v9174_v24 }
 0xbb6   :  { %8231 = vmatpush3.bf16.msra.mxu0 %v9175_v59 }
 0xbb7   :  { %8232 = vmatprep.subr.bf16.mxu0 %v9176_v60 }
 0xbba   :  { %8233 = vmatpush3.bf16.msra.mxu0 %v9177_v44 }
 0xbbb   :  { %8725 = vmatprep.subr.bf16.mxu0 %v9688_v36 }
 0xbbd   :  { %3634 = vmatmul.mubr.bf16.vlgmr.msra.gmra.mrb[52].mxu0 %v7553_v61  ;;  %v4012_v61 = vld [vmem:[#allocation4 + $0x70] sm:$0xff] }
 0xbbe   :  { %8733 = vmatprep.mubr.msk.bf16.mxu0 %vm9689_vm0, %v9688_v36  ;;  %8726 = vmatpush3.bf16.msra.mxu0 %v9202_v43  ;;  %v7604_v0 = vcombine.high %v4012_v61, %v4012_v61  ;;  %v9229_v43 = vld [vmem:[#allocation7] sm:$0xff]  }
 0xbbf   :  { %8727 = vmatprep.subr.bf16.mxu0 %v9688_v36 }
 0xbc2   :  { %8728 = vmatpush3.bf16.msra.mxu0 %v9203_v45 }
 0xbc3   :  { %8729 = vmatprep.subr.bf16.mxu0 %v9688_v36 }
 0xbc6   :  { %8730 = vmatpush3.bf16.msra.mxu0 %v9204_v53 }
 0xbc7   :  { %8731 = vmatprep.subr.bf16.mxu0 %v9688_v36 }
 0xbca   :  { %8732 = vmatpush3.bf16.msra.mxu0 %v9205_v46  ;;  %v9230_v46 = vld [vmem:[#allocation7 + $0x48] sm:$0xff]  }
 0xbcb   :  { %8272 = vmatprep.subr.bf16.mxu0 %v9206_v47  ;;  %v9231_v47 = vld [vmem:[#allocation7 + $0x8] sm:$0xff]  }
 0xbea   :  { %v3176_v62 = vpop.permute.xlu0 %3175 }
 0xbeb   :  { %3179 = vst.msk [vmem:[#allocation2] sm:$0xff] %vm3178_vm12, %v3176_v62  ;;  %vm4563_vm12 = vcmask 1048512  }
 0xc70   :  { %v3443_v5 = vpop.f32.mrb[48].mxu0 }
 0xc71   :  { %v3444_v6 = vadd.f32 %v10009_v4, %v3443_v5  ;;  %v8711_v7 = vpop.f32.mrb[49].mxu0  ;;  %v9210_v5 = vld [vmem:[#allocation7 + $0x50] sm:$0xff]  }
 0xc72   :  { %v3446_v8 = vpop.f32.mrb[50].mxu0  ;;  %v9212_v7 = vld [vmem:[#allocation7 + $0x58] sm:$0xff]  }
 0xc73   :  { %v3449_v9 = vmul.f32 0.2, %v3444_v6  ;;  %v8712_v17 = vpop.f32.mrb[51].mxu0  ;;  %v9213_v8 = vld [vmem:[#allocation7 + $0x18] sm:$0xff]  }
 0xc74   :  { %v9215_v17 = vld [vmem:[#allocation7 + $0x20] sm:$0xff]  }
 0xc75   :  { %v3450_v10 = vmax.f32 %v3444_v6, %v3449_v9  ;;  %v9211_v6 = vld [vmem:[#allocation7 + $0x10] sm:$0xff]   ;;  %v9214_v9 = vld [vmem:[#allocation7 + $0x60] sm:$0xff]  }
 0xc77   :  { %3452 = vrot.lane.b32.xlu0 %v3450_v10, %s9698_s3  ;;  %v9216_v10 = vld [vmem:[#allocation7 + $0x68] sm:$0xff]  }
 0xc90   :  { %v8234_v11 = vpop.f32.mrb[52].mxu0 }
 0xc91   :  { %v8235_v12 = vpop.f32.mrb[53].mxu0 }
 0xc92   :  { %v8236_v13 = vadd.f32 %v8235_v12, %v8234_v11  ;;  %v8237_v14 = vpop.f32.mrb[54].mxu0  ;;  %v9217_v11 = vld [vmem:[#allocation7 + $0x28] sm:$0xff]   ;;  %v9218_v12 = vld [vmem:[#allocation7 + $0x70] sm:$0xff]  }
 0xc93   :  { %v8238_v15 = vpop.f32.mrb[55].mxu0  ;;  %v9220_v14 = vld [vmem:[#allocation7 + $0x78] sm:$0xff]  }
 0xc94   :  { %v3636_v16 = vadd.f32 %v8236_v13, %v9999_v35  ;;  %v9219_v13 = vld [vmem:[#allocation7 + $0x30] sm:$0xff]   ;;  %v9221_v15 = vld [vmem:[#allocation7 + $0x38] sm:$0xff]  }
 0xc96   :  { %v3641_v18 = vmul.f32 0.2, %v3636_v16 }
 0xc98   :  { %v3642_v20 = vmax.f32 %v3636_v16, %v3641_v18  ;;  %v7603_v16 = vcombine.low %v4012_v61, %v4012_v61  ;;  %v9246_v61 = vld [vmem:[#allocation10] sm:$0xff]  }
 0xc9a   :  { %v3643_v23 = vpack.c.bf16 %v3642_v20, %v3642_v20  ;;  %v9225_v20 = vld [vmem:[#allocation10 + $0x8] sm:$0xff]  }
 0xc9c   :  { %8722 = vmatmul.mubr.msk.bf16.vlgmr.msra.gmra.mrb[44].mxu1 %vm362_vm1, %v3643_v23  ;;  %v9228_v23 = vld [vmem:[#allocation7 + $0x40] sm:$0xff]  }
 0xc9d   :  { %8246 = vmatpush3.bf16.msra.mxu1 %v9185_v21  ;;  %3910 = vmatprep.mubr.bf16.mxu1 %v7579_v22  ;;  %v9226_v21 = vld [vmem:[#allocation10 + $0x10] sm:$0xff]   ;;  %v9227_v22 = vld [vmem:[#allocation10 + $0x18] sm:$0xff]  }
 0xc9e   :  { %8247 = vmatprep.subr.bf16.mxu1 %v9186_v25 }
 0xca1   :  { %8248 = vmatpush3.bf16.msra.mxu1 %v9187_v27 }
 0xca2   :  { %8249 = vmatprep.subr.bf16.mxu1 %v9188_v26 }
 0xca5   :  { %8250 = vmatpush3.bf16.msra.mxu1 %v9189_v28 }
 0xca6   :  { %8251 = vmatprep.subr.bf16.mxu1 %v9190_v29 }
 0xca9   :  { %8252 = vmatpush3.bf16.msra.mxu1 %v9191_v30 }
 0xcaa   :  { %8253 = vmatprep.subr.bf16.mxu1 %v9192_v31 }
 0xcad   :  { %8254 = vmatpush3.bf16.msra.mxu1 %v9193_v32 }
 0xcae   :  { %8255 = vmatprep.subr.bf16.mxu1 %v9194_v33 }
 0xcb1   :  { %8256 = vmatpush3.bf16.msra.mxu1 %v9195_v34 }
 0xcb2   :  { %8257 = vmatprep.subr.bf16.mxu1 %v9196_v37 }
 0xcb5   :  { %8258 = vmatpush3.bf16.msra.mxu1 %v9197_v38 }
 0xcb6   :  { %8259 = vmatprep.subr.bf16.mxu1 %v9198_v39 }
 0xcb9   :  { %8260 = vmatpush3.bf16.msra.mxu1 %v9199_v40 }
 0xcba   :  { %8737 = vmatprep.subr.bf16.mxu1 %v9688_v36 }
 0xcbc   :  { %3911 = vmatmul.mubr.bf16.vlgmr.msra.gmra.mrb[48].mxu1 %v7578_v41  ;;  %v4289_v41 = vld [vmem:[#allocation4 + $0x78] sm:$0xff] }
 0xcbd   :  { %8745 = vmatprep.mubr.msk.bf16.mxu1 %vm9689_vm0, %v9688_v36  ;;  %8738 = vmatpush3.bf16.msra.mxu1 %v9224_v19  ;;  %v7629_v45 = vcombine.high %v4289_v41, %v4289_v41  ;;  %v9251_v19 = vld [vmem:[#allocation7] sm:$0xff]  }
 0xcbe   :  { %8739 = vmatprep.subr.bf16.mxu1 %v9688_v36 }
 0xcc1   :  { %8740 = vmatpush3.bf16.msra.mxu1 %v9225_v20 }
 0xcc2   :  { %8741 = vmatprep.subr.bf16.mxu1 %v9688_v36 }
 0xcc5   :  { %8742 = vmatpush3.bf16.msra.mxu1 %v9226_v21 }
 0xcc6   :  { %8743 = vmatprep.subr.bf16.mxu1 %v9688_v36 }
 0xcc9   :  { %8744 = vmatpush3.bf16.msra.mxu1 %v9227_v22  ;;  %v9252_v22 = vld [vmem:[#allocation7 + $0x48] sm:$0xff]  }
 0xcca   :  { %8299 = vmatprep.subr.bf16.mxu1 %v9228_v23  ;;  %v9253_v23 = vld [vmem:[#allocation7 + $0x8] sm:$0xff]  }
 0xce9   :  { %v3453_v42 = vpop.permute.xlu0 %3452 }
 0xcea   :  { %3456 = vst.msk [vmem:[#allocation2] sm:$0xff] %vm3455_vm13, %v3453_v42 }
 0xd6f   :  { %v3720_v48 = vpop.f32.mrb[44].mxu1 }
 0xd70   :  { %v3721_v49 = vadd.f32 %v10009_v4, %v3720_v48  ;;  %v8723_v50 = vpop.f32.mrb[45].mxu1  ;;  %v9232_v48 = vld [vmem:[#allocation7 + $0x50] sm:$0xff]  }
 0xd71   :  { %v3723_v51 = vpop.f32.mrb[46].mxu1  ;;  %v9234_v50 = vld [vmem:[#allocation7 + $0x58] sm:$0xff]  }
 0xd72   :  { %v3726_v52 = vmul.f32 0.2, %v3721_v49  ;;  %v8724_v54 = vpop.f32.mrb[47].mxu1  ;;  %v9235_v51 = vld [vmem:[#allocation7 + $0x18] sm:$0xff]  }
 0xd73   :  { %v9237_v54 = vld [vmem:[#allocation7 + $0x20] sm:$0xff]  }
 0xd74   :  { %v3727_v55 = vmax.f32 %v3721_v49, %v3726_v52  ;;  %v9233_v49 = vld [vmem:[#allocation7 + $0x10] sm:$0xff]   ;;  %v9236_v52 = vld [vmem:[#allocation7 + $0x60] sm:$0xff]  }
 0xd76   :  { %3729 = vrot.lane.b32.xlu0 %v3727_v55, %s9699_s25  ;;  %v9238_v55 = vld [vmem:[#allocation7 + $0x68] sm:$0xff]  }
 0xd8f   :  { %v8261_v56 = vpop.f32.mrb[48].mxu1 }
 0xd90   :  { %v8262_v57 = vpop.f32.mrb[49].mxu1 }
 0xd91   :  { %v8263_v58 = vadd.f32 %v8262_v57, %v8261_v56  ;;  %v8264_v24 = vpop.f32.mrb[50].mxu1  ;;  %v9239_v56 = vld [vmem:[#allocation7 + $0x28] sm:$0xff]   ;;  %v9240_v57 = vld [vmem:[#allocation7 + $0x70] sm:$0xff]  }
 0xd92   :  { %v8265_v59 = vpop.f32.mrb[51].mxu1  ;;  %v9242_v24 = vld [vmem:[#allocation7 + $0x78] sm:$0xff]  }
 0xd93   :  { %v3913_v60 = vadd.f32 %v8263_v58, %v9999_v35  ;;  %v9241_v58 = vld [vmem:[#allocation7 + $0x30] sm:$0xff]   ;;  %v9243_v59 = vld [vmem:[#allocation7 + $0x38] sm:$0xff]  }
 0xd95   :  { %v3918_v44 = vmul.f32 0.2, %v3913_v60 }
 0xd97   :  { %v3919_v62 = vmax.f32 %v3913_v60, %v3918_v44  ;;  %v7628_v60 = vcombine.low %v4289_v41, %v4289_v41  ;;  %v9269_v41 = vld [vmem:[#allocation10 + $0x8] sm:$0xff]  }
 0xd99   :  { %v3920_v1 = vpack.c.bf16 %v3919_v62, %v3919_v62  ;;  %v9247_v62 = vld [vmem:[#allocation10 + $0x8] sm:$0xff]  }
 0xd9b   :  { %8734 = vmatmul.mubr.msk.bf16.vlgmr.msra.gmra.mrb[56].mxu0 %vm362_vm1, %v3920_v1  ;;  %v9250_v1 = vld [vmem:[#allocation7 + $0x40] sm:$0xff]  }
 0xd9c   :  { %8273 = vmatpush3.bf16.msra.mxu0 %v9207_v63  ;;  %4187 = vmatprep.mubr.bf16.mxu0 %v7604_v0  ;;  %v9248_v63 = vld [vmem:[#allocation10 + $0x10] sm:$0xff]   ;;  %v9249_v0 = vld [vmem:[#allocation10 + $0x18] sm:$0xff]  }
 0xd9d   :  { %8274 = vmatprep.subr.bf16.mxu0 %v9208_v2 }
 0xda0   :  { %8275 = vmatpush3.bf16.msra.mxu0 %v9209_v3 }
 0xda1   :  { %8276 = vmatprep.subr.bf16.mxu0 %v9210_v5 }
 0xda4   :  { %8277 = vmatpush3.bf16.msra.mxu0 %v9211_v6 }
 0xda5   :  { %8278 = vmatprep.subr.bf16.mxu0 %v9212_v7 }
 0xda8   :  { %8279 = vmatpush3.bf16.msra.mxu0 %v9213_v8 }
 0xda9   :  { %8280 = vmatprep.subr.bf16.mxu0 %v9214_v9 }
 0xdac   :  { %8281 = vmatpush3.bf16.msra.mxu0 %v9215_v17 }
 0xdad   :  { %8282 = vmatprep.subr.bf16.mxu0 %v9216_v10 }
 0xdb0   :  { %8283 = vmatpush3.bf16.msra.mxu0 %v9217_v11 }
 0xdb1   :  { %8284 = vmatprep.subr.bf16.mxu0 %v9218_v12 }
 0xdb4   :  { %8285 = vmatpush3.bf16.msra.mxu0 %v9219_v13 }
 0xdb5   :  { %8286 = vmatprep.subr.bf16.mxu0 %v9220_v14 }
 0xdb8   :  { %8287 = vmatpush3.bf16.msra.mxu0 %v9221_v15 }
 0xdb9   :  { %8749 = vmatprep.subr.bf16.mxu0 %v9688_v36 }
 0xdbb   :  { %4188 = vmatmul.mubr.bf16.vlgmr.msra.gmra.mrb[60].mxu0 %v7603_v16  ;;  %v4566_v16 = vld [vmem:[#allocation4 + $0x80] sm:$0xff] }
 0xdbc   :  { %8757 = vmatprep.mubr.msk.bf16.mxu0 %vm9689_vm0, %v9688_v36  ;;  %8750 = vmatpush3.bf16.msra.mxu0 %v9246_v61  ;;  %v7654_v20 = vcombine.high %v4566_v16, %v4566_v16 }
 0xdbd   :  { %8751 = vmatprep.subr.bf16.mxu0 %v9688_v36 }
 0xdc0   :  { %8752 = vmatpush3.bf16.msra.mxu0 %v9247_v62 }
 0xdc1   :  { %8753 = vmatprep.subr.bf16.mxu0 %v9688_v36 }
 0xdc4   :  { %8754 = vmatpush3.bf16.msra.mxu0 %v9248_v63  ;;  %v9274_v63 = vld [vmem:[#allocation7 + $0x48] sm:$0xff]  }
 0xdc5   :  { %8755 = vmatprep.subr.bf16.mxu0 %v9688_v36 }
 0xdc8   :  { %8756 = vmatpush3.bf16.msra.mxu0 %v9249_v0  ;;  %v9275_v0 = vld [vmem:[#allocation7 + $0x8] sm:$0xff]  }
 0xdc9   :  { %8326 = vmatprep.subr.bf16.mxu0 %v9250_v1  ;;  %v9276_v1 = vld [vmem:[#allocation7 + $0x50] sm:$0xff]  }
 0xde8   :  { %v3730_v18 = vpop.permute.xlu0 %3729 }
 0xde9   :  { %3733 = vst.msk [vmem:[#allocation2] sm:$0xff] %vm3732_vm14, %v3730_v18 }
 0xe6e   :  { %v3997_v25 = vpop.f32.mrb[56].mxu0 }
 0xe6f   :  { %v3998_v27 = vadd.f32 %v10009_v4, %v3997_v25  ;;  %v8735_v26 = vpop.f32.mrb[57].mxu0  ;;  %v9254_v25 = vld [vmem:[#allocation7 + $0x50] sm:$0xff]  }
 0xe70   :  { %v4000_v28 = vpop.f32.mrb[58].mxu0  ;;  %v9256_v26 = vld [vmem:[#allocation7 + $0x58] sm:$0xff]  }
 0xe71   :  { %v4003_v29 = vmul.f32 0.2, %v3998_v27  ;;  %v8736_v30 = vpop.f32.mrb[59].mxu0  ;;  %v9258_v28 = vld [vmem:[#allocation7 + $0x60] sm:$0xff]  }
 0xe72   :  { %v9260_v30 = vld [vmem:[#allocation7 + $0x68] sm:$0xff]  }
 0xe73   :  { %v4004_v31 = vmax.f32 %v3998_v27, %v4003_v29  ;;  %v9255_v27 = vld [vmem:[#allocation7 + $0x10] sm:$0xff]   ;;  %v9259_v29 = vld [vmem:[#allocation7 + $0x20] sm:$0xff]  }
 0xe75   :  { %4006 = vrot.lane.b32.xlu0 %v4004_v31, %s9700_s26  ;;  %v9261_v31 = vld [vmem:[#allocation7 + $0x28] sm:$0xff]  }
 0xe8e   :  { %v8288_v32 = vpop.f32.mrb[60].mxu0 }
 0xe8f   :  { %v8289_v33 = vpop.f32.mrb[61].mxu0 }
 0xe90   :  { %v8290_v34 = vadd.f32 %v8289_v33, %v8288_v32  ;;  %v8291_v37 = vpop.f32.mrb[62].mxu0  ;;  %v9262_v32 = vld [vmem:[#allocation7 + $0x70] sm:$0xff]  }
 0xe91   :  { %v8292_v38 = vpop.f32.mrb[63].mxu0  ;;  %v9263_v33 = vld [vmem:[#allocation7 + $0x30] sm:$0xff]   ;;  %v9265_v37 = vld [vmem:[#allocation7 + $0x38] sm:$0xff]  }
 0xe92   :  { %v4190_v39 = vadd.f32 %v8290_v34, %v9999_v35  ;;  %v9264_v34 = vld [vmem:[#allocation7 + $0x78] sm:$0xff]   ;;  %v7653_v38 = vcombine.low %v4566_v16, %v4566_v16  ;;  %v9291_v16 = vld [vmem:[#allocation10 + $0x8] sm:$0xff]  }
 0xe94   :  { %v4195_v40 = vmul.f32 0.2, %v4190_v39 }
 0xe96   :  { %v4196_v42 = vmax.f32 %v4190_v39, %v4195_v40  ;;  %v9268_v40 = vld [vmem:[#allocation10] sm:$0xff]  }
 0xe98   :  { %v4197_v53 = vpack.c.bf16 %v4196_v42, %v4196_v42  ;;  %v9270_v42 = vld [vmem:[#allocation10 + $0x10] sm:$0xff]  }
 0xe9a   :  { %8746 = vmatmul.mubr.msk.bf16.vlgmr.msra.gmra.mrb[52].mxu1 %vm362_vm1, %v4197_v53 }
 0xe9b   :  { %8300 = vmatpush3.bf16.msra.mxu1 %v9229_v43  ;;  %4464 = vmatprep.mubr.bf16.mxu1 %v7629_v45  ;;  %v9271_v43 = vld [vmem:[#allocation10 + $0x18] sm:$0xff]  }
 0xe9c   :  { %8301 = vmatprep.subr.bf16.mxu1 %v9230_v46  ;;  %v9272_v45 = vld [vmem:[#allocation7 + $0x40] sm:$0xff]  }
 0xe9f   :  { %8302 = vmatpush3.bf16.msra.mxu1 %v9231_v47 }
 0xea0   :  { %8303 = vmatprep.subr.bf16.mxu1 %v9232_v48 }
 0xea3   :  { %8304 = vmatpush3.bf16.msra.mxu1 %v9233_v49 }
 0xea4   :  { %8305 = vmatprep.subr.bf16.mxu1 %v9234_v50 }
 0xea7   :  { %8306 = vmatpush3.bf16.msra.mxu1 %v9235_v51 }
 0xea8   :  { %8307 = vmatprep.subr.bf16.mxu1 %v9236_v52 }
 0xeab   :  { %8308 = vmatpush3.bf16.msra.mxu1 %v9237_v54  ;;  %v10048_v54 = vld [vmem:[#allocation9] ss:$0 sm:$0xff] }
 0xeac   :  { %8309 = vmatprep.subr.bf16.mxu1 %v9238_v55 }
 0xeaf   :  { %8310 = vmatpush3.bf16.msra.mxu1 %v9239_v56 }
 0xeb0   :  { %8311 = vmatprep.subr.bf16.mxu1 %v9240_v57 }
 0xeb3   :  { %8312 = vmatpush3.bf16.msra.mxu1 %v9241_v58 }
 0xeb4   :  { %8313 = vmatprep.subr.bf16.mxu1 %v9242_v24 }
 0xeb7   :  { %8314 = vmatpush3.bf16.msra.mxu1 %v9243_v59 }
 0xeb8   :  { %8761 = vmatprep.subr.bf16.mxu1 %v9688_v36 }
 0xeba   :  { %4465 = vmatmul.mubr.bf16.vlgmr.msra.gmra.mrb[56].mxu1 %v7628_v60  ;;  %v4838_v60 = vld [vmem:[#allocation4 + $0x88] sm:$0xff] }
 0xebb   :  { %8769 = vmatprep.mubr.msk.bf16.mxu1 %vm9689_vm0, %v9688_v36  ;;  %8762 = vmatpush3.bf16.msra.mxu1 %v9268_v40  ;;  %v7679_v61 = vcombine.high %v4838_v60, %v4838_v60  ;;  %v9295_v40 = vld [vmem:[#allocation7] sm:$0xff]  }
 0xebc   :  { %8763 = vmatprep.subr.bf16.mxu1 %v9688_v36 }
 0xebf   :  { %8764 = vmatpush3.bf16.msra.mxu1 %v9269_v41 }
 0xec0   :  { %8765 = vmatprep.subr.bf16.mxu1 %v9688_v36 }
 0xec3   :  { %8766 = vmatpush3.bf16.msra.mxu1 %v9270_v42 }
 0xec4   :  { %8767 = vmatprep.subr.bf16.mxu1 %v9688_v36 }
 0xec7   :  { %8768 = vmatpush3.bf16.msra.mxu1 %v9271_v43  ;;  %v9296_v43 = vld [vmem:[#allocation7 + $0x48] sm:$0xff]  }
 0xec8   :  { %8353 = vmatprep.subr.bf16.mxu1 %v9272_v45  ;;  %v9297_v45 = vld [vmem:[#allocation7 + $0x8] sm:$0xff]  }
 0xee7   :  { %v4007_v44 = vpop.permute.xlu0 %4006 }
 0xee8   :  { %4010 = vst.msk [vmem:[#allocation2] sm:$0xff] %vm4009_vm15, %v4007_v44 }
 0xf6d   :  { %v4274_v2 = vpop.f32.mrb[52].mxu1 }
 0xf6e   :  { %v4275_v3 = vadd.f32 %v10009_v4, %v4274_v2  ;;  %v8747_v5 = vpop.f32.mrb[53].mxu1  ;;  %v9277_v2 = vld [vmem:[#allocation7 + $0x10] sm:$0xff]  }
 0xf6f   :  { %v4277_v6 = vpop.f32.mrb[54].mxu1  ;;  %v9279_v5 = vld [vmem:[#allocation7 + $0x18] sm:$0xff]  }
 0xf70   :  { %v4280_v7 = vmul.f32 0.2, %v4275_v3  ;;  %v8748_v8 = vpop.f32.mrb[55].mxu1  ;;  %v9280_v6 = vld [vmem:[#allocation7 + $0x60] sm:$0xff]  }
 0xf71   :  { %v9282_v8 = vld [vmem:[#allocation7 + $0x68] sm:$0xff]  }
 0xf72   :  { %v4281_v9 = vmax.f32 %v4275_v3, %v4280_v7  ;;  %v9278_v3 = vld [vmem:[#allocation7 + $0x58] sm:$0xff]   ;;  %v9281_v7 = vld [vmem:[#allocation7 + $0x20] sm:$0xff]  }
 0xf74   :  { %4283 = vrot.lane.b32.xlu0 %v4281_v9, %s9701_s0  ;;  %v9283_v9 = vld [vmem:[#allocation7 + $0x28] sm:$0xff]  }
 0xf8d   :  { %v8315_v17 = vpop.f32.mrb[56].mxu1 }
 0xf8e   :  { %v8316_v10 = vpop.f32.mrb[57].mxu1 }
 0xf8f   :  { %v8317_v11 = vadd.f32 %v8316_v10, %v8315_v17  ;;  %v8318_v12 = vpop.f32.mrb[58].mxu1  ;;  %v9284_v17 = vld [vmem:[#allocation7 + $0x70] sm:$0xff]  }
 0xf90   :  { %v8319_v13 = vpop.f32.mrb[59].mxu1  ;;  %v9285_v10 = vld [vmem:[#allocation7 + $0x30] sm:$0xff]   ;;  %v9287_v12 = vld [vmem:[#allocation7 + $0x38] sm:$0xff]  }
 0xf91   :  { %v4467_v14 = vadd.f32 %v8317_v11, %v9999_v35  ;;  %v9257_v35 = vld [vmem:[#allocation7 + $0x18] sm:$0xff]   ;;  %v7678_v13 = vcombine.low %v4838_v60, %v4838_v60  ;;  %v9313_v60 = vld [vmem:[#allocation10 + $0x8] sm:$0xff]  }
 0xf92   :  { %v9286_v11 = vld [vmem:[#allocation7 + $0x78] sm:$0xff]  }
 0xf93   :  { %v4472_v15 = vmul.f32 0.2, %v4467_v14 }
 0xf95   :  { %v4473_v18 = vmax.f32 %v4467_v14, %v4472_v15  ;;  %v9290_v15 = vld [vmem:[#allocation10] sm:$0xff]  }
 0xf97   :  { %v4474_v21 = vpack.c.bf16 %v4473_v18, %v4473_v18  ;;  %v9292_v18 = vld [vmem:[#allocation10 + $0x10] sm:$0xff]  }
 0xf99   :  { %8758 = vmatmul.mubr.msk.bf16.vlgmr.msra.gmra.mrb[64].mxu0 %vm362_vm1, %v4474_v21  ;;  %v10058_v21 = vld [vmem:[#allocation12] ss:$0 sm:$0xff] }
 0xf9a   :  { %8327 = vmatpush3.bf16.msra.mxu0 %v9251_v19  ;;  %4741 = vmatprep.mubr.bf16.mxu0 %v7654_v20  ;;  %v9293_v19 = vld [vmem:[#allocation10 + $0x18] sm:$0xff]  }
 0xf9b   :  { %8328 = vmatprep.subr.bf16.mxu0 %v9252_v22  ;;  %v9294_v20 = vld [vmem:[#allocation7 + $0x40] sm:$0xff]  }
 0xf9e   :  { %8329 = vmatpush3.bf16.msra.mxu0 %v9253_v23 }
 0xf9f   :  { %8330 = vmatprep.subr.bf16.mxu0 %v9254_v25 }
 0xfa2   :  { %8331 = vmatpush3.bf16.msra.mxu0 %v9255_v27 }
 0xfa3   :  { %8332 = vmatprep.subr.bf16.mxu0 %v9256_v26 }
 0xfa6   :  { %8333 = vmatpush3.bf16.msra.mxu0 %v9257_v35 }
 0xfa7   :  { %8334 = vmatprep.subr.bf16.mxu0 %v9258_v28 }
 0xfaa   :  { %8335 = vmatpush3.bf16.msra.mxu0 %v9259_v29 }
 0xfab   :  { %8336 = vmatprep.subr.bf16.mxu0 %v9260_v30 }
 0xfae   :  { %8337 = vmatpush3.bf16.msra.mxu0 %v9261_v31 }
 0xfaf   :  { %8338 = vmatprep.subr.bf16.mxu0 %v9262_v32 }
 0xfb2   :  { %8339 = vmatpush3.bf16.msra.mxu0 %v9263_v33 }
 0xfb3   :  { %8340 = vmatprep.subr.bf16.mxu0 %v9264_v34 }
 0xfb6   :  { %8341 = vmatpush3.bf16.msra.mxu0 %v9265_v37 }
 0xfb7   :  { %8773 = vmatprep.subr.bf16.mxu0 %v9688_v36 }
 0xfb9   :  { %4742 = vmatmul.mubr.bf16.vlgmr.msra.gmra.mrb[68].mxu0 %v7653_v38  ;;  %v5114_v38 = vld [vmem:[#allocation4 + $0x90] sm:$0xff] }
 0xfba   :  { %8781 = vmatprep.mubr.msk.bf16.mxu0 %vm9689_vm0, %v9688_v36  ;;  %8774 = vmatpush3.bf16.msra.mxu0 %v9290_v15  ;;  %v7704_v41 = vcombine.high %v5114_v38, %v5114_v38 }
 0xfbb   :  { %8775 = vmatprep.subr.bf16.mxu0 %v9688_v36 }
 0xfbe   :  { %8776 = vmatpush3.bf16.msra.mxu0 %v9291_v16 }
 0xfbf   :  { %8777 = vmatprep.subr.bf16.mxu0 %v9688_v36 }
 0xfc2   :  { %8778 = vmatpush3.bf16.msra.mxu0 %v9292_v18  ;;  %v9318_v18 = vld [vmem:[#allocation7 + $0x48] sm:$0xff]  }
 0xfc3   :  { %8779 = vmatprep.subr.bf16.mxu0 %v9688_v36 }
 0xfc6   :  { %8780 = vmatpush3.bf16.msra.mxu0 %v9293_v19  ;;  %v9319_v19 = vld [vmem:[#allocation7 + $0x8] sm:$0xff]  }
 0xfc7   :  { %8380 = vmatprep.subr.bf16.mxu0 %v9294_v20  ;;  %v9320_v20 = vld [vmem:[#allocation7 + $0x50] sm:$0xff]  }
 0xfe6   :  { %v4284_v39 = vpop.permute.xlu0 %4283 }
 0xfe7   :  { %4287 = vst.msk [vmem:[#allocation2] sm:$0xff] %vm4286_vm11, %v4284_v39 }
0x106c   :  { %v4551_v53 = vpop.f32.mrb[64].mxu0 }
0x106d   :  { %v4552_v46 = vadd.f32 %v10009_v4, %v4551_v53  ;;  %v8759_v47 = vpop.f32.mrb[65].mxu0  ;;  %v9273_v4 = vld [vmem:[#allocation7] sm:$0xff]   ;;  %v9298_v53 = vld [vmem:[#allocation7 + $0x50] sm:$0xff]  }
0x106e   :  { %v4554_v48 = vpop.f32.mrb[66].mxu0  ;;  %v9300_v47 = vld [vmem:[#allocation7 + $0x58] sm:$0xff]  }
0x106f   :  { %v4557_v49 = vmul.f32 0.2, %v4552_v46  ;;  %v8760_v50 = vpop.f32.mrb[67].mxu0  ;;  %v9301_v48 = vld [vmem:[#allocation7 + $0x18] sm:$0xff]  }
0x1070   :  { %v9303_v50 = vld [vmem:[#allocation7 + $0x20] sm:$0xff]  }
0x1071   :  { %v4558_v51 = vmax.f32 %v4552_v46, %v4557_v49  ;;  %v9299_v46 = vld [vmem:[#allocation7 + $0x10] sm:$0xff]   ;;  %v9302_v49 = vld [vmem:[#allocation7 + $0x60] sm:$0xff]  }
0x1073   :  { %4560 = vrot.lane.b32.xlu0 %v4558_v51, %s9702_s28  ;;  %v9304_v51 = vld [vmem:[#allocation7 + $0x68] sm:$0xff]  }
0x108c   :  { %v8342_v52 = vpop.f32.mrb[68].mxu0 }
0x108d   :  { %v8343_v55 = vpop.f32.mrb[69].mxu0 }
0x108e   :  { %v8344_v56 = vadd.f32 %v8343_v55, %v8342_v52  ;;  %v8345_v57 = vpop.f32.mrb[70].mxu0  ;;  %v9305_v52 = vld [vmem:[#allocation7 + $0x28] sm:$0xff]   ;;  %v9306_v55 = vld [vmem:[#allocation7 + $0x70] sm:$0xff]  }
0x108f   :  { %v8346_v58 = vpop.f32.mrb[71].mxu0  ;;  %v9308_v57 = vld [vmem:[#allocation7 + $0x78] sm:$0xff]  }
0x1090   :  { %v4744_v24 = vadd.f32 %v8344_v56, %v10048_v54  ;;  %v9307_v56 = vld [vmem:[#allocation7 + $0x30] sm:$0xff]   ;;  %v9309_v58 = vld [vmem:[#allocation7 + $0x38] sm:$0xff]  }
0x1092   :  { %v4749_v59 = vmul.f32 0.2, %v4744_v24 }
0x1094   :  { %v4750_v44 = vmax.f32 %v4744_v24, %v4749_v59  ;;  %v7703_v24 = vcombine.low %v5114_v38, %v5114_v38  ;;  %v9312_v59 = vld [vmem:[#allocation10] sm:$0xff]   ;;  %v9335_v38 = vld [vmem:[#allocation10 + $0x8] sm:$0xff]  }
0x1096   :  { %v4751_v62 = vpack.c.bf16 %v4750_v44, %v4750_v44  ;;  %v9314_v44 = vld [vmem:[#allocation10 + $0x10] sm:$0xff]  }
0x1098   :  { %8770 = vmatmul.mubr.msk.bf16.vlgmr.msra.gmra.mrb[60].mxu1 %vm362_vm1, %v4751_v62 }
0x1099   :  { %8354 = vmatpush3.bf16.msra.mxu1 %v9273_v4  ;;  %5013 = vmatprep.mubr.bf16.mxu1 %v7679_v61  ;;  %v9315_v4 = vld [vmem:[#allocation10 + $0x18] sm:$0xff]  }
0x109a   :  { %8355 = vmatprep.subr.bf16.mxu1 %v9274_v63  ;;  %v9316_v61 = vld [vmem:[#allocation7 + $0x40] sm:$0xff]  }
0x109d   :  { %8356 = vmatpush3.bf16.msra.mxu1 %v9275_v0 }
0x109e   :  { %8357 = vmatprep.subr.bf16.mxu1 %v9276_v1 }
0x10a1   :  { %8358 = vmatpush3.bf16.msra.mxu1 %v9277_v2 }
0x10a2   :  { %8359 = vmatprep.subr.bf16.mxu1 %v9278_v3 }
0x10a5   :  { %8360 = vmatpush3.bf16.msra.mxu1 %v9279_v5 }
0x10a6   :  { %8361 = vmatprep.subr.bf16.mxu1 %v9280_v6 }
0x10a9   :  { %8362 = vmatpush3.bf16.msra.mxu1 %v9281_v7 }
0x10aa   :  { %8363 = vmatprep.subr.bf16.mxu1 %v9282_v8 }
0x10ad   :  { %8364 = vmatpush3.bf16.msra.mxu1 %v9283_v9 }
0x10ae   :  { %8365 = vmatprep.subr.bf16.mxu1 %v9284_v17 }
0x10b1   :  { %8366 = vmatpush3.bf16.msra.mxu1 %v9285_v10 }
0x10b2   :  { %8367 = vmatprep.subr.bf16.mxu1 %v9286_v11 }
0x10b5   :  { %8368 = vmatpush3.bf16.msra.mxu1 %v9287_v12  ;;  %v5390_v12 = vld [vmem:[#allocation4 + $0x98] sm:$0xff] }
0x10b6   :  { %8785 = vmatprep.subr.bf16.mxu1 %v9688_v36  ;;  %v7729_v15 = vcombine.high %v5390_v12, %v5390_v12 }
0x10b8   :  { %5014 = vmatmul.mubr.bf16.vlgmr.msra.gmra.mrb[64].mxu1 %v7678_v13 }
0x10b9   :  { %8793 = vmatprep.mubr.msk.bf16.mxu1 %vm9689_vm0, %v9688_v36  ;;  %8786 = vmatpush3.bf16.msra.mxu1 %v9312_v59  ;;  %v9339_v59 = vld [vmem:[#allocation7] sm:$0xff]  }
0x10ba   :  { %8787 = vmatprep.subr.bf16.mxu1 %v9688_v36 }
0x10bd   :  { %8788 = vmatpush3.bf16.msra.mxu1 %v9313_v60 }
0x10be   :  { %8789 = vmatprep.subr.bf16.mxu1 %v9688_v36 }
0x10c1   :  { %8790 = vmatpush3.bf16.msra.mxu1 %v9314_v44 }
0x10c2   :  { %8791 = vmatprep.subr.bf16.mxu1 %v9688_v36 }
0x10c5   :  { %8792 = vmatpush3.bf16.msra.mxu1 %v9315_v4  ;;  %v9340_v4 = vld [vmem:[#allocation7 + $0x48] sm:$0xff]  }
0x10c6   :  { %8407 = vmatprep.subr.bf16.mxu1 %v9316_v61  ;;  %v9341_v61 = vld [vmem:[#allocation7 + $0x8] sm:$0xff]  }
0x10e5   :  { %v4561_v14 = vpop.permute.xlu0 %4560 }
0x10e6   :  { %4564 = vst.msk [vmem:[#allocation2] sm:$0xff] %vm4563_vm12, %v4561_v14  ;;  %v9317_v14 = vld [vmem:[#allocation7] sm:$0xff]  }
0x116b   :  { %v4828_v22 = vpop.f32.mrb[60].mxu1 }
0x116c   :  { %v4829_v23 = vadd.f32 %v10058_v21, %v4828_v22  ;;  %v8771_v25 = vpop.f32.mrb[61].mxu1  ;;  %v9321_v22 = vld [vmem:[#allocation7 + $0x10] sm:$0xff]  }
0x116d   :  { %v4831_v27 = vpop.f32.mrb[62].mxu1  ;;  %v9323_v25 = vld [vmem:[#allocation7 + $0x18] sm:$0xff]  }
0x116e   :  { %v4834_v26 = vmul.f32 0.2, %v4829_v23  ;;  %v8772_v35 = vpop.f32.mrb[63].mxu1  ;;  %v9324_v27 = vld [vmem:[#allocation7 + $0x60] sm:$0xff]  }
0x116f   :  { %v9326_v35 = vld [vmem:[#allocation7 + $0x68] sm:$0xff]  }
0x1170   :  { %v4835_v28 = vmax.f32 %v4829_v23, %v4834_v26  ;;  %v9322_v23 = vld [vmem:[#allocation7 + $0x58] sm:$0xff]   ;;  %v9325_v26 = vld [vmem:[#allocation7 + $0x20] sm:$0xff]  }
0x1172   :  { %4836 = vst.msk [vmem:[#allocation2 + $0x8] sm:$0xff] %vm408_vm2, %v4835_v28  ;;  %v9327_v28 = vld [vmem:[#allocation7 + $0x28] sm:$0xff]   ;;  %vm7214_vm2 = vcmask 261120  }
0x118b   :  { %v8369_v29 = vpop.f32.mrb[64].mxu1 }
0x118c   :  { %v8370_v30 = vpop.f32.mrb[65].mxu1 }
0x118d   :  { %v8371_v31 = vadd.f32 %v8370_v30, %v8369_v29  ;;  %v8372_v32 = vpop.f32.mrb[66].mxu1  ;;  %v9328_v29 = vld [vmem:[#allocation7 + $0x70] sm:$0xff]  }
0x118e   :  { %v8373_v33 = vpop.f32.mrb[67].mxu1  ;;  %v9329_v30 = vld [vmem:[#allocation7 + $0x30] sm:$0xff]   ;;  %v9331_v32 = vld [vmem:[#allocation7 + $0x38] sm:$0xff]  }
0x118f   :  { %v5016_v34 = vadd.f32 %v8371_v31, %v10048_v54  ;;  %v9330_v31 = vld [vmem:[#allocation7 + $0x78] sm:$0xff]   ;;  %v7728_v33 = vcombine.low %v5390_v12, %v5390_v12  ;;  %v9356_v12 = vld [vmem:[#allocation10] sm:$0xff]  }
0x1191   :  { %v5021_v37 = vmul.f32 0.2, %v5016_v34 }
0x1193   :  { %v5022_v39 = vmax.f32 %v5016_v34, %v5021_v37  ;;  %v9334_v37 = vld [vmem:[#allocation10] sm:$0xff]  }
0x1195   :  { %v5023_v42 = vpack.c.bf16 %v5022_v39, %v5022_v39  ;;  %v9336_v39 = vld [vmem:[#allocation10 + $0x10] sm:$0xff]  }
0x1197   :  { %8782 = vmatmul.mubr.msk.bf16.vlgmr.msra.gmra.mrb[72].mxu0 %vm362_vm1, %v5023_v42 }
0x1198   :  { %8381 = vmatpush3.bf16.msra.mxu0 %v9295_v40  ;;  %5289 = vmatprep.mubr.bf16.mxu0 %v7704_v41  ;;  %v9337_v40 = vld [vmem:[#allocation10 + $0x18] sm:$0xff]  }
0x1199   :  { %8382 = vmatprep.subr.bf16.mxu0 %v9296_v43  ;;  %v9338_v41 = vld [vmem:[#allocation7 + $0x40] sm:$0xff]  }
0x119c   :  { %8383 = vmatpush3.bf16.msra.mxu0 %v9297_v45 }
0x119d   :  { %8384 = vmatprep.subr.bf16.mxu0 %v9298_v53 }
0x11a0   :  { %8385 = vmatpush3.bf16.msra.mxu0 %v9299_v46 }
0x11a1   :  { %8386 = vmatprep.subr.bf16.mxu0 %v9300_v47 }
0x11a4   :  { %8387 = vmatpush3.bf16.msra.mxu0 %v9301_v48 }
0x11a5   :  { %8388 = vmatprep.subr.bf16.mxu0 %v9302_v49 }
0x11a8   :  { %8389 = vmatpush3.bf16.msra.mxu0 %v9303_v50 }
0x11a9   :  { %8390 = vmatprep.subr.bf16.mxu0 %v9304_v51 }
0x11ac   :  { %8391 = vmatpush3.bf16.msra.mxu0 %v9305_v52 }
0x11ad   :  { %8392 = vmatprep.subr.bf16.mxu0 %v9306_v55 }
0x11b0   :  { %8393 = vmatpush3.bf16.msra.mxu0 %v9307_v56 }
0x11b1   :  { %8394 = vmatprep.subr.bf16.mxu0 %v9308_v57 }
0x11b4   :  { %8395 = vmatpush3.bf16.msra.mxu0 %v9309_v58  ;;  %v5666_v58 = vld [vmem:[#allocation4 + $0xa0] sm:$0xff] }
0x11b5   :  { %8797 = vmatprep.subr.bf16.mxu0 %v9688_v36  ;;  %v7754_v60 = vcombine.high %v5666_v58, %v5666_v58 }
0x11b7   :  { %5290 = vmatmul.mubr.bf16.vlgmr.msra.gmra.mrb[76].mxu0 %v7703_v24 }
0x11b8   :  { %8805 = vmatprep.mubr.msk.bf16.mxu0 %vm9689_vm0, %v9688_v36  ;;  %8798 = vmatpush3.bf16.msra.mxu0 %v9334_v37  ;;  %v9361_v37 = vld [vmem:[#allocation7] sm:$0xff]  }
0x11b9   :  { %8799 = vmatprep.subr.bf16.mxu0 %v9688_v36 }
0x11bc   :  { %8800 = vmatpush3.bf16.msra.mxu0 %v9335_v38 }
0x11bd   :  { %8801 = vmatprep.subr.bf16.mxu0 %v9688_v36 }
0x11c0   :  { %8802 = vmatpush3.bf16.msra.mxu0 %v9336_v39 }
0x11c1   :  { %8803 = vmatprep.subr.bf16.mxu0 %v9688_v36 }
0x11c4   :  { %8804 = vmatpush3.bf16.msra.mxu0 %v9337_v40  ;;  %v9362_v40 = vld [vmem:[#allocation7 + $0x48] sm:$0xff]  }
0x11c5   :  { %8434 = vmatprep.subr.bf16.mxu0 %v9338_v41  ;;  %v9363_v41 = vld [vmem:[#allocation7 + $0x8] sm:$0xff]  }
0x126a   :  { %v5100_v62 = vpop.f32.mrb[72].mxu0 }
0x126b   :  { %v5101_v63 = vadd.f32 %v10058_v21, %v5100_v62  ;;  %v8783_v0 = vpop.f32.mrb[73].mxu0  ;;  %v9342_v62 = vld [vmem:[#allocation7 + $0x50] sm:$0xff]  }
0x126c   :  { %v5103_v1 = vpop.f32.mrb[74].mxu0  ;;  %v9344_v0 = vld [vmem:[#allocation7 + $0x58] sm:$0xff]  }
0x126d   :  { %v5106_v2 = vmul.f32 0.2, %v5101_v63  ;;  %v8784_v3 = vpop.f32.mrb[75].mxu0  ;;  %v9345_v1 = vld [vmem:[#allocation7 + $0x18] sm:$0xff]  }
0x126e   :  { %v9347_v3 = vld [vmem:[#allocation7 + $0x20] sm:$0xff]  }
0x126f   :  { %v5107_v5 = vmax.f32 %v5101_v63, %v5106_v2  ;;  %v9343_v63 = vld [vmem:[#allocation7 + $0x10] sm:$0xff]   ;;  %v9346_v2 = vld [vmem:[#allocation7 + $0x60] sm:$0xff]  }
0x1271   :  { %5109 = vrot.lane.b32.xlu1 %v5107_v5, %s9683_s21  ;;  %v9348_v5 = vld [vmem:[#allocation7 + $0x68] sm:$0xff]  }
0x128a   :  { %v8396_v6 = vpop.f32.mrb[76].mxu0 }
0x128b   :  { %v8397_v7 = vpop.f32.mrb[77].mxu0 }
0x128c   :  { %v8398_v8 = vadd.f32 %v8397_v7, %v8396_v6  ;;  %v8399_v9 = vpop.f32.mrb[78].mxu0  ;;  %v9349_v6 = vld [vmem:[#allocation7 + $0x28] sm:$0xff]   ;;  %v9350_v7 = vld [vmem:[#allocation7 + $0x70] sm:$0xff]  }
0x128d   :  { %v8400_v17 = vpop.f32.mrb[79].mxu0  ;;  %v9352_v9 = vld [vmem:[#allocation7 + $0x78] sm:$0xff]  }
0x128e   :  { %v5292_v10 = vadd.f32 %v8398_v8, %v10048_v54  ;;  %v9351_v8 = vld [vmem:[#allocation7 + $0x30] sm:$0xff]   ;;  %v9353_v17 = vld [vmem:[#allocation7 + $0x38] sm:$0xff]  }
0x1290   :  { %v5297_v11 = vmul.f32 0.2, %v5292_v10 }
0x1292   :  { %v5298_v13 = vmax.f32 %v5292_v10, %v5297_v11  ;;  %v7753_v10 = vcombine.low %v5666_v58, %v5666_v58  ;;  %v9379_v58 = vld [vmem:[#allocation10 + $0x8] sm:$0xff]  }
0x1294   :  { %v5299_v16 = vpack.c.bf16 %v5298_v13, %v5298_v13  ;;  %v9357_v13 = vld [vmem:[#allocation10 + $0x8] sm:$0xff]  }
0x1296   :  { %8794 = vmatmul.mubr.msk.bf16.vlgmr.msra.gmra.mrb[68].mxu1 %vm362_vm1, %v5299_v16  ;;  %v9360_v16 = vld [vmem:[#allocation7 + $0x40] sm:$0xff]  }
0x1297   :  { %8408 = vmatpush3.bf16.msra.mxu1 %v9317_v14  ;;  %5565 = vmatprep.mubr.bf16.mxu1 %v7729_v15  ;;  %v9358_v14 = vld [vmem:[#allocation10 + $0x10] sm:$0xff]   ;;  %v9359_v15 = vld [vmem:[#allocation10 + $0x18] sm:$0xff]  }
0x1298   :  { %8409 = vmatprep.subr.bf16.mxu1 %v9318_v18 }
0x129b   :  { %8410 = vmatpush3.bf16.msra.mxu1 %v9319_v19 }
0x129c   :  { %8411 = vmatprep.subr.bf16.mxu1 %v9320_v20 }
0x129f   :  { %8412 = vmatpush3.bf16.msra.mxu1 %v9321_v22 }
0x12a0   :  { %8413 = vmatprep.subr.bf16.mxu1 %v9322_v23 }
0x12a3   :  { %8414 = vmatpush3.bf16.msra.mxu1 %v9323_v25 }
0x12a4   :  { %8415 = vmatprep.subr.bf16.mxu1 %v9324_v27 }
0x12a7   :  { %8416 = vmatpush3.bf16.msra.mxu1 %v9325_v26 }
0x12a8   :  { %8417 = vmatprep.subr.bf16.mxu1 %v9326_v35 }
0x12ab   :  { %8418 = vmatpush3.bf16.msra.mxu1 %v9327_v28 }
0x12ac   :  { %8419 = vmatprep.subr.bf16.mxu1 %v9328_v29 }
0x12af   :  { %8420 = vmatpush3.bf16.msra.mxu1 %v9329_v30 }
0x12b0   :  { %8421 = vmatprep.subr.bf16.mxu1 %v9330_v31 }
0x12b3   :  { %8422 = vmatpush3.bf16.msra.mxu1 %v9331_v32 }
0x12b4   :  { %8809 = vmatprep.subr.bf16.mxu1 %v9688_v36 }
0x12b6   :  { %5566 = vmatmul.mubr.bf16.vlgmr.msra.gmra.mrb[72].mxu1 %v7728_v33  ;;  %v5942_v33 = vld [vmem:[#allocation4 + $0xa8] sm:$0xff] }
0x12b7   :  { %8817 = vmatprep.mubr.msk.bf16.mxu1 %vm9689_vm0, %v9688_v36  ;;  %8810 = vmatpush3.bf16.msra.mxu1 %v9356_v12  ;;  %v7779_v38 = vcombine.high %v5942_v33, %v5942_v33 }
0x12b8   :  { %8811 = vmatprep.subr.bf16.mxu1 %v9688_v36 }
0x12bb   :  { %8812 = vmatpush3.bf16.msra.mxu1 %v9357_v13 }
0x12bc   :  { %8813 = vmatprep.subr.bf16.mxu1 %v9688_v36 }
0x12bf   :  { %8814 = vmatpush3.bf16.msra.mxu1 %v9358_v14  ;;  %v9384_v14 = vld [vmem:[#allocation7 + $0x48] sm:$0xff]  }
0x12c0   :  { %8815 = vmatprep.subr.bf16.mxu1 %v9688_v36 }
0x12c3   :  { %8816 = vmatpush3.bf16.msra.mxu1 %v9359_v15  ;;  %v9385_v15 = vld [vmem:[#allocation7 + $0x8] sm:$0xff]  }
0x12c4   :  { %8461 = vmatprep.subr.bf16.mxu1 %v9360_v16  ;;  %v9386_v16 = vld [vmem:[#allocation7 + $0x50] sm:$0xff]  }
0x12e3   :  { %v5110_v34 = vpop.permute.xlu1 %5109 }
0x12e4   :  { %5112 = vst.msk [vmem:[#allocation2 + $0x8] sm:$0xff] %vm685_vm3, %v5110_v34  ;;  %vm7231_vm3 = vcmask 7168  }
0x1369   :  { %v5376_v42 = vpop.f32.mrb[68].mxu1 }
0x136a   :  { %v5377_v43 = vadd.f32 %v10058_v21, %v5376_v42  ;;  %v8795_v45 = vpop.f32.mrb[69].mxu1  ;;  %v9364_v42 = vld [vmem:[#allocation7 + $0x50] sm:$0xff]  }
0x136b   :  { %v5379_v53 = vpop.f32.mrb[70].mxu1  ;;  %v9366_v45 = vld [vmem:[#allocation7 + $0x58] sm:$0xff]  }
0x136c   :  { %v5382_v46 = vmul.f32 0.2, %v5377_v43  ;;  %v8796_v47 = vpop.f32.mrb[71].mxu1  ;;  %v9368_v53 = vld [vmem:[#allocation7 + $0x60] sm:$0xff]  }
0x136d   :  { %v9370_v47 = vld [vmem:[#allocation7 + $0x68] sm:$0xff]  }
0x136e   :  { %v5383_v48 = vmax.f32 %v5377_v43, %v5382_v46  ;;  %v9365_v43 = vld [vmem:[#allocation7 + $0x10] sm:$0xff]   ;;  %v9369_v46 = vld [vmem:[#allocation7 + $0x20] sm:$0xff]  }
0x1370   :  { %5385 = vrot.lane.b32.xlu1 %v5383_v48, %s9690_s7  ;;  %v9371_v48 = vld [vmem:[#allocation7 + $0x28] sm:$0xff]  }
0x1389   :  { %v8423_v49 = vpop.f32.mrb[72].mxu1 }
0x138a   :  { %v8424_v50 = vpop.f32.mrb[73].mxu1 }
0x138b   :  { %v8425_v51 = vadd.f32 %v8424_v50, %v8423_v49  ;;  %v8426_v52 = vpop.f32.mrb[74].mxu1  ;;  %v9372_v49 = vld [vmem:[#allocation7 + $0x70] sm:$0xff]  }
0x138c   :  { %v8427_v55 = vpop.f32.mrb[75].mxu1  ;;  %v9373_v50 = vld [vmem:[#allocation7 + $0x30] sm:$0xff]   ;;  %v9375_v52 = vld [vmem:[#allocation7 + $0x38] sm:$0xff]  }
0x138d   :  { %v5568_v56 = vadd.f32 %v8425_v51, %v10048_v54  ;;  %v9374_v51 = vld [vmem:[#allocation7 + $0x78] sm:$0xff]   ;;  %v7778_v55 = vcombine.low %v5942_v33, %v5942_v33  ;;  %v9401_v33 = vld [vmem:[#allocation10 + $0x8] sm:$0xff]  }
0x138f   :  { %v5573_v57 = vmul.f32 0.2, %v5568_v56 }
0x1391   :  { %v5574_v24 = vmax.f32 %v5568_v56, %v5573_v57  ;;  %v9378_v57 = vld [vmem:[#allocation10] sm:$0xff]  }
0x1393   :  { %v5575_v44 = vpack.c.bf16 %v5574_v24, %v5574_v24  ;;  %v9380_v24 = vld [vmem:[#allocation10 + $0x10] sm:$0xff]  }
0x1395   :  { %8806 = vmatmul.mubr.msk.bf16.vlgmr.msra.gmra.mrb[80].mxu0 %vm362_vm1, %v5575_v44 }
0x1396   :  { %8435 = vmatpush3.bf16.msra.mxu0 %v9339_v59  ;;  %5841 = vmatprep.mubr.bf16.mxu0 %v7754_v60  ;;  %v9381_v59 = vld [vmem:[#allocation10 + $0x18] sm:$0xff]  }
0x1397   :  { %8436 = vmatprep.subr.bf16.mxu0 %v9340_v4  ;;  %v9382_v60 = vld [vmem:[#allocation7 + $0x40] sm:$0xff]  }
0x139a   :  { %8437 = vmatpush3.bf16.msra.mxu0 %v9341_v61 }
0x139b   :  { %8438 = vmatprep.subr.bf16.mxu0 %v9342_v62 }
0x139e   :  { %8439 = vmatpush3.bf16.msra.mxu0 %v9343_v63 }
0x139f   :  { %8440 = vmatprep.subr.bf16.mxu0 %v9344_v0 }
0x13a2   :  { %8441 = vmatpush3.bf16.msra.mxu0 %v9345_v1 }
0x13a3   :  { %8442 = vmatprep.subr.bf16.mxu0 %v9346_v2 }
0x13a6   :  { %8443 = vmatpush3.bf16.msra.mxu0 %v9347_v3  ;;  %v10105_v3 = vld [vmem:[#allocation9] ss:$0 sm:$0xff] }
0x13a7   :  { %8444 = vmatprep.subr.bf16.mxu0 %v9348_v5 }
0x13aa   :  { %8445 = vmatpush3.bf16.msra.mxu0 %v9349_v6 }
0x13ab   :  { %8446 = vmatprep.subr.bf16.mxu0 %v9350_v7 }
0x13ae   :  { %8447 = vmatpush3.bf16.msra.mxu0 %v9351_v8 }
0x13af   :  { %8448 = vmatprep.subr.bf16.mxu0 %v9352_v9 }
0x13b2   :  { %8449 = vmatpush3.bf16.msra.mxu0 %v9353_v17 }
0x13b3   :  { %8821 = vmatprep.subr.bf16.mxu0 %v9688_v36 }
0x13b5   :  { %5842 = vmatmul.mubr.bf16.vlgmr.msra.gmra.mrb[84].mxu0 %v7753_v10  ;;  %v6218_v10 = vld [vmem:[#allocation4 + $0xb0] sm:$0xff] }
0x13b6   :  { %8829 = vmatprep.mubr.msk.bf16.mxu0 %vm9689_vm0, %v9688_v36  ;;  %8822 = vmatpush3.bf16.msra.mxu0 %v9378_v57  ;;  %v7804_v12 = vcombine.high %v6218_v10, %v6218_v10  ;;  %v9405_v57 = vld [vmem:[#allocation7] sm:$0xff]  }
0x13b7   :  { %8823 = vmatprep.subr.bf16.mxu0 %v9688_v36 }
0x13ba   :  { %8824 = vmatpush3.bf16.msra.mxu0 %v9379_v58 }
0x13bb   :  { %8825 = vmatprep.subr.bf16.mxu0 %v9688_v36 }
0x13be   :  { %8826 = vmatpush3.bf16.msra.mxu0 %v9380_v24 }
0x13bf   :  { %8827 = vmatprep.subr.bf16.mxu0 %v9688_v36 }
0x13c2   :  { %8828 = vmatpush3.bf16.msra.mxu0 %v9381_v59  ;;  %v9406_v59 = vld [vmem:[#allocation7 + $0x48] sm:$0xff]  }
0x13c3   :  { %8488 = vmatprep.subr.bf16.mxu0 %v9382_v60  ;;  %v9407_v60 = vld [vmem:[#allocation7 + $0x8] sm:$0xff]  }
0x13e2   :  { %v5386_v11 = vpop.permute.xlu1 %5385 }
0x13e3   :  { %5388 = vst.msk [vmem:[#allocation2 + $0x8] sm:$0xff] %vm962_vm4, %v5386_v11 }
0x1468   :  { %v5652_v18 = vpop.f32.mrb[80].mxu0 }
0x1469   :  { %v5653_v19 = vadd.f32 %v10058_v21, %v5652_v18  ;;  %v8807_v20 = vpop.f32.mrb[81].mxu0  ;;  %v9387_v18 = vld [vmem:[#allocation7 + $0x10] sm:$0xff]  }
0x146a   :  { %v5655_v22 = vpop.f32.mrb[82].mxu0  ;;  %v9389_v20 = vld [vmem:[#allocation7 + $0x18] sm:$0xff]  }
0x146b   :  { %v5658_v23 = vmul.f32 0.2, %v5653_v19  ;;  %v8808_v25 = vpop.f32.mrb[83].mxu0  ;;  %v9390_v22 = vld [vmem:[#allocation7 + $0x60] sm:$0xff]  }
0x146c   :  { %v9392_v25 = vld [vmem:[#allocation7 + $0x68] sm:$0xff]  }
0x146d   :  { %v5659_v27 = vmax.f32 %v5653_v19, %v5658_v23  ;;  %v9388_v19 = vld [vmem:[#allocation7 + $0x58] sm:$0xff]   ;;  %v9391_v23 = vld [vmem:[#allocation7 + $0x20] sm:$0xff]  }
0x146f   :  { %5661 = vrot.lane.b32.xlu1 %v5659_v27, %s9691_s16  ;;  %v9393_v27 = vld [vmem:[#allocation7 + $0x28] sm:$0xff]  }
0x1488   :  { %v8450_v26 = vpop.f32.mrb[84].mxu0 }
0x1489   :  { %v8451_v35 = vpop.f32.mrb[85].mxu0 }
0x148a   :  { %v8452_v28 = vadd.f32 %v8451_v35, %v8450_v26  ;;  %v8453_v29 = vpop.f32.mrb[86].mxu0  ;;  %v9394_v26 = vld [vmem:[#allocation7 + $0x70] sm:$0xff]  }
0x148b   :  { %v8454_v30 = vpop.f32.mrb[87].mxu0  ;;  %v9395_v35 = vld [vmem:[#allocation7 + $0x30] sm:$0xff]   ;;  %v9397_v29 = vld [vmem:[#allocation7 + $0x38] sm:$0xff]  }
0x148c   :  { %v5844_v31 = vadd.f32 %v8452_v28, %v10048_v54  ;;  %v9367_v54 = vld [vmem:[#allocation7 + $0x18] sm:$0xff]   ;;  %v7803_v30 = vcombine.low %v6218_v10, %v6218_v10  ;;  %v9422_v10 = vld [vmem:[#allocation10] sm:$0xff]  }
0x148d   :  { %v9396_v28 = vld [vmem:[#allocation7 + $0x78] sm:$0xff]  }
0x148e   :  { %v5849_v32 = vmul.f32 0.2, %v5844_v31 }
0x1490   :  { %v5850_v34 = vmax.f32 %v5844_v31, %v5849_v32  ;;  %v9400_v32 = vld [vmem:[#allocation10] sm:$0xff]  }
0x1492   :  { %v5851_v39 = vpack.c.bf16 %v5850_v34, %v5850_v34  ;;  %v9402_v34 = vld [vmem:[#allocation10 + $0x10] sm:$0xff]  }
0x1494   :  { %8818 = vmatmul.mubr.msk.bf16.vlgmr.msra.gmra.mrb[76].mxu1 %vm362_vm1, %v5851_v39  ;;  %v10116_v39 = vld [vmem:[#allocation12] ss:$0 sm:$0xff] }
0x1495   :  { %8462 = vmatpush3.bf16.msra.mxu1 %v9361_v37  ;;  %6117 = vmatprep.mubr.bf16.mxu1 %v7779_v38  ;;  %v9403_v37 = vld [vmem:[#allocation10 + $0x18] sm:$0xff]  }
0x1496   :  { %8463 = vmatprep.subr.bf16.mxu1 %v9362_v40  ;;  %v9404_v38 = vld [vmem:[#allocation7 + $0x40] sm:$0xff]  }
0x1499   :  { %8464 = vmatpush3.bf16.msra.mxu1 %v9363_v41 }
0x149a   :  { %8465 = vmatprep.subr.bf16.mxu1 %v9364_v42 }
0x149d   :  { %8466 = vmatpush3.bf16.msra.mxu1 %v9365_v43 }
0x149e   :  { %8467 = vmatprep.subr.bf16.mxu1 %v9366_v45 }
0x14a1   :  { %8468 = vmatpush3.bf16.msra.mxu1 %v9367_v54 }
0x14a2   :  { %8469 = vmatprep.subr.bf16.mxu1 %v9368_v53 }
0x14a5   :  { %8470 = vmatpush3.bf16.msra.mxu1 %v9369_v46 }
0x14a6   :  { %8471 = vmatprep.subr.bf16.mxu1 %v9370_v47 }
0x14a9   :  { %8472 = vmatpush3.bf16.msra.mxu1 %v9371_v48 }
0x14aa   :  { %8473 = vmatprep.subr.bf16.mxu1 %v9372_v49 }
0x14ad   :  { %8474 = vmatpush3.bf16.msra.mxu1 %v9373_v50 }
0x14ae   :  { %8475 = vmatprep.subr.bf16.mxu1 %v9374_v51 }
0x14b1   :  { %8476 = vmatpush3.bf16.msra.mxu1 %v9375_v52 }
0x14b2   :  { %8833 = vmatprep.subr.bf16.mxu1 %v9688_v36 }
0x14b4   :  { %6118 = vmatmul.mubr.bf16.vlgmr.msra.gmra.mrb[80].mxu1 %v7778_v55  ;;  %v6494_v55 = vld [vmem:[#allocation4 + $0xb8] sm:$0xff] }
0x14b5   :  { %8841 = vmatprep.mubr.msk.bf16.mxu1 %vm9689_vm0, %v9688_v36  ;;  %8834 = vmatpush3.bf16.msra.mxu1 %v9400_v32  ;;  %v7829_v58 = vcombine.high %v6494_v55, %v6494_v55  ;;  %v9427_v32 = vld [vmem:[#allocation7] sm:$0xff]  }
0x14b6   :  { %8835 = vmatprep.subr.bf16.mxu1 %v9688_v36 }
0x14b9   :  { %8836 = vmatpush3.bf16.msra.mxu1 %v9401_v33 }
0x14ba   :  { %8837 = vmatprep.subr.bf16.mxu1 %v9688_v36 }
0x14bd   :  { %8838 = vmatpush3.bf16.msra.mxu1 %v9402_v34 }
0x14be   :  { %8839 = vmatprep.subr.bf16.mxu1 %v9688_v36 }
0x14c1   :  { %8840 = vmatpush3.bf16.msra.mxu1 %v9403_v37  ;;  %v9428_v37 = vld [vmem:[#allocation7 + $0x48] sm:$0xff]  }
0x14c2   :  { %8515 = vmatprep.subr.bf16.mxu1 %v9404_v38  ;;  %v9429_v38 = vld [vmem:[#allocation7 + $0x8] sm:$0xff]  }
0x14e1   :  { %v5662_v56 = vpop.permute.xlu1 %5661 }
0x14e2   :  { %5664 = vst.msk [vmem:[#allocation2 + $0x8] sm:$0xff] %vm1239_vm5, %v5662_v56 }
0x1567   :  { %v5928_v44 = vpop.f32.mrb[76].mxu1 }
0x1568   :  { %v5929_v4 = vadd.f32 %v10058_v21, %v5928_v44  ;;  %v8819_v61 = vpop.f32.mrb[77].mxu1  ;;  %v9383_v21 = vld [vmem:[#allocation7] sm:$0xff]   ;;  %v9408_v44 = vld [vmem:[#allocation7 + $0x50] sm:$0xff]  }
0x1569   :  { %v5931_v62 = vpop.f32.mrb[78].mxu1  ;;  %v9410_v61 = vld [vmem:[#allocation7 + $0x58] sm:$0xff]  }
0x156a   :  { %v5934_v63 = vmul.f32 0.2, %v5929_v4  ;;  %v8820_v0 = vpop.f32.mrb[79].mxu1  ;;  %v9411_v62 = vld [vmem:[#allocation7 + $0x18] sm:$0xff]  }
0x156b   :  { %v9413_v0 = vld [vmem:[#allocation7 + $0x20] sm:$0xff]  }
0x156c   :  { %v5935_v1 = vmax.f32 %v5929_v4, %v5934_v63  ;;  %v9409_v4 = vld [vmem:[#allocation7 + $0x10] sm:$0xff]   ;;  %v9412_v63 = vld [vmem:[#allocation7 + $0x60] sm:$0xff]  }
0x156e   :  { %5937 = vrot.lane.b32.xlu1 %v5935_v1, %s9692_s17  ;;  %v9414_v1 = vld [vmem:[#allocation7 + $0x68] sm:$0xff]  }
0x1587   :  { %v8477_v2 = vpop.f32.mrb[80].mxu1 }
0x1588   :  { %v8478_v5 = vpop.f32.mrb[81].mxu1 }
0x1589   :  { %v8479_v6 = vadd.f32 %v8478_v5, %v8477_v2  ;;  %v8480_v7 = vpop.f32.mrb[82].mxu1  ;;  %v9415_v2 = vld [vmem:[#allocation7 + $0x28] sm:$0xff]   ;;  %v9416_v5 = vld [vmem:[#allocation7 + $0x70] sm:$0xff]  }
0x158a   :  { %v8481_v8 = vpop.f32.mrb[83].mxu1  ;;  %v9418_v7 = vld [vmem:[#allocation7 + $0x78] sm:$0xff]  }
0x158b   :  { %v6120_v9 = vadd.f32 %v8479_v6, %v10105_v3  ;;  %v9417_v6 = vld [vmem:[#allocation7 + $0x30] sm:$0xff]   ;;  %v9419_v8 = vld [vmem:[#allocation7 + $0x38] sm:$0xff]  }
0x158d   :  { %v6125_v17 = vmul.f32 0.2, %v6120_v9 }
0x158f   :  { %v6126_v11 = vmax.f32 %v6120_v9, %v6125_v17  ;;  %v7828_v9 = vcombine.low %v6494_v55, %v6494_v55  ;;  %v9444_v55 = vld [vmem:[#allocation10] sm:$0xff]  }
0x1591   :  { %v6127_v13 = vpack.c.bf16 %v6126_v11, %v6126_v11  ;;  %v9423_v11 = vld [vmem:[#allocation10 + $0x8] sm:$0xff]  }
0x1593   :  { %8830 = vmatmul.mubr.msk.bf16.vlgmr.msra.gmra.mrb[88].mxu0 %vm362_vm1, %v6127_v13  ;;  %v9426_v13 = vld [vmem:[#allocation7 + $0x40] sm:$0xff]  }
0x1594   :  { %8489 = vmatpush3.bf16.msra.mxu0 %v9383_v21  ;;  %6393 = vmatprep.mubr.bf16.mxu0 %v7804_v12  ;;  %v9424_v21 = vld [vmem:[#allocation10 + $0x10] sm:$0xff]   ;;  %v9425_v12 = vld [vmem:[#allocation10 + $0x18] sm:$0xff]  }
0x1595   :  { %8490 = vmatprep.subr.bf16.mxu0 %v9384_v14 }
0x1598   :  { %8491 = vmatpush3.bf16.msra.mxu0 %v9385_v15 }
0x1599   :  { %8492 = vmatprep.subr.bf16.mxu0 %v9386_v16 }
0x159c   :  { %8493 = vmatpush3.bf16.msra.mxu0 %v9387_v18 }
0x159d   :  { %8494 = vmatprep.subr.bf16.mxu0 %v9388_v19 }
0x15a0   :  { %8495 = vmatpush3.bf16.msra.mxu0 %v9389_v20 }
0x15a1   :  { %8496 = vmatprep.subr.bf16.mxu0 %v9390_v22 }
0x15a4   :  { %8497 = vmatpush3.bf16.msra.mxu0 %v9391_v23 }
0x15a5   :  { %8498 = vmatprep.subr.bf16.mxu0 %v9392_v25 }
0x15a8   :  { %8499 = vmatpush3.bf16.msra.mxu0 %v9393_v27 }
0x15a9   :  { %8500 = vmatprep.subr.bf16.mxu0 %v9394_v26 }
0x15ac   :  { %8501 = vmatpush3.bf16.msra.mxu0 %v9395_v35 }
0x15ad   :  { %8502 = vmatprep.subr.bf16.mxu0 %v9396_v28 }
0x15b0   :  { %8503 = vmatpush3.bf16.msra.mxu0 %v9397_v29 }
0x15b1   :  { %8845 = vmatprep.subr.bf16.mxu0 %v9688_v36 }
0x15b3   :  { %6394 = vmatmul.mubr.bf16.vlgmr.msra.gmra.mrb[92].mxu0 %v7803_v30  ;;  %v6770_v30 = vld [vmem:[#allocation4 + $0xc0] sm:$0xff] }
0x15b4   :  { %8853 = vmatprep.mubr.msk.bf16.mxu0 %vm9689_vm0, %v9688_v36  ;;  %8846 = vmatpush3.bf16.msra.mxu0 %v9422_v10  ;;  %v7854_v33 = vcombine.high %v6770_v30, %v6770_v30  ;;  %v9703_v10 = vmov 0  }
0x15b5   :  { %8847 = vmatprep.subr.bf16.mxu0 %v9688_v36 }
0x15b8   :  { %8848 = vmatpush3.bf16.msra.mxu0 %v9423_v11  ;;  %v9449_v11 = vld [vmem:[#allocation13 + $0x8] sm:$0xff]  }
0x15b9   :  { %8849 = vmatprep.subr.bf16.mxu0 %v9688_v36 }
0x15bc   :  { %8850 = vmatpush3.bf16.msra.mxu0 %v9424_v21  ;;  %v9450_v21 = vld [vmem:[#allocation13 + $0x10] sm:$0xff]  }
0x15bd   :  { %8851 = vmatprep.subr.bf16.mxu0 %v9688_v36 }
0x15c0   :  { %8852 = vmatpush3.bf16.msra.mxu0 %v9425_v12  ;;  %v9451_v12 = vld [vmem:[#allocation13 + $0x18] sm:$0xff]  }
0x15c1   :  { %8542 = vmatprep.subr.bf16.mxu0 %v9426_v13  ;;  %v9453_v13 = vld [vmem:[#allocation13 + $0x28] sm:$0xff]  }
0x15e0   :  { %v5938_v31 = vpop.permute.xlu1 %5937 }
0x15e1   :  { %5940 = vst.msk [vmem:[#allocation2 + $0x8] sm:$0xff] %vm1516_vm6, %v5938_v31 }
0x1666   :  { %v6204_v40 = vpop.f32.mrb[88].mxu0 }
0x1667   :  { %v6205_v41 = vadd.f32 %v10116_v39, %v6204_v40  ;;  %v8831_v42 = vpop.f32.mrb[89].mxu0  ;;  %v9430_v40 = vld [vmem:[#allocation7 + $0x50] sm:$0xff]  }
0x1668   :  { %v6207_v43 = vpop.f32.mrb[90].mxu0  ;;  %v9432_v42 = vld [vmem:[#allocation7 + $0x58] sm:$0xff]  }
0x1669   :  { %v6210_v45 = vmul.f32 0.2, %v6205_v41  ;;  %v8832_v54 = vpop.f32.mrb[91].mxu0  ;;  %v9433_v43 = vld [vmem:[#allocation7 + $0x18] sm:$0xff]  }
0x166a   :  { %v9435_v54 = vld [vmem:[#allocation7 + $0x20] sm:$0xff]  }
0x166b   :  { %v6211_v53 = vmax.f32 %v6205_v41, %v6210_v45  ;;  %v9431_v41 = vld [vmem:[#allocation7 + $0x10] sm:$0xff]   ;;  %v9434_v45 = vld [vmem:[#allocation7 + $0x60] sm:$0xff]  }
0x166d   :  { %6213 = vrot.lane.b32.xlu1 %v6211_v53, %s9693_s18  ;;  %v9436_v53 = vld [vmem:[#allocation7 + $0x68] sm:$0xff]  }
0x1686   :  { %v8504_v46 = vpop.f32.mrb[92].mxu0 }
0x1687   :  { %v8505_v47 = vpop.f32.mrb[93].mxu0 }
0x1688   :  { %v8506_v48 = vadd.f32 %v8505_v47, %v8504_v46  ;;  %v8507_v49 = vpop.f32.mrb[94].mxu0  ;;  %v9437_v46 = vld [vmem:[#allocation7 + $0x28] sm:$0xff]   ;;  %v9438_v47 = vld [vmem:[#allocation7 + $0x70] sm:$0xff]  }
0x1689   :  { %v8508_v50 = vpop.f32.mrb[95].mxu0  ;;  %v9440_v49 = vld [vmem:[#allocation7 + $0x78] sm:$0xff]  }
0x168a   :  { %v6396_v51 = vadd.f32 %v8506_v48, %v10105_v3  ;;  %v9439_v48 = vld [vmem:[#allocation7 + $0x30] sm:$0xff]   ;;  %v9441_v50 = vld [vmem:[#allocation7 + $0x38] sm:$0xff]  }
0x168c   :  { %v6401_v52 = vmul.f32 0.2, %v6396_v51 }
0x168e   :  { %v6402_v56 = vmax.f32 %v6396_v51, %v6401_v52  ;;  %v7853_v51 = vcombine.low %v6770_v30, %v6770_v30 }
0x1690   :  { %v6403_v24 = vpack.c.bf16 %v6402_v56, %v6402_v56  ;;  %v9445_v56 = vld [vmem:[#allocation10 + $0x8] sm:$0xff]  }
0x1692   :  { %8842 = vmatmul.mubr.msk.bf16.vlgmr.msra.gmra.mrb[84].mxu1 %vm362_vm1, %v6403_v24 }
0x1693   :  { %8516 = vmatpush3.bf16.msra.mxu1 %v9405_v57  ;;  %6669 = vmatprep.mubr.bf16.mxu1 %v7829_v58  ;;  %v9446_v57 = vld [vmem:[#allocation10 + $0x10] sm:$0xff]   ;;  %v9447_v58 = vld [vmem:[#allocation10 + $0x18] sm:$0xff]  }
0x1694   :  { %8517 = vmatprep.subr.bf16.mxu1 %v9406_v59 }
0x1697   :  { %8518 = vmatpush3.bf16.msra.mxu1 %v9407_v60 }
0x1698   :  { %8519 = vmatprep.subr.bf16.mxu1 %v9408_v44 }
0x169b   :  { %8520 = vmatpush3.bf16.msra.mxu1 %v9409_v4 }
0x169c   :  { %8521 = vmatprep.subr.bf16.mxu1 %v9410_v61 }
0x169f   :  { %8522 = vmatpush3.bf16.msra.mxu1 %v9411_v62 }
0x16a0   :  { %8523 = vmatprep.subr.bf16.mxu1 %v9412_v63 }
0x16a3   :  { %8524 = vmatpush3.bf16.msra.mxu1 %v9413_v0 }
0x16a4   :  { %8525 = vmatprep.subr.bf16.mxu1 %v9414_v1 }
0x16a7   :  { %8526 = vmatpush3.bf16.msra.mxu1 %v9415_v2 }
0x16a8   :  { %8527 = vmatprep.subr.bf16.mxu1 %v9416_v5 }
0x16ab   :  { %8528 = vmatpush3.bf16.msra.mxu1 %v9417_v6 }
0x16ac   :  { %8529 = vmatprep.subr.bf16.mxu1 %v9418_v7 }
0x16af   :  { %8530 = vmatpush3.bf16.msra.mxu1 %v9419_v8 }
0x16b0   :  { %8857 = vmatprep.subr.bf16.mxu1 %v9688_v36 }
0x16b2   :  { %6670 = vmatmul.mubr.bf16.vlgmr.msra.gmra.mrb[88].mxu1 %v7828_v9 }
0x16b3   :  { %8865 = vmatprep.mubr.msk.bf16.mxu1 %vm9689_vm0, %v9688_v36  ;;  %8858 = vmatpush3.bf16.msra.mxu1 %v9444_v55  ;;  %vm7160_vm0 = vcmask 1043456  }
0x16b4   :  { %8859 = vmatprep.subr.bf16.mxu1 %v9688_v36 }
0x16b7   :  { %8860 = vmatpush3.bf16.msra.mxu1 %v9445_v56 }
0x16b8   :  { %8861 = vmatprep.subr.bf16.mxu1 %v9688_v36 }
0x16bb   :  { %8862 = vmatpush3.bf16.msra.mxu1 %v9446_v57 }
0x16bc   :  { %8863 = vmatprep.subr.bf16.mxu1 %v9688_v36 }
0x16bf   :  { %8864 = vmatpush3.bf16.msra.mxu1 %v9447_v58 }
0x16c0   :  { %7164 = vmatprep.subr.bf16.mxu1 %v9703_v10 }
0x16df   :  { %v6214_v17 = vpop.permute.xlu1 %6213 }
0x16e0   :  { %6216 = vst.msk [vmem:[#allocation2 + $0x8] sm:$0xff] %vm1793_vm7, %v6214_v17  ;;  %v9448_v17 = vld [vmem:[#allocation13] sm:$0xff]  }
0x1765   :  { %v6480_v14 = vpop.f32.mrb[84].mxu1 }
0x1766   :  { %v6481_v15 = vadd.f32 %v10116_v39, %v6480_v14  ;;  %v8843_v16 = vpop.f32.mrb[85].mxu1  ;;  %v9454_v14 = vld [vmem:[#allocation13 + $0x30] sm:$0xff]  }
0x1767   :  { %v6483_v18 = vpop.f32.mrb[86].mxu1  ;;  %v9456_v16 = vld [vmem:[#allocation13 + $0x40] sm:$0xff]  }
0x1768   :  { %v6486_v19 = vmul.f32 0.2, %v6481_v15  ;;  %v8844_v20 = vpop.f32.mrb[87].mxu1  ;;  %v9457_v18 = vld [vmem:[#allocation13 + $0x48] sm:$0xff]  }
0x1769   :  { %v9459_v20 = vld [vmem:[#allocation13 + $0x58] sm:$0xff]  }
0x176a   :  { %v6487_v22 = vmax.f32 %v6481_v15, %v6486_v19  ;;  %v9455_v15 = vld [vmem:[#allocation13 + $0x38] sm:$0xff]   ;;  %v9458_v19 = vld [vmem:[#allocation13 + $0x50] sm:$0xff]  }
0x176c   :  { %6489 = vrot.lane.b32.xlu1 %v6487_v22, %s9694_s19  ;;  %v9460_v22 = vld [vmem:[#allocation13 + $0x60] ss:$0 sps:$4 sm:$0xff]  }
0x1785   :  { %v8531_v23 = vpop.f32.mrb[88].mxu1 }
0x1786   :  { %v8532_v25 = vpop.f32.mrb[89].mxu1 }
0x1787   :  { %v8533_v27 = vadd.f32 %v8532_v25, %v8531_v23  ;;  %v8534_v26 = vpop.f32.mrb[90].mxu1  ;;  %v7162_v23 = vsel %vm7160_vm0, %v9460_v22, 0 }
0x1788   :  { %v8535_v35 = vpop.f32.mrb[91].mxu1 }
0x1789   :  { %v6672_v28 = vadd.f32 %v8533_v27, %v10105_v3 }
0x178b   :  { %v6677_v29 = vmul.f32 0.2, %v6672_v28 }
0x178d   :  { %v6678_v31 = vmax.f32 %v6672_v28, %v6677_v29 }
0x178f   :  { %v6679_v34 = vpack.c.bf16 %v6678_v31, %v6678_v31 }
0x1791   :  { %8854 = vmatmul.mubr.msk.bf16.vlgmr.msra.gmra.mrb[96].mxu0 %vm362_vm1, %v6679_v34 }
0x1792   :  { %8543 = vmatpush3.bf16.msra.mxu0 %v9427_v32  ;;  %6945 = vmatprep.mubr.bf16.mxu0 %v7854_v33  ;;  %v7045_v32 = vld [vmem:[#allocation2] sm:$0xff] }
0x1793   :  { %8544 = vmatprep.subr.bf16.mxu0 %v9428_v37  ;;  %v7047_v37 = vpack.c.bf16 %v7045_v32, %v7045_v32 }
0x1796   :  { %8545 = vmatpush3.bf16.msra.mxu0 %v9429_v38  ;;  %v7877_v38 = vld [vmem:[#allocation15] ss:$0 sm:$0xff] }
0x1797   :  { %8546 = vmatprep.subr.bf16.mxu0 %v9430_v40 }
0x179a   :  { %8547 = vmatpush3.bf16.msra.mxu0 %v9431_v41 }
0x179b   :  { %8548 = vmatprep.subr.bf16.mxu0 %v9432_v42 }
0x179e   :  { %8549 = vmatpush3.bf16.msra.mxu0 %v9433_v43 }
0x179f   :  { %8550 = vmatprep.subr.bf16.mxu0 %v9434_v45 }
0x17a2   :  { %8551 = vmatpush3.bf16.msra.mxu0 %v9435_v54  ;;  %v7892_v54 = vld [vmem:[#allocation16] ss:$0 sm:$0xff] }
0x17a3   :  { %8552 = vmatprep.subr.bf16.mxu0 %v9436_v53 }
0x17a6   :  { %8553 = vmatpush3.bf16.msra.mxu0 %v9437_v46 }
0x17a7   :  { %8554 = vmatprep.subr.bf16.mxu0 %v9438_v47 }
0x17aa   :  { %8555 = vmatpush3.bf16.msra.mxu0 %v9439_v48  ;;  %v7893_v48 = vld [vmem:[#allocation3] ss:$0 sm:$0xff] }
0x17ab   :  { %8556 = vmatprep.subr.bf16.mxu0 %v9440_v49 }
0x17ae   :  { %8557 = vmatpush3.bf16.msra.mxu0 %v9441_v50 }
0x17b1   :  { %6946 = vmatmul.mubr.bf16.vlgmr.msra.gmra.mrb[100].mxu0 %v7853_v51 }
0x17de   :  { %v6490_v52 = vpop.permute.xlu1 %6489 }
0x17df   :  { %6492 = vst.msk [vmem:[#allocation2 + $0x8] sm:$0xff] %vm2070_vm8, %v6490_v52 }
0x1864   :  { %v6756_v24 = vpop.f32.mrb[96].mxu0 }
0x1865   :  { %v6757_v59 = vadd.f32 %v10116_v39, %v6756_v24  ;;  %v8855_v60 = vpop.f32.mrb[97].mxu0 }
0x1866   :  { %v6759_v44 = vpop.f32.mrb[98].mxu0 }
0x1867   :  { %v6762_v4 = vmul.f32 0.2, %v6757_v59  ;;  %v8856_v61 = vpop.f32.mrb[99].mxu0 }
0x1869   :  { %v6763_v62 = vmax.f32 %v6757_v59, %v6762_v4 }
0x186b   :  { %6765 = vrot.lane.b32.xlu1 %v6763_v62, %s9695_s22 }
0x1884   :  { %v8558_v63 = vpop.f32.mrb[100].mxu0 }
0x1885   :  { %v8559_v0 = vpop.f32.mrb[101].mxu0 }
0x1886   :  { %v8560_v1 = vadd.f32 %v8559_v0, %v8558_v63  ;;  %v8561_v2 = vpop.f32.mrb[102].mxu0 }
0x1887   :  { %v8562_v5 = vpop.f32.mrb[103].mxu0 }
0x1888   :  { %v6948_v6 = vadd.f32 %v8560_v1, %v10105_v3  ;;  %v9452_v3 = vld [vmem:[#allocation13 + $0x20] sm:$0xff]  }
0x188a   :  { %v6953_v36 = vmul.f32 0.2, %v6948_v6 }
0x188c   :  { %v6954_v7 = vmax.f32 %v6948_v6, %v6953_v36 }
0x188e   :  { %v6955_v8 = vpack.c.bf16 %v6954_v7, %v6954_v7 }
0x1890   :  { %8866 = vmatmul.mubr.msk.bf16.vlgmr.msra.gmra.mrb[92].mxu1 %vm362_vm1, %v6955_v8  ;;  %vm7156_vm1 = vcmask 588800  }
0x1891   :  { %7165 = vmatpush1.bf16.msra.mxu1 %v9448_v17 }
0x1892   :  { %7166 = vmatprep.subr.bf16.mxu1 %v9703_v10 }
0x1895   :  { %7167 = vmatpush1.bf16.msra.mxu1 %v9449_v11 }
0x1896   :  { %7168 = vmatprep.subr.bf16.mxu1 %v9703_v10 }
0x1899   :  { %7169 = vmatpush1.bf16.msra.mxu1 %v9450_v21 }
0x189a   :  { %7170 = vmatprep.subr.bf16.mxu1 %v9703_v10 }
0x189d   :  { %7171 = vmatpush1.bf16.msra.mxu1 %v9451_v12 }
0x189e   :  { %7172 = vmatprep.subr.bf16.mxu1 %v9703_v10 }
0x18a1   :  { %7173 = vmatpush1.bf16.msra.mxu1 %v9452_v3 }
0x18a2   :  { %7174 = vmatprep.subr.bf16.mxu1 %v9703_v10 }
0x18a5   :  { %7175 = vmatpush1.bf16.msra.mxu1 %v9453_v13 }
0x18a6   :  { %7176 = vmatprep.subr.bf16.mxu1 %v9703_v10 }
0x18a9   :  { %7177 = vmatpush1.bf16.msra.mxu1 %v9454_v14 }
0x18aa   :  { %7178 = vmatprep.subr.bf16.mxu1 %v9703_v10 }
0x18ad   :  { %7179 = vmatpush1.bf16.msra.mxu1 %v9455_v15 }
0x18ae   :  { %7180 = vmatprep.subr.bf16.mxu1 %v9703_v10 }
0x18b1   :  { %7181 = vmatpush1.bf16.msra.mxu1 %v9456_v16 }
0x18b2   :  { %7182 = vmatprep.subr.bf16.mxu1 %v9703_v10 }
0x18b5   :  { %7183 = vmatpush1.bf16.msra.mxu1 %v9457_v18 }
0x18b6   :  { %7184 = vmatprep.subr.bf16.mxu1 %v9703_v10 }
0x18b9   :  { %7185 = vmatpush1.bf16.msra.mxu1 %v9458_v19 }
0x18ba   :  { %7186 = vmatprep.subr.bf16.mxu1 %v9703_v10 }
0x18bd   :  { %7187 = vmatpush1.bf16.msra.mxu1 %v9459_v20 }
0x18be   :  { %7188 = vmatprep.subr.bf16.mxu1 %v9703_v10 }
0x18c1   :  { %7189 = vmatpush1.bf16.msra.mxu1 %v7162_v23 }
0x18dd   :  { %v6766_v9 = vpop.permute.xlu1 %6765 }
0x18de   :  { %6768 = vst.msk [vmem:[#allocation2 + $0x8] sm:$0xff] %vm2347_vm9, %v6766_v9 }
0x1963   :  { %v7032_v25 = vpop.f32.mrb[92].mxu1 }
0x1964   :  { %v7033_v27 = vadd.f32 %v10116_v39, %v7032_v25  ;;  %v8867_v26 = vpop.f32.mrb[93].mxu1 }
0x1965   :  { %v7035_v35 = vpop.f32.mrb[94].mxu1 }
0x1966   :  { %v7038_v28 = vmul.f32 0.2, %v7033_v27  ;;  %v8868_v29 = vpop.f32.mrb[95].mxu1 }
0x1968   :  { %v7039_v30 = vmax.f32 %v7033_v27, %v7038_v28 }
0x196a   :  { %7041 = vrot.lane.b32.xlu1 %v7039_v30, %s9677_s20  ;;  %s9704_s20 = smov [#allocation18]  }
0x196b   :  { %s7239_s21 = sshll.u32 %s9704_s20, 4  ;;  %s7240_s21 = int_to_ptr.vmem [resolvable:$true] %s7239_s21 }
0x196c   :  { %s9642_s4 = scalar_lea.vmem %s7240_s21, 128  ;;  %p9647_p9 = scmp.lt.s32.totalorder %s7240_s21, %s7240_s21 }
0x196d   :  { %p9643_p8 = scmp.ne.s32.totalorder %s7240_s21, %s9642_s4  ;;  %p9648_p10 = scmp.lt.s32.totalorder %s9642_s4, %s9642_s4 }
0x196f   :  { %p9649_p11 = por %p9648_p10, %p9647_p9 }
0x1971   :  { %p9650_p12 = pnand %p9649_p11, %p9643_p8 }
0x19dc   :  { %v7042_v31 = vpop.permute.xlu1 %7041 }
0x19dd   :  { %7044 = vst.msk [vmem:[#allocation2 + $0x8] sm:$0xff] %vm2624_vm10, %v7042_v31 }
0x19e4   :  { %v7046_v33 = vld [vmem:[#allocation2 + $0x8] sm:$0xff] }
0x19e5   :  { %v7048_v34 = vpack.c.bf16 %v7046_v33, %v7046_v33 }
0x19e7   :  { %7891 = vmatprep.mubr.msk.bf16.mxu1 %vm7156_vm1, %v7048_v34 }
0x19e8   :  { %7197 = vmatmul.mubr.bf16.vlgmr.msra.gmra.mrb[96].mxu1 %v7047_v37 }
0x1abb   :  { %v7198_v39 = vpop.f32.mrb[96].mxu1 }
0x1abc   :  { %v7199_v40 = vadd.f32 %v7877_v38, %v7198_v39  ;;  %v7200_v41 = vpop.f32.mrb[97].mxu1 }
0x1abd   :  { %v7201_v42 = vpop.f32.mrb[98].mxu1 }
0x1abe   :  { %v7204_v43 = vmul.f32 0.2, %v7199_v40  ;;  %v7202_v45 = vpop.f32.mrb[99].mxu1 }
0x1ac0   :  { %v7205_v53 = vmax.f32 %v7199_v40, %v7204_v43 }
0x1ac2   :  { %v7213_v46 = vmul.f32 %v7892_v54, %v7205_v53 }
0x1ac4   :  { %v7215_v47 = vsel %vm7214_vm2, %v7213_v46, 0.0 }
0x1ac5   :  { %7216 = vadd.xlane.f32.xlu1 %v7215_v47 }
0x1b52   :  { %v7217_v49 = vpop.xlane.xlu1 %7216 }
0x1b53   :  { %v7225_v50 = vadd.f32 %v7893_v48, %v7217_v49 }
0x1b55   :  { %v7226_v51 = vsub.f32 0.0, %v7225_v50 }
0x1b57   :  { %v7227_v52 = vmul.f32 1.442695, %v7226_v51 }
0x1b59   :  { %9461 = vpow2.f32 %v7227_v52 }
0x1b63   :  { %v9462_v55 = vpop.eup %9461 }
0x1b64   :  { %v7229_v56 = vadd.f32 1.0, %v9462_v55 }
0x1b66   :  { %9463 = vrcp.f32 %v7229_v56 }
0x1b70   :  { %v9464_v57 = vpop.eup %9463 }
0x1b71   :  { %7232 = vst.msk [vmem:[#allocation18] sm:$0xff] %vm7231_vm3, %v9464_v57 }
0x1b72   :  { %9653 = shalt.err (!%p9650_p12)
}
0x1b73   :  { %s9654_s30 = scalar_lea.hbm %s10166_s9, 128 }
0x1b74   :  { %p9655_p13 = scmp.ne.s32.totalorder %s10166_s9, %s9654_s30  ;;  %p9658_p0 = scmp.lt.u32.totalorder %s9654_s30, %s10166_s9 }
0x1b76   :  { %p9660_p1 = pnand %p9658_p0, %p9655_p13 }
0x1b78   :  { %9663 = shalt.err (!%p9660_p1)
}
0x1b79   :  { %7242 = dma.vmem_to_hbm [thread:$0]  %s7240_s21, 128, %s10166_s9, [#allocation6]  }
0x1b7a   :  { %9674 = dma.done.wait [#allocation6], 128  }
0x1b7b   :  { %9675 = vsyncadd [#allocation6], 4294967168 }
0x1b7c   :  { %7246 = vsyncpa [#allocation5], 1 }
0x1b7d   :  { %7247 = vsyncpa [#allocation8], 1 }
0x1b7e   :  { %7248 = vsyncpa [#allocation11], 1 }
0x1b7f   :  { %7249 = vsyncpa [#allocation14], 1 }
0x1b80   :  { %7250 = vsyncpa [#allocation17], 1 }
0x1b81   :  { %7251 = vsyncpa [#allocation6], 1 }

</bundles_post_ra>
